<compile_context>
chip_gen: v6e
topology: v6e:2x2x1
jax: 0.10.0
libtpu: 0.0.40
codegen_flags: <defaults>
</compile_context>

<pallas_src>
import functools

import jax
import jax.numpy as jnp
from jax.experimental import pallas as pl
from jax.experimental.pallas import tpu as pltpu  # noqa: F401  (TPU backend assumed)


# ----------------------------- Pallas kernels -----------------------------

def _gemm_kernel(x_ref, w_ref, *rest, act, pre_relu, has_bias, has_res, res_relu):
    """o = act(maybe_relu(x) @ w + b) [+ maybe_relu(res)].  bf16 MXU, f32 acc."""
    o_ref = rest[-1]
    i = 0
    x = x_ref[...]
    if pre_relu:                       # relu folded from the previous layer
        x = jnp.maximum(x, 0.0)
    y = jnp.dot(x.astype(jnp.bfloat16), w_ref[...].astype(jnp.bfloat16),
                preferred_element_type=jnp.float32)
    if has_bias:
        y = y + rest[i][...]
        i += 1
    if act == "relu":
        y = jnp.maximum(y, 0.0)
    if has_res:                        # fused residual add (ResidualLayer)
        r = rest[i][...]
        i += 1
        if res_relu:
            r = jnp.maximum(r, 0.0)
        y = y + r
    o_ref[...] = y.astype(o_ref.dtype)


def pallas_linear(x, w, b=None, act="none", pre_relu=False,
                  residual=None, res_relu=False):
    """Single-block fused GEMM.  x:(M,K) w:(K,N) -> (M,N) f32."""
    M, _ = x.shape
    N = w.shape[1]
    args = [x, w]
    if b is not None:
        args.append(b.reshape(1, N))
    if residual is not None:
        args.append(residual)
    kern = functools.partial(
        _gemm_kernel, act=act, pre_relu=pre_relu,
        has_bias=b is not None, has_res=residual is not None, res_relu=res_relu)
    return pl.pallas_call(
        kern, out_shape=jax.ShapeDtypeStruct((M, N), jnp.float32))(*args)


def _vq_pool_kernel(z_ref, ww_ref, we_ref, wb_ref, o_ref, *, pool):
    """Codebook GEMM + nearest-codebook lookup + global average pool, fused.

    z_ref: (M, D) flattened z_e rows (M = n_img * pool, NHWC row order).
    ww_ref: (K, n_words) weights_map, we_ref: (n_words, D) word embeddings,
    wb_ref: (K, 1) weights_map bias.  Output: pooled (n_img, D).
    """
    z = z_ref[...]                                                     # (M, D)
    # codebook = weights_map(word_embs.T).T  ==  W_map @ word_embs + b[:, None]
    cb = jnp.dot(ww_ref[...], we_ref[...],
                 preferred_element_type=jnp.float32) + wb_ref[...]     # (K, D)
    # ||cb_k||^2 laid out along lanes without an explicit transpose:
    gram = jax.lax.dot_general(cb, cb, (((1,), (1,)), ((), ())),
                               preferred_element_type=jnp.float32)     # (K, K)
    K = gram.shape[0]
    eye = (jax.lax.broadcasted_iota(jnp.int32, (K, K), 0)
           == jax.lax.broadcasted_iota(jnp.int32, (K, K), 1))
    cbn = jnp.sum(jnp.where(eye, gram, 0.0), axis=0, keepdims=True)    # (1, K)
    # ||z||^2 is constant per row -> dropped, argmin unchanged.
    score = cbn - 2.0 * jax.lax.dot_general(
        z, cb, (((1,), (1,)), ((), ())), preferred_element_type=jnp.float32)
    kiota = jax.lax.broadcasted_iota(jnp.int32, score.shape, 1)
    smin = jnp.min(score, axis=-1, keepdims=True)
    idx = jnp.min(jnp.where(score == smin, kiota, K), axis=-1,
                  keepdims=True)                      # first argmin (torch tie-break)
    onehot = (kiota == idx).astype(jnp.float32)                        # (M, K)
    # group rows by image and average the selected codebook vectors:
    M = score.shape[0]
    n_img = M // pool
    row = jax.lax.broadcasted_iota(jnp.int32, (n_img, M), 0)
    col = jax.lax.broadcasted_iota(jnp.int32, (n_img, M), 1)
    pmat = ((col >= row * pool) & (col < (row + 1) * pool)).astype(jnp.float32)
    counts = jnp.dot(pmat, onehot, preferred_element_type=jnp.float32)  # (n_img, K)
    o_ref[...] = (jnp.dot(counts, cb, preferred_element_type=jnp.float32)
                  * (1.0 / pool)).astype(o_ref.dtype)


def pallas_vq_pool(z_flat, wmap_w, word_embs, wmap_b, pool):
    M, D = z_flat.shape
    n_img = M // pool
    return pl.pallas_call(
        functools.partial(_vq_pool_kernel, pool=pool),
        out_shape=jax.ShapeDtypeStruct((n_img, D), jnp.float32),
    )(z_flat, wmap_w, word_embs, wmap_b.reshape(-1, 1))


def _heads_kernel(x_ref, a1w, a1b, a2w, a2b, c1w, c1b, c2w, c2b, c3w, c3b,
                  logp_ref, val_ref):
    """Fused DiscreteActor (log-softmax output) + 3-layer critic MLP."""
    def gemm(h, w_ref, b_ref):
        return jnp.dot(h.astype(jnp.bfloat16), w_ref[...].astype(jnp.bfloat16),
                       preferred_element_type=jnp.float32) + b_ref[...]

    def ln_relu(y):  # nn.LayerNorm(elementwise_affine=False) + ReLU, f32
        mu = jnp.mean(y, axis=-1, keepdims=True)
        var = jnp.mean((y - mu) ** 2, axis=-1, keepdims=True)
        return jnp.maximum((y - mu) * jax.lax.rsqrt(var + 1e-5), 0.0)

    x = x_ref[...]
    # ---- actor: Linear -> LN -> ReLU -> Linear -> stable log-softmax ----
    a = ln_relu(gemm(x, a1w, a1b))
    logits = gemm(a, a2w, a2b)
    logits = logits - jnp.max(logits, axis=-1, keepdims=True)
    logp_ref[...] = logits - jnp.log(jnp.sum(jnp.exp(logits), axis=-1,
                                             keepdims=True))
    # ---- critic: (Linear -> LN -> ReLU) x2 -> Linear ----
    c = ln_relu(gemm(x, c1w, c1b))
    c = ln_relu(gemm(c, c2w, c2b))
    val_ref[...] = gemm(c, c3w, c3b)


def pallas_heads(feat, p, action_dim):
    bs = feat.shape[0]
    return pl.pallas_call(
        _heads_kernel,
        out_shape=(jax.ShapeDtypeStruct((bs, action_dim), jnp.float32),
                   jax.ShapeDtypeStruct((bs, 1), jnp.float32)),
    )(feat,
      p["act_fc1_w"], p["act_fc1_b"].reshape(1, -1),
      p["act_fc2_w"], p["act_fc2_b"].reshape(1, -1),
      p["cr_fc1_w"], p["cr_fc1_b"].reshape(1, -1),
      p["cr_fc2_w"], p["cr_fc2_b"].reshape(1, -1),
      p["cr_fc3_w"], p["cr_fc3_b"].reshape(1, -1))


# ----------------------------- conv glue (im2col, NHWC) -----------------------------

def _im2col_nhwc(x, kh, kw, stride, pad):
    """x: (N,H,W,C) -> (N*Ho*Wo, kh*kw*C); feature order (kh, kw, C)."""
    if pad:
        x = jnp.pad(x, ((0, 0), (pad, pad), (pad, pad), (0, 0)))
    N, H, W, C = x.shape
    Ho = (H - kh) // stride + 1
    Wo = (W - kw) // stride + 1
    cols = []
    for i in range(kh):
        for j in range(kw):
            cols.append(x[:, i:i + stride * Ho:stride, j:j + stride * Wo:stride, :])
    patches = jnp.stack(cols, axis=3)                 # (N, Ho, Wo, kh*kw, C)
    return patches.reshape(N * Ho * Wo, kh * kw * C), (N, Ho, Wo)


def conv2d(x, w, b, stride, pad, act="none", pre_relu=False,
           residual=None, res_relu=False):
    """PyTorch-semantics Conv2d.  x NHWC, w torch layout (O,I,kh,kw) -> NHWC."""
    # TODO(synk): im2col patch extraction stays in XLA; at the real model size
    # it should move into the Pallas K-loop (strided DMA per (kh,kw) tap).
    O, C, kh, kw = w.shape
    patches, (N, Ho, Wo) = _im2col_nhwc(x, kh, kw, stride, pad)
    wm = jnp.transpose(w, (2, 3, 1, 0)).reshape(kh * kw * C, O)
    res2 = None if residual is None else residual.reshape(N * Ho * Wo, O)
    y = pallas_linear(patches, wm, b, act=act, pre_relu=pre_relu,
                      residual=res2, res_relu=res_relu)
    return y.reshape(N, Ho, Wo, O)                    # stays NHWC


# ----------------------------- parameters -----------------------------

def init_params(key, *, action_dim, hidden_dim=32, res_h_dim=32,
                n_words=16, n_e=10, channel_scale=1):
    keys = iter(jax.random.split(key, 40))

    def w(shape, scale=0.1):
        return scale * jax.random.normal(next(keys), shape, jnp.float32)

    def zeros(shape):
        return jnp.zeros(shape, jnp.float32)

    h2 = hidden_dim // 2
    c1 = 16 * channel_scale
    c2 = 32 * channel_scale
    imp_feat = c2 * 2 * 2  # flattened Impala features for an 8x8 observation

    return {
        # VQVAE encoder
        "enc_c1_w": w((h2, 3, 3, 3)), "enc_c1_b": zeros((h2,)),
        "enc_c2_w": w((hidden_dim, h2, 3, 3)), "enc_c2_b": zeros((hidden_dim,)),
        "enc_c3_w": w((hidden_dim, hidden_dim, 2, 2)), "enc_c3_b": zeros((hidden_dim,)),
        # residual layer (shared across the 2-layer stack, bias=False)
        "res_c1_w": w((res_h_dim, hidden_dim, 3, 3)),
        "res_c2_w": w((hidden_dim, res_h_dim, 1, 1)),
        # pre-quantization 1x1 conv
        "pq_w": w((hidden_dim, hidden_dim, 1, 1)), "pq_b": zeros((hidden_dim,)),
        # vector quantizer (synthetic stand-in for TransfoXL word embeddings)
        "word_embs": w((n_words, hidden_dim), scale=1.0),
        "wmap_w": w((n_e, n_words)), "wmap_b": zeros((n_e,)),
        # SmallImpalaCNN (8x8 obs -> kernels 4/2, strides 2/1)
        "imp_c1_w": w((c1, 3, 4, 4)), "imp_c1_b": zeros((c1,)),
        "imp_c2_w": w((c2, c1, 2, 2)), "imp_c2_b": zeros((c2,)),
        "imp_fc_w": w((imp_feat, hidden_dim)), "imp_fc_b": zeros((hidden_dim,)),
        # actor: Linear(2h,128) LN ReLU Linear(128,A) Softmax
        "act_fc1_w": w((2 * hidden_dim, 128)), "act_fc1_b": zeros((128,)),
        "act_fc2_w": w((128, action_dim)), "act_fc2_b": zeros((action_dim,)),
        # critic: Linear(2h,1024) LN ReLU Linear(1024,512) LN ReLU Linear(512,1)
        "cr_fc1_w": w((2 * hidden_dim, 1024)), "cr_fc1_b": zeros((1024,)),
        "cr_fc2_w": w((1024, 512)), "cr_fc2_b": zeros((512,)),
        "cr_fc3_w": w((512, 1)), "cr_fc3_b": zeros((1,)),
    }


# ----------------------------- forward pass -----------------------------

def llm_agent_forward(params, states, sample_key):
    """states: (bs, seqlen, 3, H, W) float32 -> (action, values, log_prob)."""
    bs, seqlen, C, H, W = states.shape
    # single up-front layout change; everything downstream stays channel-last
    states_nhwc = jnp.transpose(states, (0, 1, 3, 4, 2))
    x = states_nhwc.reshape(bs * seqlen, H, W, C)

    # ---- VQVAE.calculate_zq: Encoder ----
    h = conv2d(x, params["enc_c1_w"], params["enc_c1_b"], 2, 1, act="relu")
    h = conv2d(h, params["enc_c2_w"], params["enc_c2_b"], 2, 1, act="relu")
    h = conv2d(h, params["enc_c3_w"], params["enc_c3_b"], 1, 1, act="none")
    # ResidualStack: the SAME ResidualLayer applied twice (shared weights).
    # torch's in-place nn.ReLU(True) means: h <- relu(h) + conv2(relu(conv1(relu(h))))
    for _ in range(2):
        r = conv2d(h, params["res_c1_w"], None, 1, 1, act="relu", pre_relu=True)
        h = conv2d(r, params["res_c2_w"], None, 1, 0, act="none",
                   residual=h, res_relu=True)
    # final F.relu of the stack is folded into the 1x1 pre-quantization conv
    z_e = conv2d(h, params["pq_w"], params["pq_b"], 1, 0, act="none", pre_relu=True)

    # ---- VectorQuantizer + F.avg_pool2d(z_q, z_q.shape[-1], 1), fused ----
    N, Hq, Wq, D = z_e.shape
    assert Hq == Wq  # global-mean equivalence of the avg_pool only holds then
    pooled = pallas_vq_pool(z_e.reshape(N * Hq * Wq, D),
                            params["wmap_w"], params["word_embs"],
                            params["wmap_b"], pool=Hq * Wq)          # (N, D)
    encoded = pooled.reshape(bs, seqlen, D)

    # ---- SmallImpalaCNN on the last frame ----
    s2 = states_nhwc[:, -1]                                          # (bs,H,W,3)
    t = conv2d(s2, params["imp_c1_w"], params["imp_c1_b"], 2, 0, act="relu")
    t = conv2d(t, params["imp_c2_w"], params["imp_c2_b"], 1, 0, act="relu")
    t = jnp.transpose(t, (0, 3, 1, 2)).reshape(bs, -1)   # torch (C,H,W) flatten order
    time_encoded = pallas_linear(t, params["imp_fc_w"], params["imp_fc_b"],
                                 act="relu")

    # TODO(synk): TransfoXLModel.from_pretrained (pretrained Transformer-XL
    # backbone) has no Pallas equivalent here; identity pass-through on the
    # embedded sequence and take last_hidden_state[:, -1].
    hidden = encoded[:, -1, :]                                       # (bs, D)
    feat = jnp.concatenate([hidden, time_encoded], axis=-1)          # (bs, 2D)

    # ---- DiscreteActor + critic, one fused Pallas call ----
    action_dim = params["act_fc2_w"].shape[1]
    logp, val = pallas_heads(feat, params, action_dim)               # (bs,A),(bs,1)
    action = jax.random.categorical(sample_key, logp, axis=-1)
    log_prob = jnp.take_along_axis(logp, action[:, None], axis=-1)[:, 0]
    values = val[:, 0]
    return action, values, log_prob


# ----------------------------- driver -----------------------------

if __name__ == "__main__":
    key = jax.random.PRNGKey(0)
    pkey, skey, akey = jax.random.split(key, 3)

    action_dim = 6
    bs, seqlen, C, H, W = 2, 4, 3, 8, 8

    params = init_params(pkey, action_dim=action_dim, hidden_dim=32)
    states = jax.random.uniform(skey, (bs, seqlen, C, H, W), jnp.float32)

    fwd = jax.jit(llm_agent_forward)
    action, values, log_prob = fwd(params, states, akey)
    jax.block_until_ready((action, values, log_prob))

    assert action.shape == (bs,)
    assert values.shape == (bs,)
    assert log_prob.shape == (bs,)
    print("KERNEL_OK")
</pallas_src>

<mosaic_0001>
module attributes {stable_mosaic.version = 11 : i64} {
  func.func @_gemm_kernel(%arg0: memref<128x27xf32, #tpu.memory_space<vmem>>, %arg1: memref<27x16xf32, #tpu.memory_space<vmem>>, %arg2: memref<1x16xf32, #tpu.memory_space<vmem>>, %arg3: memref<128x16xf32, #tpu.memory_space<vmem>>) attributes {dimension_semantics = [], scalar_prefetch = 0 : i64, scratch_operands = 0 : i64, tpu.core_type = #tpu.core_type<tc>} {
    %c0 = arith.constant 0 : index
    %c0_0 = arith.constant 0 : index
    %0 = vector.load %arg0[%c0, %c0_0] : memref<128x27xf32, #tpu.memory_space<vmem>>, vector<128x27xf32>
    %1 = arith.truncf %0 : vector<128x27xf32> to vector<128x27xbf16>
    %c0_1 = arith.constant 0 : index
    %c0_2 = arith.constant 0 : index
    %2 = vector.load %arg1[%c0_1, %c0_2] : memref<27x16xf32, #tpu.memory_space<vmem>>, vector<27x16xf32>
    %3 = arith.truncf %2 : vector<27x16xf32> to vector<27x16xbf16>
    %cst = arith.constant dense<0.000000e+00> : vector<128x16xf32>
    %4 = tpu.matmul %1, %3, %cst {dimension_numbers = #tpu.dot_dimension_numbers<[1], [0], [0], [1], [0, 0, 1, 1], [], []>} : vector<128x27xbf16>, vector<27x16xbf16>, vector<128x16xf32> -> vector<128x16xf32>
    %c0_3 = arith.constant 0 : index
    %c0_4 = arith.constant 0 : index
    %5 = vector.load %arg2[%c0_3, %c0_4] : memref<1x16xf32, #tpu.memory_space<vmem>>, vector<1x16xf32>
    %6 = vector.broadcast %5 : vector<1x16xf32> to vector<128x16xf32>
    %7 = arith.addf %4, %6 : vector<128x16xf32>
    %cst_5 = arith.constant 0.000000e+00 : f32
    %8 = vector.broadcast %cst_5 : f32 to vector<128x16xf32>
    %9 = arith.maximumf %7, %8 : vector<128x16xf32>
    %c0_6 = arith.constant 0 : index
    %c0_7 = arith.constant 0 : index
    %10 = vector.load %arg3[%c0_6, %c0_7] : memref<128x16xf32, #tpu.memory_space<vmem>>, vector<128x16xf32>
    tpu.vector_store %arg3[%c0_6, %c0_7], %9 {strides = array<i32>} : memref<128x16xf32, #tpu.memory_space<vmem>>, vector<128x16xf32>,
    return
  }
}

module attributes {stable_mosaic.version = 11 : i64} {
  func.func @_gemm_kernel(%arg0: memref<32x144xf32, #tpu.memory_space<vmem>>, %arg1: memref<144x32xf32, #tpu.memory_space<vmem>>, %arg2: memref<1x32xf32, #tpu.memory_space<vmem>>, %arg3: memref<32x32xf32, #tpu.memory_space<vmem>>) attributes {dimension_semantics = [], scalar_prefetch = 0 : i64, scratch_operands = 0 : i64, tpu.core_type = #tpu.core_type<tc>} {
    %c0 = arith.constant 0 : index
    %c0_0 = arith.constant 0 : index
    %0 = vector.load %arg0[%c0, %c0_0] : memref<32x144xf32, #tpu.memory_space<vmem>>, vector<32x144xf32>
    %1 = arith.truncf %0 : vector<32x144xf32> to vector<32x144xbf16>
    %c0_1 = arith.constant 0 : index
    %c0_2 = arith.constant 0 : index
    %2 = vector.load %arg1[%c0_1, %c0_2] : memref<144x32xf32, #tpu.memory_space<vmem>>, vector<144x32xf32>
    %3 = arith.truncf %2 : vector<144x32xf32> to vector<144x32xbf16>
    %cst = arith.constant dense<0.000000e+00> : vector<32x32xf32>
    %4 = tpu.matmul %1, %3, %cst {dimension_numbers = #tpu.dot_dimension_numbers<[1], [0], [0], [1], [0, 0, 1, 1], [], []>} : vector<32x144xbf16>, vector<144x32xbf16>, vector<32x32xf32> -> vector<32x32xf32>
    %c0_3 = arith.constant 0 : index
    %c0_4 = arith.constant 0 : index
    %5 = vector.load %arg2[%c0_3, %c0_4] : memref<1x32xf32, #tpu.memory_space<vmem>>, vector<1x32xf32>
    %6 = vector.broadcast %5 : vector<1x32xf32> to vector<32x32xf32>
    %7 = arith.addf %4, %6 : vector<32x32xf32>
    %cst_5 = arith.constant 0.000000e+00 : f32
    %8 = vector.broadcast %cst_5 : f32 to vector<32x32xf32>
    %9 = arith.maximumf %7, %8 : vector<32x32xf32>
    %c0_6 = arith.constant 0 : index
    %c0_7 = arith.constant 0 : index
    %10 = vector.load %arg3[%c0_6, %c0_7] : memref<32x32xf32, #tpu.memory_space<vmem>>, vector<32x32xf32>
    tpu.vector_store %arg3[%c0_6, %c0_7], %9 {strides = array<i32>} : memref<32x32xf32, #tpu.memory_space<vmem>>, vector<32x32xf32>,
    return
  }
}

module attributes {stable_mosaic.version = 11 : i64} {
  func.func @_gemm_kernel(%arg0: memref<72x128xf32, #tpu.memory_space<vmem>>, %arg1: memref<128x32xf32, #tpu.memory_space<vmem>>, %arg2: memref<1x32xf32, #tpu.memory_space<vmem>>, %arg3: memref<72x32xf32, #tpu.memory_space<vmem>>) attributes {dimension_semantics = [], scalar_prefetch = 0 : i64, scratch_operands = 0 : i64, tpu.core_type = #tpu.core_type<tc>} {
    %c0 = arith.constant 0 : index
    %c0_0 = arith.constant 0 : index
    %0 = vector.load %arg0[%c0, %c0_0] : memref<72x128xf32, #tpu.memory_space<vmem>>, vector<72x128xf32>
    %1 = arith.truncf %0 : vector<72x128xf32> to vector<72x128xbf16>
    %c0_1 = arith.constant 0 : index
    %c0_2 = arith.constant 0 : index
    %2 = vector.load %arg1[%c0_1, %c0_2] : memref<128x32xf32, #tpu.memory_space<vmem>>, vector<128x32xf32>
    %3 = arith.truncf %2 : vector<128x32xf32> to vector<128x32xbf16>
    %cst = arith.constant dense<0.000000e+00> : vector<72x32xf32>
    %4 = tpu.matmul %1, %3, %cst {dimension_numbers = #tpu.dot_dimension_numbers<[1], [0], [0], [1], [0, 0, 1, 1], [], []>} : vector<72x128xbf16>, vector<128x32xbf16>, vector<72x32xf32> -> vector<72x32xf32>
    %c0_3 = arith.constant 0 : index
    %c0_4 = arith.constant 0 : index
    %5 = vector.load %arg2[%c0_3, %c0_4] : memref<1x32xf32, #tpu.memory_space<vmem>>, vector<1x32xf32>
    %6 = vector.broadcast %5 : vector<1x32xf32> to vector<72x32xf32>
    %7 = arith.addf %4, %6 : vector<72x32xf32>
    %c0_5 = arith.constant 0 : index
    %c0_6 = arith.constant 0 : index
    %8 = vector.load %arg3[%c0_5, %c0_6] : memref<72x32xf32, #tpu.memory_space<vmem>>, vector<72x32xf32>
    tpu.vector_store %arg3[%c0_5, %c0_6], %7 {strides = array<i32>} : memref<72x32xf32, #tpu.memory_space<vmem>>, vector<72x32xf32>,
    return
  }
}

module attributes {stable_mosaic.version = 11 : i64} {
  func.func @_gemm_kernel(%arg0: memref<72x32xf32, #tpu.memory_space<vmem>>, %arg1: memref<32x32xf32, #tpu.memory_space<vmem>>, %arg2: memref<72x32xf32, #tpu.memory_space<vmem>>, %arg3: memref<72x32xf32, #tpu.memory_space<vmem>>) attributes {dimension_semantics = [], scalar_prefetch = 0 : i64, scratch_operands = 0 : i64, tpu.core_type = #tpu.core_type<tc>} {
    %c0 = arith.constant 0 : index
    %c0_0 = arith.constant 0 : index
    %0 = vector.load %arg0[%c0, %c0_0] : memref<72x32xf32, #tpu.memory_space<vmem>>, vector<72x32xf32>
    %1 = arith.truncf %0 : vector<72x32xf32> to vector<72x32xbf16>
    %c0_1 = arith.constant 0 : index
    %c0_2 = arith.constant 0 : index
    %2 = vector.load %arg1[%c0_1, %c0_2] : memref<32x32xf32, #tpu.memory_space<vmem>>, vector<32x32xf32>
    %3 = arith.truncf %2 : vector<32x32xf32> to vector<32x32xbf16>
    %cst = arith.constant dense<0.000000e+00> : vector<72x32xf32>
    %4 = tpu.matmul %1, %3, %cst {dimension_numbers = #tpu.dot_dimension_numbers<[1], [0], [0], [1], [0, 0, 1, 1], [], []>} : vector<72x32xbf16>, vector<32x32xbf16>, vector<72x32xf32> -> vector<72x32xf32>
    %c0_3 = arith.constant 0 : index
    %c0_4 = arith.constant 0 : index
    %5 = vector.load %arg2[%c0_3, %c0_4] : memref<72x32xf32, #tpu.memory_space<vmem>>, vector<72x32xf32>
    %cst_5 = arith.constant 0.000000e+00 : f32
    %6 = vector.broadcast %cst_5 : f32 to vector<72x32xf32>
    %7 = arith.maximumf %5, %6 : vector<72x32xf32>
    %8 = arith.addf %4, %7 : vector<72x32xf32>
    %c0_6 = arith.constant 0 : index
    %c0_7 = arith.constant 0 : index
    %9 = vector.load %arg3[%c0_6, %c0_7] : memref<72x32xf32, #tpu.memory_space<vmem>>, vector<72x32xf32>
    tpu.vector_store %arg3[%c0_6, %c0_7], %8 {strides = array<i32>} : memref<72x32xf32, #tpu.memory_space<vmem>>, vector<72x32xf32>,
    return
  }
}

module attributes {stable_mosaic.version = 11 : i64} {
  func.func @_gemm_kernel(%arg0: memref<72x288xf32, #tpu.memory_space<vmem>>, %arg1: memref<288x32xf32, #tpu.memory_space<vmem>>, %arg2: memref<72x32xf32, #tpu.memory_space<vmem>>) attributes {dimension_semantics = [], scalar_prefetch = 0 : i64, scratch_operands = 0 : i64, tpu.core_type = #tpu.core_type<tc>} {
    %c0 = arith.constant 0 : index
    %c0_0 = arith.constant 0 : index
    %0 = vector.load %arg0[%c0, %c0_0] : memref<72x288xf32, #tpu.memory_space<vmem>>, vector<72x288xf32>
    %cst = arith.constant 0.000000e+00 : f32
    %1 = vector.broadcast %cst : f32 to vector<72x288xf32>
    %2 = arith.maximumf %0, %1 : vector<72x288xf32>
    %3 = arith.truncf %2 : vector<72x288xf32> to vector<72x288xbf16>
    %c0_1 = arith.constant 0 : index
    %c0_2 = arith.constant 0 : index
    %4 = vector.load %arg1[%c0_1, %c0_2] : memref<288x32xf32, #tpu.memory_space<vmem>>, vector<288x32xf32>
    %5 = arith.truncf %4 : vector<288x32xf32> to vector<288x32xbf16>
    %cst_3 = arith.constant dense<0.000000e+00> : vector<72x32xf32>
    %6 = tpu.matmul %3, %5, %cst_3 {dimension_numbers = #tpu.dot_dimension_numbers<[1], [0], [0], [1], [0, 0, 1, 1], [], []>} : vector<72x288xbf16>, vector<288x32xbf16>, vector<72x32xf32> -> vector<72x32xf32>
    %cst_4 = arith.constant 0.000000e+00 : f32
    %7 = vector.broadcast %cst_4 : f32 to vector<72x32xf32>
    %8 = arith.maximumf %6, %7 : vector<72x32xf32>
    %c0_5 = arith.constant 0 : index
    %c0_6 = arith.constant 0 : index
    %9 = vector.load %arg2[%c0_5, %c0_6] : memref<72x32xf32, #tpu.memory_space<vmem>>, vector<72x32xf32>
    tpu.vector_store %arg2[%c0_5, %c0_6], %8 {strides = array<i32>} : memref<72x32xf32, #tpu.memory_space<vmem>>, vector<72x32xf32>,
    return
  }
}

module attributes {stable_mosaic.version = 11 : i64} {
  func.func @_gemm_kernel(%arg0: memref<72x32xf32, #tpu.memory_space<vmem>>, %arg1: memref<32x32xf32, #tpu.memory_space<vmem>>, %arg2: memref<1x32xf32, #tpu.memory_space<vmem>>, %arg3: memref<72x32xf32, #tpu.memory_space<vmem>>) attributes {dimension_semantics = [], scalar_prefetch = 0 : i64, scratch_operands = 0 : i64, tpu.core_type = #tpu.core_type<tc>} {
    %c0 = arith.constant 0 : index
    %c0_0 = arith.constant 0 : index
    %0 = vector.load %arg0[%c0, %c0_0] : memref<72x32xf32, #tpu.memory_space<vmem>>, vector<72x32xf32>
    %cst = arith.constant 0.000000e+00 : f32
    %1 = vector.broadcast %cst : f32 to vector<72x32xf32>
    %2 = arith.maximumf %0, %1 : vector<72x32xf32>
    %3 = arith.truncf %2 : vector<72x32xf32> to vector<72x32xbf16>
    %c0_1 = arith.constant 0 : index
    %c0_2 = arith.constant 0 : index
    %4 = vector.load %arg1[%c0_1, %c0_2] : memref<32x32xf32, #tpu.memory_space<vmem>>, vector<32x32xf32>
    %5 = arith.truncf %4 : vector<32x32xf32> to vector<32x32xbf16>
    %cst_3 = arith.constant dense<0.000000e+00> : vector<72x32xf32>
    %6 = tpu.matmul %3, %5, %cst_3 {dimension_numbers = #tpu.dot_dimension_numbers<[1], [0], [0], [1], [0, 0, 1, 1], [], []>} : vector<72x32xbf16>, vector<32x32xbf16>, vector<72x32xf32> -> vector<72x32xf32>
    %c0_4 = arith.constant 0 : index
    %c0_5 = arith.constant 0 : index
    %7 = vector.load %arg2[%c0_4, %c0_5] : memref<1x32xf32, #tpu.memory_space<vmem>>, vector<1x32xf32>
    %8 = vector.broadcast %7 : vector<1x32xf32> to vector<72x32xf32>
    %9 = arith.addf %6, %8 : vector<72x32xf32>
    %c0_6 = arith.constant 0 : index
    %c0_7 = arith.constant 0 : index
    %10 = vector.load %arg3[%c0_6, %c0_7] : memref<72x32xf32, #tpu.memory_space<vmem>>, vector<72x32xf32>
    tpu.vector_store %arg3[%c0_6, %c0_7], %9 {strides = array<i32>} : memref<72x32xf32, #tpu.memory_space<vmem>>, vector<72x32xf32>,
    return
  }
}

module attributes {stable_mosaic.version = 11 : i64} {
  func.func @_vq_pool_kernel(%arg0: memref<72x32xf32, #tpu.memory_space<vmem>>, %arg1: memref<10x16xf32, #tpu.memory_space<vmem>>, %arg2: memref<16x32xf32, #tpu.memory_space<vmem>>, %arg3: memref<10x1xf32, #tpu.memory_space<vmem>>, %arg4: memref<8x32xf32, #tpu.memory_space<vmem>>) attributes {dimension_semantics = [], scalar_prefetch = 0 : i64, scratch_operands = 0 : i64, tpu.core_type = #tpu.core_type<tc>} {
    %c0 = arith.constant 0 : index
    %c0_0 = arith.constant 0 : index
    %0 = vector.load %arg0[%c0, %c0_0] : memref<72x32xf32, #tpu.memory_space<vmem>>, vector<72x32xf32>
    %c0_1 = arith.constant 0 : index
    %c0_2 = arith.constant 0 : index
    %1 = vector.load %arg1[%c0_1, %c0_2] : memref<10x16xf32, #tpu.memory_space<vmem>>, vector<10x16xf32>
    %c0_3 = arith.constant 0 : index
    %c0_4 = arith.constant 0 : index
    %2 = vector.load %arg2[%c0_3, %c0_4] : memref<16x32xf32, #tpu.memory_space<vmem>>, vector<16x32xf32>
    %cst = arith.constant dense<0.000000e+00> : vector<10x32xf32>
    %3 = tpu.matmul %1, %2, %cst {dimension_numbers = #tpu.dot_dimension_numbers<[1], [0], [0], [1], [0, 0, 1, 1], [], []>} : vector<10x16xf32>, vector<16x32xf32>, vector<10x32xf32> -> vector<10x32xf32>
    %c0_5 = arith.constant 0 : index
    %c0_6 = arith.constant 0 : index
    %4 = vector.load %arg3[%c0_5, %c0_6] : memref<10x1xf32, #tpu.memory_space<vmem>>, vector<10x1xf32>
    %5 = vector.broadcast %4 : vector<10x1xf32> to vector<10x32xf32>
    %6 = arith.addf %3, %5 : vector<10x32xf32>
    %cst_7 = arith.constant dense<0.000000e+00> : vector<10x10xf32>
    %7 = tpu.matmul %6, %6, %cst_7 {dimension_numbers = #tpu.dot_dimension_numbers<[1], [1], [0], [0], [0, 0, 1, 0], [], []>} : vector<10x32xf32>, vector<10x32xf32>, vector<10x10xf32> -> vector<10x10xf32>
    %8 = tpu.iota {dimensions = array<i32: 0>} : vector<10x10xi32>
    %9 = tpu.iota {dimensions = array<i32: 1>} : vector<10x10xi32>
    %10 = arith.cmpi eq, %8, %9 : vector<10x10xi32>
    %cst_8 = arith.constant 0.000000e+00 : f32
    %11 = vector.broadcast %cst_8 : f32 to vector<10x10xf32>
    %12 = arith.select %10, %7, %11 : vector<10x10xi1>, vector<10x10xf32>
    %cst_9 = arith.constant dense<0.000000e+00> : vector<10xf32>
    %13 = vector.multi_reduction <add>, %12, %cst_9 [0] : vector<10x10xf32> to vector<10xf32>
    %14 = vector.shape_cast %13 : vector<10xf32> to vector<1x10xf32>
    %cst_10 = arith.constant dense<0.000000e+00> : vector<72x10xf32>
    %15 = tpu.matmul %0, %6, %cst_10 {dimension_numbers = #tpu.dot_dimension_numbers<[1], [1], [0], [0], [0, 0, 1, 0], [], []>} : vector<72x32xf32>, vector<10x32xf32>, vector<72x10xf32> -> vector<72x10xf32>
    %cst_11 = arith.constant 2.000000e+00 : f32
    %16 = vector.broadcast %cst_11 : f32 to vector<72x10xf32>
    %17 = arith.mulf %16, %15 : vector<72x10xf32>
    %18 = vector.broadcast %14 : vector<1x10xf32> to vector<72x10xf32>
    %19 = arith.subf %18, %17 : vector<72x10xf32>
    %20 = tpu.iota {dimensions = array<i32: 1>} : vector<72x10xi32>
    %cst_12 = arith.constant dense<0x7F800000> : vector<72xf32>
    %21 = vector.multi_reduction <minimumf>, %19, %cst_12 [1] : vector<72x10xf32> to vector<72xf32>
    %22 = vector.shape_cast %21 : vector<72xf32> to vector<72x1xf32>
    %23 = vector.broadcast %22 : vector<72x1xf32> to vector<72x10xf32>
    %24 = arith.cmpf oeq, %19, %23 : vector<72x10xf32>
    %c10_i32 = arith.constant 10 : i32
    %25 = vector.broadcast %c10_i32 : i32 to vector<72x10xi32>
    %26 = arith.select %24, %20, %25 : vector<72x10xi1>, vector<72x10xi32>
    %cst_13 = arith.constant dense<2147483647> : vector<72xi32>
    %27 = vector.multi_reduction <minsi>, %26, %cst_13 [1] : vector<72x10xi32> to vector<72xi32>
    %28 = vector.shape_cast %27 : vector<72xi32> to vector<72x1xi32>
    %29 = vector.broadcast %28 : vector<72x1xi32> to vector<72x10xi32>
    %30 = arith.cmpi eq, %20, %29 : vector<72x10xi32>
    %31 = arith.extui %30 : vector<72x10xi1> to vector<72x10xi32>
    %32 = arith.sitofp %31 : vector<72x10xi32> to vector<72x10xf32>
    %33 = tpu.iota {dimensions = array<i32: 0>} : vector<8x72xi32>
    %34 = tpu.iota {dimensions = array<i32: 1>} : vector<8x72xi32>
    %c9_i32 = arith.constant 9 : i32
    %35 = vector.broadcast %c9_i32 : i32 to vector<8x72xi32>
    %36 = arith.muli %33, %35 : vector<8x72xi32>
    %37 = arith.cmpi sge, %34, %36 : vector<8x72xi32>
    %c1_i32 = arith.constant 1 : i32
    %38 = vector.broadcast %c1_i32 : i32 to vector<8x72xi32>
    %39 = arith.addi %33, %38 : vector<8x72xi32>
    %c9_i32_14 = arith.constant 9 : i32
    %40 = vector.broadcast %c9_i32_14 : i32 to vector<8x72xi32>
    %41 = arith.muli %39, %40 : vector<8x72xi32>
    %42 = arith.cmpi slt, %34, %41 : vector<8x72xi32>
    %43 = arith.andi %37, %42 : vector<8x72xi1>
    %44 = arith.extui %43 : vector<8x72xi1> to vector<8x72xi32>
    %45 = arith.sitofp %44 : vector<8x72xi32> to vector<8x72xf32>
    %cst_15 = arith.constant dense<0.000000e+00> : vector<8x10xf32>
    %46 = tpu.matmul %45, %32, %cst_15 {dimension_numbers = #tpu.dot_dimension_numbers<[1], [0], [0], [1], [0, 0, 1, 1], [], []>} : vector<8x72xf32>, vector<72x10xf32>, vector<8x10xf32> -> vector<8x10xf32>
    %cst_16 = arith.constant dense<0.000000e+00> : vector<8x32xf32>
    %47 = tpu.matmul %46, %6, %cst_16 {dimension_numbers = #tpu.dot_dimension_numbers<[1], [0], [0], [1], [0, 0, 1, 1], [], []>} : vector<8x10xf32>, vector<10x32xf32>, vector<8x32xf32> -> vector<8x32xf32>
    %cst_17 = arith.constant 0.111111112 : f32
    %48 = vector.broadcast %cst_17 : f32 to vector<8x32xf32>
    %49 = arith.mulf %47, %48 : vector<8x32xf32>
    %c0_18 = arith.constant 0 : index
    %c0_19 = arith.constant 0 : index
    %50 = vector.load %arg4[%c0_18, %c0_19] : memref<8x32xf32, #tpu.memory_space<vmem>>, vector<8x32xf32>
    tpu.vector_store %arg4[%c0_18, %c0_19], %49 {strides = array<i32>} : memref<8x32xf32, #tpu.memory_space<vmem>>, vector<8x32xf32>,
    return
  }
}

module attributes {stable_mosaic.version = 11 : i64} {
  func.func @_gemm_kernel(%arg0: memref<18x48xf32, #tpu.memory_space<vmem>>, %arg1: memref<48x16xf32, #tpu.memory_space<vmem>>, %arg2: memref<1x16xf32, #tpu.memory_space<vmem>>, %arg3: memref<18x16xf32, #tpu.memory_space<vmem>>) attributes {dimension_semantics = [], scalar_prefetch = 0 : i64, scratch_operands = 0 : i64, tpu.core_type = #tpu.core_type<tc>} {
    %c0 = arith.constant 0 : index
    %c0_0 = arith.constant 0 : index
    %0 = vector.load %arg0[%c0, %c0_0] : memref<18x48xf32, #tpu.memory_space<vmem>>, vector<18x48xf32>
    %1 = arith.truncf %0 : vector<18x48xf32> to vector<18x48xbf16>
    %c0_1 = arith.constant 0 : index
    %c0_2 = arith.constant 0 : index
    %2 = vector.load %arg1[%c0_1, %c0_2] : memref<48x16xf32, #tpu.memory_space<vmem>>, vector<48x16xf32>
    %3 = arith.truncf %2 : vector<48x16xf32> to vector<48x16xbf16>
    %cst = arith.constant dense<0.000000e+00> : vector<18x16xf32>
    %4 = tpu.matmul %1, %3, %cst {dimension_numbers = #tpu.dot_dimension_numbers<[1], [0], [0], [1], [0, 0, 1, 1], [], []>} : vector<18x48xbf16>, vector<48x16xbf16>, vector<18x16xf32> -> vector<18x16xf32>
    %c0_3 = arith.constant 0 : index
    %c0_4 = arith.constant 0 : index
    %5 = vector.load %arg2[%c0_3, %c0_4] : memref<1x16xf32, #tpu.memory_space<vmem>>, vector<1x16xf32>
    %6 = vector.broadcast %5 : vector<1x16xf32> to vector<18x16xf32>
    %7 = arith.addf %4, %6 : vector<18x16xf32>
    %cst_5 = arith.constant 0.000000e+00 : f32
    %8 = vector.broadcast %cst_5 : f32 to vector<18x16xf32>
    %9 = arith.maximumf %7, %8 : vector<18x16xf32>
    %c0_6 = arith.constant 0 : index
    %c0_7 = arith.constant 0 : index
    %10 = vector.load %arg3[%c0_6, %c0_7] : memref<18x16xf32, #tpu.memory_space<vmem>>, vector<18x16xf32>
    tpu.vector_store %arg3[%c0_6, %c0_7], %9 {strides = array<i32>} : memref<18x16xf32, #tpu.memory_space<vmem>>, vector<18x16xf32>,
    return
  }
}

module attributes {stable_mosaic.version = 11 : i64} {
  func.func @_gemm_kernel(%arg0: memref<8x64xf32, #tpu.memory_space<vmem>>, %arg1: memref<64x32xf32, #tpu.memory_space<vmem>>, %arg2: memref<1x32xf32, #tpu.memory_space<vmem>>, %arg3: memref<8x32xf32, #tpu.memory_space<vmem>>) attributes {dimension_semantics = [], scalar_prefetch = 0 : i64, scratch_operands = 0 : i64, tpu.core_type = #tpu.core_type<tc>} {
    %c0 = arith.constant 0 : index
    %c0_0 = arith.constant 0 : index
    %0 = vector.load %arg0[%c0, %c0_0] : memref<8x64xf32, #tpu.memory_space<vmem>>, vector<8x64xf32>
    %1 = arith.truncf %0 : vector<8x64xf32> to vector<8x64xbf16>
    %c0_1 = arith.constant 0 : index
    %c0_2 = arith.constant 0 : index
    %2 = vector.load %arg1[%c0_1, %c0_2] : memref<64x32xf32, #tpu.memory_space<vmem>>, vector<64x32xf32>
    %3 = arith.truncf %2 : vector<64x32xf32> to vector<64x32xbf16>
    %cst = arith.constant dense<0.000000e+00> : vector<8x32xf32>
    %4 = tpu.matmul %1, %3, %cst {dimension_numbers = #tpu.dot_dimension_numbers<[1], [0], [0], [1], [0, 0, 1, 1], [], []>} : vector<8x64xbf16>, vector<64x32xbf16>, vector<8x32xf32> -> vector<8x32xf32>
    %c0_3 = arith.constant 0 : index
    %c0_4 = arith.constant 0 : index
    %5 = vector.load %arg2[%c0_3, %c0_4] : memref<1x32xf32, #tpu.memory_space<vmem>>, vector<1x32xf32>
    %6 = vector.broadcast %5 : vector<1x32xf32> to vector<8x32xf32>
    %7 = arith.addf %4, %6 : vector<8x32xf32>
    %cst_5 = arith.constant 0.000000e+00 : f32
    %8 = vector.broadcast %cst_5 : f32 to vector<8x32xf32>
    %9 = arith.maximumf %7, %8 : vector<8x32xf32>
    %c0_6 = arith.constant 0 : index
    %c0_7 = arith.constant 0 : index
    %10 = vector.load %arg3[%c0_6, %c0_7] : memref<8x32xf32, #tpu.memory_space<vmem>>, vector<8x32xf32>
    tpu.vector_store %arg3[%c0_6, %c0_7], %9 {strides = array<i32>} : memref<8x32xf32, #tpu.memory_space<vmem>>, vector<8x32xf32>,
    return
  }
}

module attributes {stable_mosaic.version = 11 : i64} {
  func.func @_gemm_kernel(%arg0: memref<2x128xf32, #tpu.memory_space<vmem>>, %arg1: memref<128x32xf32, #tpu.memory_space<vmem>>, %arg2: memref<1x32xf32, #tpu.memory_space<vmem>>, %arg3: memref<2x32xf32, #tpu.memory_space<vmem>>) attributes {dimension_semantics = [], scalar_prefetch = 0 : i64, scratch_operands = 0 : i64, tpu.core_type = #tpu.core_type<tc>} {
    %c0 = arith.constant 0 : index
    %c0_0 = arith.constant 0 : index
    %0 = vector.load %arg0[%c0, %c0_0] : memref<2x128xf32, #tpu.memory_space<vmem>>, vector<2x128xf32>
    %1 = arith.truncf %0 : vector<2x128xf32> to vector<2x128xbf16>
    %c0_1 = arith.constant 0 : index
    %c0_2 = arith.constant 0 : index
    %2 = vector.load %arg1[%c0_1, %c0_2] : memref<128x32xf32, #tpu.memory_space<vmem>>, vector<128x32xf32>
    %3 = arith.truncf %2 : vector<128x32xf32> to vector<128x32xbf16>
    %cst = arith.constant dense<0.000000e+00> : vector<2x32xf32>
    %4 = tpu.matmul %1, %3, %cst {dimension_numbers = #tpu.dot_dimension_numbers<[1], [0], [0], [1], [0, 0, 1, 1], [], []>} : vector<2x128xbf16>, vector<128x32xbf16>, vector<2x32xf32> -> vector<2x32xf32>
    %c0_3 = arith.constant 0 : index
    %c0_4 = arith.constant 0 : index
    %5 = vector.load %arg2[%c0_3, %c0_4] : memref<1x32xf32, #tpu.memory_space<vmem>>, vector<1x32xf32>
    %6 = vector.broadcast %5 : vector<1x32xf32> to vector<2x32xf32>
    %7 = arith.addf %4, %6 : vector<2x32xf32>
    %cst_5 = arith.constant 0.000000e+00 : f32
    %8 = vector.broadcast %cst_5 : f32 to vector<2x32xf32>
    %9 = arith.maximumf %7, %8 : vector<2x32xf32>
    %c0_6 = arith.constant 0 : index
    %c0_7 = arith.constant 0 : index
    %10 = vector.load %arg3[%c0_6, %c0_7] : memref<2x32xf32, #tpu.memory_space<vmem>>, vector<2x32xf32>
    tpu.vector_store %arg3[%c0_6, %c0_7], %9 {strides = array<i32>} : memref<2x32xf32, #tpu.memory_space<vmem>>, vector<2x32xf32>,
    return
  }
}

module attributes {stable_mosaic.version = 11 : i64} {
  func.func @_heads_kernel(%arg0: memref<2x64xf32, #tpu.memory_space<vmem>>, %arg1: memref<64x128xf32, #tpu.memory_space<vmem>>, %arg2: memref<1x128xf32, #tpu.memory_space<vmem>>, %arg3: memref<128x6xf32, #tpu.memory_space<vmem>>, %arg4: memref<1x6xf32, #tpu.memory_space<vmem>>, %arg5: memref<64x1024xf32, #tpu.memory_space<vmem>>, %arg6: memref<1x1024xf32, #tpu.memory_space<vmem>>, %arg7: memref<1024x512xf32, #tpu.memory_space<vmem>>, %arg8: memref<1x512xf32, #tpu.memory_space<vmem>>, %arg9: memref<512x1xf32, #tpu.memory_space<vmem>>, %arg10: memref<1x1xf32, #tpu.memory_space<vmem>>, %arg11: memref<2x6xf32, #tpu.memory_space<vmem>>, %arg12: memref<2x1xf32, #tpu.memory_space<vmem>>) attributes {dimension_semantics = [], scalar_prefetch = 0 : i64, scratch_operands = 0 : i64, tpu.core_type = #tpu.core_type<tc>} {
    %c0 = arith.constant 0 : index
    %c0_0 = arith.constant 0 : index
    %0 = vector.load %arg0[%c0, %c0_0] : memref<2x64xf32, #tpu.memory_space<vmem>>, vector<2x64xf32>
    %1 = arith.truncf %0 : vector<2x64xf32> to vector<2x64xbf16>
    %c0_1 = arith.constant 0 : index
    %c0_2 = arith.constant 0 : index
    %2 = vector.load %arg1[%c0_1, %c0_2] : memref<64x128xf32, #tpu.memory_space<vmem>>, vector<64x128xf32>
    %3 = arith.truncf %2 : vector<64x128xf32> to vector<64x128xbf16>
    %cst = arith.constant dense<0.000000e+00> : vector<2x128xf32>
    %4 = tpu.matmul %1, %3, %cst {dimension_numbers = #tpu.dot_dimension_numbers<[1], [0], [0], [1], [0, 0, 1, 1], [], []>} : vector<2x64xbf16>, vector<64x128xbf16>, vector<2x128xf32> -> vector<2x128xf32>
    %c0_3 = arith.constant 0 : index
    %c0_4 = arith.constant 0 : index
    %5 = vector.load %arg2[%c0_3, %c0_4] : memref<1x128xf32, #tpu.memory_space<vmem>>, vector<1x128xf32>
    %6 = vector.broadcast %5 : vector<1x128xf32> to vector<2x128xf32>
    %7 = arith.addf %4, %6 : vector<2x128xf32>
    %cst_5 = arith.constant dense<0.000000e+00> : vector<2xf32>
    %8 = vector.multi_reduction <add>, %7, %cst_5 [1] : vector<2x128xf32> to vector<2xf32>
    %9 = vector.shape_cast %8 : vector<2xf32> to vector<2x1xf32>
    %cst_6 = arith.constant 1.280000e+02 : f32
    %10 = vector.broadcast %cst_6 : f32 to vector<2x1xf32>
    %11 = arith.divf %9, %10 : vector<2x1xf32>
    %12 = vector.broadcast %11 : vector<2x1xf32> to vector<2x128xf32>
    %13 = arith.subf %7, %12 : vector<2x128xf32>
    %14 = arith.mulf %13, %13 : vector<2x128xf32>
    %cst_7 = arith.constant dense<0.000000e+00> : vector<2xf32>
    %15 = vector.multi_reduction <add>, %14, %cst_7 [1] : vector<2x128xf32> to vector<2xf32>
    %16 = vector.shape_cast %15 : vector<2xf32> to vector<2x1xf32>
    %cst_8 = arith.constant 1.280000e+02 : f32
    %17 = vector.broadcast %cst_8 : f32 to vector<2x1xf32>
    %18 = arith.divf %16, %17 : vector<2x1xf32>
    %19 = vector.broadcast %11 : vector<2x1xf32> to vector<2x128xf32>
    %20 = arith.subf %7, %19 : vector<2x128xf32>
    %cst_9 = arith.constant 9.99999974E-6 : f32
    %21 = vector.broadcast %cst_9 : f32 to vector<2x1xf32>
    %22 = arith.addf %18, %21 : vector<2x1xf32>
    %23 = math.rsqrt %22 : vector<2x1xf32>
    %24 = vector.broadcast %23 : vector<2x1xf32> to vector<2x128xf32>
    %25 = arith.mulf %20, %24 : vector<2x128xf32>
    %cst_10 = arith.constant 0.000000e+00 : f32
    %26 = vector.broadcast %cst_10 : f32 to vector<2x128xf32>
    %27 = arith.maximumf %25, %26 : vector<2x128xf32>
    %28 = arith.truncf %27 : vector<2x128xf32> to vector<2x128xbf16>
    %c0_11 = arith.constant 0 : index
    %c0_12 = arith.constant 0 : index
    %29 = vector.load %arg3[%c0_11, %c0_12] : memref<128x6xf32, #tpu.memory_space<vmem>>, vector<128x6xf32>
    %30 = arith.truncf %29 : vector<128x6xf32> to vector<128x6xbf16>
    %cst_13 = arith.constant dense<0.000000e+00> : vector<2x6xf32>
    %31 = tpu.matmul %28, %30, %cst_13 {dimension_numbers = #tpu.dot_dimension_numbers<[1], [0], [0], [1], [0, 0, 1, 1], [], []>} : vector<2x128xbf16>, vector<128x6xbf16>, vector<2x6xf32> -> vector<2x6xf32>
    %c0_14 = arith.constant 0 : index
    %c0_15 = arith.constant 0 : index
    %32 = vector.load %arg4[%c0_14, %c0_15] : memref<1x6xf32, #tpu.memory_space<vmem>>, vector<1x6xf32>
    %33 = vector.broadcast %32 : vector<1x6xf32> to vector<2x6xf32>
    %34 = arith.addf %31, %33 : vector<2x6xf32>
    %cst_16 = arith.constant dense<0xFF800000> : vector<2xf32>
    %35 = vector.multi_reduction <maximumf>, %34, %cst_16 [1] : vector<2x6xf32> to vector<2xf32>
    %36 = vector.shape_cast %35 : vector<2xf32> to vector<2x1xf32>
    %37 = vector.broadcast %36 : vector<2x1xf32> to vector<2x6xf32>
    %38 = arith.subf %34, %37 : vector<2x6xf32>
    %39 = math.exp %38 : vector<2x6xf32>
    %cst_17 = arith.constant dense<0.000000e+00> : vector<2xf32>
    %40 = vector.multi_reduction <add>, %39, %cst_17 [1] : vector<2x6xf32> to vector<2xf32>
    %41 = vector.shape_cast %40 : vector<2xf32> to vector<2x1xf32>
    %42 = math.log %41 : vector<2x1xf32>
    %43 = vector.broadcast %42 : vector<2x1xf32> to vector<2x6xf32>
    %44 = arith.subf %38, %43 : vector<2x6xf32>
    %c0_18 = arith.constant 0 : index
    %c0_19 = arith.constant 0 : index
    %45 = vector.load %arg11[%c0_18, %c0_19] : memref<2x6xf32, #tpu.memory_space<vmem>>, vector<2x6xf32>
    tpu.vector_store %arg11[%c0_18, %c0_19], %44 {strides = array<i32>} : memref<2x6xf32, #tpu.memory_space<vmem>>, vector<2x6xf32>,
    %46 = arith.truncf %0 : vector<2x64xf32> to vector<2x64xbf16>
    %c0_20 = arith.constant 0 : index
    %c0_21 = arith.constant 0 : index
    %47 = vector.load %arg5[%c0_20, %c0_21] : memref<64x1024xf32, #tpu.memory_space<vmem>>, vector<64x1024xf32>
    %48 = arith.truncf %47 : vector<64x1024xf32> to vector<64x1024xbf16>
    %cst_22 = arith.constant dense<0.000000e+00> : vector<2x1024xf32>
    %49 = tpu.matmul %46, %48, %cst_22 {dimension_numbers = #tpu.dot_dimension_numbers<[1], [0], [0], [1], [0, 0, 1, 1], [], []>} : vector<2x64xbf16>, vector<64x1024xbf16>, vector<2x1024xf32> -> vector<2x1024xf32>
    %c0_23 = arith.constant 0 : index
    %c0_24 = arith.constant 0 : index
    %50 = vector.load %arg6[%c0_23, %c0_24] : memref<1x1024xf32, #tpu.memory_space<vmem>>, vector<1x1024xf32>
    %51 = vector.broadcast %50 : vector<1x1024xf32> to vector<2x1024xf32>
    %52 = arith.addf %49, %51 : vector<2x1024xf32>
    %cst_25 = arith.constant dense<0.000000e+00> : vector<2xf32>
    %53 = vector.multi_reduction <add>, %52, %cst_25 [1] : vector<2x1024xf32> to vector<2xf32>
    %54 = vector.shape_cast %53 : vector<2xf32> to vector<2x1xf32>
    %cst_26 = arith.constant 1.024000e+03 : f32
    %55 = vector.broadcast %cst_26 : f32 to vector<2x1xf32>
    %56 = arith.divf %54, %55 : vector<2x1xf32>
    %57 = vector.broadcast %56 : vector<2x1xf32> to vector<2x1024xf32>
    %58 = arith.subf %52, %57 : vector<2x1024xf32>
    %59 = arith.mulf %58, %58 : vector<2x1024xf32>
    %cst_27 = arith.constant dense<0.000000e+00> : vector<2xf32>
    %60 = vector.multi_reduction <add>, %59, %cst_27 [1] : vector<2x1024xf32> to vector<2xf32>
    %61 = vector.shape_cast %60 : vector<2xf32> to vector<2x1xf32>
    %cst_28 = arith.constant 1.024000e+03 : f32
    %62 = vector.broadcast %cst_28 : f32 to vector<2x1xf32>
    %63 = arith.divf %61, %62 : vector<2x1xf32>
    %64 = vector.broadcast %56 : vector<2x1xf32> to vector<2x1024xf32>
    %65 = arith.subf %52, %64 : vector<2x1024xf32>
    %cst_29 = arith.constant 9.99999974E-6 : f32
    %66 = vector.broadcast %cst_29 : f32 to vector<2x1xf32>
    %67 = arith.addf %63, %66 : vector<2x1xf32>
    %68 = math.rsqrt %67 : vector<2x1xf32>
    %69 = vector.broadcast %68 : vector<2x1xf32> to vector<2x1024xf32>
    %70 = arith.mulf %65, %69 : vector<2x1024xf32>
    %cst_30 = arith.constant 0.000000e+00 : f32
    %71 = vector.broadcast %cst_30 : f32 to vector<2x1024xf32>
    %72 = arith.maximumf %70, %71 : vector<2x1024xf32>
    %73 = arith.truncf %72 : vector<2x1024xf32> to vector<2x1024xbf16>
    %c0_31 = arith.constant 0 : index
    %c0_32 = arith.constant 0 : index
    %74 = vector.load %arg7[%c0_31, %c0_32] : memref<1024x512xf32, #tpu.memory_space<vmem>>, vector<1024x512xf32>
    %75 = arith.truncf %74 : vector<1024x512xf32> to vector<1024x512xbf16>
    %cst_33 = arith.constant dense<0.000000e+00> : vector<2x512xf32>
    %76 = tpu.matmul %73, %75, %cst_33 {dimension_numbers = #tpu.dot_dimension_numbers<[1], [0], [0], [1], [0, 0, 1, 1], [], []>} : vector<2x1024xbf16>, vector<1024x512xbf16>, vector<2x512xf32> -> vector<2x512xf32>
    %c0_34 = arith.constant 0 : index
    %c0_35 = arith.constant 0 : index
    %77 = vector.load %arg8[%c0_34, %c0_35] : memref<1x512xf32, #tpu.memory_space<vmem>>, vector<1x512xf32>
    %78 = vector.broadcast %77 : vector<1x512xf32> to vector<2x512xf32>
    %79 = arith.addf %76, %78 : vector<2x512xf32>
    %cst_36 = arith.constant dense<0.000000e+00> : vector<2xf32>
    %80 = vector.multi_reduction <add>, %79, %cst_36 [1] : vector<2x512xf32> to vector<2xf32>
    %81 = vector.shape_cast %80 : vector<2xf32> to vector<2x1xf32>
    %cst_37 = arith.constant 5.120000e+02 : f32
    %82 = vector.broadcast %cst_37 : f32 to vector<2x1xf32>
    %83 = arith.divf %81, %82 : vector<2x1xf32>
    %84 = vector.broadcast %83 : vector<2x1xf32> to vector<2x512xf32>
    %85 = arith.subf %79, %84 : vector<2x512xf32>
    %86 = arith.mulf %85, %85 : vector<2x512xf32>
    %cst_38 = arith.constant dense<0.000000e+00> : vector<2xf32>
    %87 = vector.multi_reduction <add>, %86, %cst_38 [1] : vector<2x512xf32> to vector<2xf32>
    %88 = vector.shape_cast %87 : vector<2xf32> to vector<2x1xf32>
    %cst_39 = arith.constant 5.120000e+02 : f32
    %89 = vector.broadcast %cst_39 : f32 to vector<2x1xf32>
    %90 = arith.divf %88, %89 : vector<2x1xf32>
    %91 = vector.broadcast %83 : vector<2x1xf32> to vector<2x512xf32>
    %92 = arith.subf %79, %91 : vector<2x512xf32>
    %cst_40 = arith.constant 9.99999974E-6 : f32
    %93 = vector.broadcast %cst_40 : f32 to vector<2x1xf32>
    %94 = arith.addf %90, %93 : vector<2x1xf32>
    %95 = math.rsqrt %94 : vector<2x1xf32>
    %96 = vector.broadcast %95 : vector<2x1xf32> to vector<2x512xf32>
    %97 = arith.mulf %92, %96 : vector<2x512xf32>
    %cst_41 = arith.constant 0.000000e+00 : f32
    %98 = vector.broadcast %cst_41 : f32 to vector<2x512xf32>
    %99 = arith.maximumf %97, %98 : vector<2x512xf32>
    %100 = arith.truncf %99 : vector<2x512xf32> to vector<2x512xbf16>
    %c0_42 = arith.constant 0 : index
    %c0_43 = arith.constant 0 : index
    %101 = vector.load %arg9[%c0_42, %c0_43] : memref<512x1xf32, #tpu.memory_space<vmem>>, vector<512x1xf32>
    %102 = arith.truncf %101 : vector<512x1xf32> to vector<512x1xbf16>
    %cst_44 = arith.constant dense<0.000000e+00> : vector<2x1xf32>
    %103 = tpu.matmul %100, %102, %cst_44 {dimension_numbers = #tpu.dot_dimension_numbers<[1], [0], [0], [1], [0, 0, 1, 1], [], []>} : vector<2x512xbf16>, vector<512x1xbf16>, vector<2x1xf32> -> vector<2x1xf32>
    %c0_45 = arith.constant 0 : index
    %c0_46 = arith.constant 0 : index
    %104 = vector.load %arg10[%c0_45, %c0_46] : memref<1x1xf32, #tpu.memory_space<vmem>>, vector<1x1xf32>
    %105 = vector.broadcast %104 : vector<1x1xf32> to vector<2x1xf32>
    %106 = arith.addf %103, %105 : vector<2x1xf32>
    %c0_47 = arith.constant 0 : index
    %c0_48 = arith.constant 0 : index
    %107 = vector.load %arg12[%c0_47, %c0_48] : memref<2x1xf32, #tpu.memory_space<vmem>>, vector<2x1xf32>
    tpu.vector_store %arg12[%c0_47, %c0_48], %106 {strides = array<i32>} : memref<2x1xf32, #tpu.memory_space<vmem>>, vector<2x1xf32>,
    return
  }
}

</mosaic_0001>

<bundles_post_ra>
// kernel: llm_agent_forward.13
= control target key start
LH: loop header
LB: loop body
LE: loop exit
PB: predicated region body
PF: predicated region fallthrough
CT: control target
= control target key end

     0   :  { %vm77_vm0 = vcmask 1044480   ;;  %vm78_vm1 = vcmask 1045504   ;;  %v262_v2 = vmov 65535   ;;  %vm52_vm2 = vcmask 220160   ;;  %s418_s1 = inlined_call_operand.vmem [shape: f32[27,16], index: 1, kind: input, shape index: {}]   ;;  %s419_s0 = inlined_call_operand.vmem [shape: f32[128,27], index: 0, kind: input, shape index: {}]   ;;  %s420_s2 = inlined_call_operand.vmem [shape: f32[1,16], index: 2, kind: input, shape index: {}]   ;;  %s421_s3 = inlined_call_operand.vmem [shape: f32[128,16], index: 3, kind: output, shape index: {}]  }
   0x1   :  { %v41_v0 = vld [vmem:[%s418_s1 + $0x10] sm:$0xff]  ;;  %v42_v1 = vld [vmem:[%s418_s1 + $0x18] sm:$0x7]  ;;  %v79_v3 = vsel %vm77_vm0, 4294967295, %v262_v2  ;;  %v39_v4 = vld [vmem:[%s418_s1] sm:$0xff]  ;;  %vm197_vm3 = vcmask 130048  }
   0x2   :  { %v44_v5 = vpack.c.bf16 %v42_v1, %v41_v0  ;;  %v80_v6 = vsel %vm78_vm1, %v79_v3, 0  ;;  %v40_v7 = vld [vmem:[%s418_s1 + $0x8] sm:$0xff]  ;;  %v15_v8 = vld [vmem:[%s419_s0] sm:$0xff]  ;;  %v17_v16 = vld [vmem:[%s419_s0 + $0x10] sm:$0xff] }
   0x3   :  { %v16_v9 = vld [vmem:[%s419_s0 + $0x8] sm:$0xff]  ;;  %v23_v11 = vld [vmem:[%s419_s0 + $0x40] sm:$0xff]  ;;  %v43_v14 = vpack.c.bf16 %v40_v7, %v39_v4  ;;  %v18_v17 = vld [vmem:[%s419_s0 + $0x18] sm:$0xff] }
   0x4   :  { %v31_v10 = vpack.c.bf16 %v16_v9, %v15_v8  ;;  %v24_v12 = vld [vmem:[%s419_s0 + $0x48] sm:$0xff]  ;;  %v82_v13 = vand.u32 %v80_v6, %v44_v5  ;;  %v25_v18 = vld [vmem:[%s419_s0 + $0x50] sm:$0xff]  ;;  %v26_v19 = vld [vmem:[%s419_s0 + $0x58] sm:$0xff]  ;;  %v32_v24 = vpack.c.bf16 %v18_v17, %v17_v16 }
   0x5   :  { %v35_v15 = vpack.c.bf16 %v24_v12, %v23_v11  ;;  %v19_v20 = vld [vmem:[%s419_s0 + $0x20] sm:$0xff]  ;;  %v20_v21 = vld [vmem:[%s419_s0 + $0x28] sm:$0xff]  ;;  %v36_v25 = vpack.c.bf16 %v26_v19, %v25_v18  ;;  %v21_v28 = vld [vmem:[%s419_s0 + $0x30] sm:$0xff] }
   0x6   :  { %241 = vmatprep.mubr.msk.bf16.mxu0 %vm52_vm2, %v31_v10  ;;  %237 = vmatprep.subr.bf16.mxu0 %v82_v13  ;;  %v27_v22 = vld [vmem:[%s419_s0 + $0x60] sm:$0xff]  ;;  %v28_v23 = vld [vmem:[%s419_s0 + $0x68] sm:$0xff]  ;;  %v33_v26 = vpack.c.bf16 %v20_v21, %v19_v20  ;;  %v22_v29 = vld [vmem:[%s419_s0 + $0x38] sm:$0xff] }
   0x7   :  { %257 = vmatprep.subr.bf16.mxu1 %v82_v13  ;;  %238 = vmatpush3.bf16.msra.mxu0 %v82_v13  ;;  %v37_v27 = vpack.c.bf16 %v28_v23, %v27_v22  ;;  %v29_v30 = vld [vmem:[%s419_s0 + $0x70] sm:$0xff]  ;;  %v30_v31 = vld [vmem:[%s419_s0 + $0x78] sm:$0xff]  ;;  %v34_v32 = vpack.c.bf16 %v22_v29, %v21_v28  ;;  %v218_v34 = vld [vmem:[%s420_s2] ss:$0 sm:$0xff] }
   0x8   :  { %259 = vmatpush3.bf16.msra.mxu1 %v82_v13  ;;  %239 = vmatprep.subr.bf16.mxu0 %v43_v14  ;;  %v38_v33 = vpack.c.bf16 %v30_v31, %v29_v30 }
   0x9   :  { %258 = vmatprep.subr.bf16.mxu1 %v43_v14  ;;  %249 = vmatprep.mubr.msk.bf16.mxu1 %vm52_vm2, %v35_v15 }
   0xb   :  { %240 = vmatpush3.bf16.msra.mxu0 %v43_v14 }
   0xc   :  { %260 = vmatpush3.bf16.msra.mxu1 %v43_v14 }
   0xe   :  { %242 = vmatmul.mubr.msk.bf16.vlgmr.msra.gmra.mxu0 %vm52_vm2, %v32_v24 }
   0xf   :  { %250 = vmatmul.mubr.msk.bf16.vlgmr.msra.gmra.mxu1 %vm52_vm2, %v36_v25  ;;  %245 = vmatprep.mubr.msk.bf16.mxu0 %vm52_vm2, %v33_v26 }
  0x10   :  { %253 = vmatprep.mubr.msk.bf16.mxu1 %vm52_vm2, %v37_v27 }
  0x16   :  { %246 = vmatmul.mubr.msk.bf16.gmra.mxu0 %vm52_vm2, %v34_v32 }
  0x17   :  { %254 = vmatmul.mubr.msk.bf16.gmra.mxu1 %vm52_vm2, %v38_v33 }
  0xce   :  { %v243_v35 = vpop.f32.mrf.mxu0 }
  0xcf   :  { %v251_v36 = vpop.f32.mrf.mxu1  ;;  %v127_v37 = vadd.f32 %v243_v35, %v218_v34 }
  0xd0   :  { %v159_v38 = vadd.f32 %v251_v36, %v218_v34  ;;  %v118_v39 = vpop.f32.mrf.mxu0 }
  0xd1   :  { %v150_v40 = vpop.f32.mrf.mxu1  ;;  %v183_v41 = vmax.f32 %v127_v37, 0.0  ;;  %v119_v43 = vadd.f32 %v218_v34, %v118_v39 }
  0xd2   :  { %v191_v42 = vmax.f32 %v159_v38, 0.0  ;;  %v151_v44 = vadd.f32 %v218_v34, %v150_v40  ;;  %v244_v45 = vpop.f32.mrf.mxu0 }
  0xd3   :  { %v252_v46 = vpop.f32.mrf.mxu1  ;;  %200 = vst.msk [vmem:[%s421_s3 + $0x10] sm:$0xff] %vm197_vm3, %v183_v41  ;;  %v181_v47 = vmax.f32 %v119_v43, 0.0  ;;  %v130_v49 = vadd.f32 %v244_v45, %v218_v34 }
  0xd4   :  { %208 = vst.msk [vmem:[%s421_s3 + $0x50] sm:$0xff] %vm197_vm3, %v191_v42  ;;  %v189_v48 = vmax.f32 %v151_v44, 0.0  ;;  %v162_v50 = vadd.f32 %v252_v46, %v218_v34  ;;  %v121_v51 = vpop.f32.mrf.mxu0 }
  0xd5   :  { %v153_v52 = vpop.f32.mrf.mxu1  ;;  %198 = vst.msk [vmem:[%s421_s3] sm:$0xff] %vm197_vm3, %v181_v47  ;;  %v184_v53 = vmax.f32 %v130_v49, 0.0  ;;  %v122_v55 = vadd.f32 %v218_v34, %v121_v51 }
  0xd6   :  { %206 = vst.msk [vmem:[%s421_s3 + $0x40] sm:$0xff] %vm197_vm3, %v189_v48  ;;  %v192_v54 = vmax.f32 %v162_v50, 0.0  ;;  %v154_v56 = vadd.f32 %v218_v34, %v153_v52  ;;  %v247_v57 = vpop.f32.mrf.mxu0 }
  0xd7   :  { %v255_v58 = vpop.f32.mrf.mxu1  ;;  %201 = vst.msk [vmem:[%s421_s3 + $0x18] sm:$0xff] %vm197_vm3, %v184_v53  ;;  %v182_v59 = vmax.f32 %v122_v55, 0.0  ;;  %v143_v61 = vadd.f32 %v247_v57, %v218_v34 }
  0xd8   :  { %209 = vst.msk [vmem:[%s421_s3 + $0x58] sm:$0xff] %vm197_vm3, %v192_v54  ;;  %v190_v60 = vmax.f32 %v154_v56, 0.0  ;;  %v175_v62 = vadd.f32 %v255_v58, %v218_v34  ;;  %v134_v63 = vpop.f32.mrf.mxu0 }
  0xd9   :  { %v166_v0 = vpop.f32.mrf.mxu1  ;;  %199 = vst.msk [vmem:[%s421_s3 + $0x8] sm:$0xff] %vm197_vm3, %v182_v59  ;;  %v187_v1 = vmax.f32 %v143_v61, 0.0  ;;  %v135_v3 = vadd.f32 %v218_v34, %v134_v63 }
  0xda   :  { %207 = vst.msk [vmem:[%s421_s3 + $0x48] sm:$0xff] %vm197_vm3, %v190_v60  ;;  %v195_v2 = vmax.f32 %v175_v62, 0.0  ;;  %v167_v4 = vadd.f32 %v218_v34, %v166_v0  ;;  %v248_v5 = vpop.f32.mrf.mxu0 }
  0xdb   :  { %v256_v6 = vpop.f32.mrf.mxu1  ;;  %204 = vst.msk [vmem:[%s421_s3 + $0x30] sm:$0xff] %vm197_vm3, %v187_v1  ;;  %v185_v7 = vmax.f32 %v135_v3, 0.0  ;;  %v146_v9 = vadd.f32 %v248_v5, %v218_v34 }
  0xdc   :  { %212 = vst.msk [vmem:[%s421_s3 + $0x70] sm:$0xff] %vm197_vm3, %v195_v2  ;;  %v193_v8 = vmax.f32 %v167_v4, 0.0  ;;  %v178_v10 = vadd.f32 %v256_v6, %v218_v34  ;;  %v137_v11 = vpop.f32.mrf.mxu0 }
  0xdd   :  { %v169_v12 = vpop.f32.mrf.mxu1  ;;  %202 = vst.msk [vmem:[%s421_s3 + $0x20] sm:$0xff] %vm197_vm3, %v185_v7  ;;  %v188_v13 = vmax.f32 %v146_v9, 0.0  ;;  %v138_v15 = vadd.f32 %v218_v34, %v137_v11 }
  0xde   :  { %210 = vst.msk [vmem:[%s421_s3 + $0x60] sm:$0xff] %vm197_vm3, %v193_v8  ;;  %v196_v14 = vmax.f32 %v178_v10, 0.0  ;;  %v170_v16 = vadd.f32 %v218_v34, %v169_v12 }
  0xdf   :  { %205 = vst.msk [vmem:[%s421_s3 + $0x38] sm:$0xff] %vm197_vm3, %v188_v13  ;;  %v186_v17 = vmax.f32 %v138_v15, 0.0 }
  0xe0   :  { %213 = vst.msk [vmem:[%s421_s3 + $0x78] sm:$0xff] %vm197_vm3, %v196_v14  ;;  %v194_v18 = vmax.f32 %v170_v16, 0.0 }
  0xe1   :  { %203 = vst.msk [vmem:[%s421_s3 + $0x28] sm:$0xff] %vm197_vm3, %v186_v17 }
  0xe2   :  { %211 = vst.msk [vmem:[%s421_s3 + $0x68] sm:$0xff] %vm197_vm3, %v194_v18 }

// kernel: llm_agent_forward.14
= control target key start
LH: loop header
LB: loop body
LE: loop exit
PB: predicated region body
PF: predicated region fallthrough
CT: control target
= control target key end

     0   :  { %v152_v0 = vmov 0   ;;  %vm61_vm0 = vcmask 130048   ;;  %vm121_vm1 = vcmask 261120   ;;  %s288_s1 = inlined_call_operand.vmem [shape: f32[144,32], index: 1, kind: input, shape index: {}]   ;;  %s289_s0 = inlined_call_operand.vmem [shape: f32[32,144], index: 0, kind: input, shape index: {}]   ;;  %s290_s2 = inlined_call_operand.vmem [shape: f32[1,32], index: 2, kind: input, shape index: {}]   ;;  %s291_s3 = inlined_call_operand.vmem [shape: f32[32,32], index: 3, kind: output, shape index: {}]  }
   0x1   :  { %68 = vmatprep.subr.bf16.mxu0 %v152_v0  ;;  %133 = vmatprep.subr.bf16.mxu1 %v152_v0  ;;  %v41_v1 = vld [vmem:[%s288_s1 + $0x70] sm:$0xff]  ;;  %v42_v2 = vld [vmem:[%s288_s1 + $0x78] sm:$0xff]  ;;  %v39_v3 = vld [vmem:[%s288_s1 + $0x60] sm:$0xff] }
   0x2   :  { %v52_v4 = vpack.c.bf16 %v42_v2, %v41_v1  ;;  %v40_v5 = vld [vmem:[%s288_s1 + $0x68] sm:$0xff]  ;;  %v37_v7 = vld [vmem:[%s288_s1 + $0x50] sm:$0xff]  ;;  %v38_v8 = vld [vmem:[%s288_s1 + $0x58] sm:$0xff] }
   0x3   :  { %v51_v6 = vpack.c.bf16 %v40_v5, %v39_v3  ;;  %v16_v9 = vld [vmem:[%s289_s0 + $0x8] sm:$0xff]  ;;  %v18_v10 = vld [vmem:[%s289_s0 + $0x18] sm:$0xff]  ;;  %v50_v12 = vpack.c.bf16 %v38_v8, %v37_v7  ;;  %v35_v15 = vld [vmem:[%s288_s1 + $0x40] sm:$0xff] }
   0x4   :  { %69 = vmatpush1.bf16.msra.mxu0 %v52_v4  ;;  %142 = vmatpush1.bf16.msra.mxu1 %v52_v4  ;;  %v20_v11 = vld [vmem:[%s289_s0 + $0x28] sm:$0xff]  ;;  %v24_v13 = vpack.c.bf16 %v18_v10, %v16_v9  ;;  %v22_v14 = vld [vmem:[%s289_s0 + $0x38] sm:$0xff]  ;;  %v33_v19 = vld [vmem:[%s288_s1 + $0x30] sm:$0xff] }
   0x5   :  { %70 = vmatprep.subr.bf16.mxu0 %v152_v0  ;;  %134 = vmatprep.subr.bf16.mxu1 %v152_v0  ;;  %v36_v16 = vld [vmem:[%s288_s1 + $0x48] sm:$0xff]  ;;  %v26_v17 = vpack.c.bf16 %v22_v14, %v20_v11  ;;  %v34_v20 = vld [vmem:[%s288_s1 + $0x38] sm:$0xff]  ;;  %v31_v22 = vld [vmem:[%s288_s1 + $0x20] sm:$0xff] }
   0x6   :  { %131 = vmatprep.mubr.msk.bf16.mxu0 %vm61_vm0, %v24_v13  ;;  %v49_v18 = vpack.c.bf16 %v36_v16, %v35_v15  ;;  %v48_v21 = vpack.c.bf16 %v34_v20, %v33_v19  ;;  %v32_v23 = vld [vmem:[%s288_s1 + $0x28] sm:$0xff]  ;;  %v29_v25 = vld [vmem:[%s288_s1 + $0x10] sm:$0xff]  ;;  %v30_v26 = vld [vmem:[%s288_s1 + $0x18] sm:$0xff] }
   0x7   :  { %132 = vmatprep.mubr.msk.bf16.mxu1 %vm61_vm0, %v26_v17  ;;  %v47_v24 = vpack.c.bf16 %v32_v23, %v31_v22  ;;  %v46_v27 = vpack.c.bf16 %v30_v26, %v29_v25  ;;  %v27_v28 = vld [vmem:[%s288_s1] sm:$0xff]  ;;  %v28_v29 = vld [vmem:[%s288_s1 + $0x8] sm:$0xff]  ;;  %v17_v35 = vld [vmem:[%s289_s0 + $0x10] sm:$0xff] }
   0x8   :  { %71 = vmatpush1.bf16.msra.mxu0 %v51_v6  ;;  %143 = vmatpush1.bf16.msra.mxu1 %v51_v6  ;;  %v45_v30 = vpack.c.bf16 %v28_v29, %v27_v28  ;;  %v43_v31 = vld [vmem:[%s288_s1 + $0x80] sm:$0xff]  ;;  %v44_v32 = vld [vmem:[%s288_s1 + $0x88] sm:$0xff]  ;;  %v21_v37 = vld [vmem:[%s289_s0 + $0x30] sm:$0xff] }
   0x9   :  { %72 = vmatprep.subr.bf16.mxu0 %v152_v0  ;;  %135 = vmatprep.subr.bf16.mxu1 %v152_v0  ;;  %v15_v33 = vld [vmem:[%s289_s0] sm:$0xff]  ;;  %v53_v34 = vpack.c.bf16 %v44_v32, %v43_v31 }
   0xa   :  { %v19_v36 = vld [vmem:[%s289_s0 + $0x20] sm:$0xff]  ;;  %v23_v38 = vpack.c.bf16 %v17_v35, %v15_v33 }
   0xb   :  { %v25_v39 = vpack.c.bf16 %v21_v37, %v19_v36  ;;  %v130_v40 = vld [vmem:[%s290_s2] ss:$0 sm:$0xff] }
   0xc   :  { %73 = vmatpush1.bf16.msra.mxu0 %v50_v12  ;;  %144 = vmatpush1.bf16.msra.mxu1 %v50_v12 }
   0xd   :  { %74 = vmatprep.subr.bf16.mxu0 %v152_v0  ;;  %136 = vmatprep.subr.bf16.mxu1 %v152_v0 }
  0x10   :  { %75 = vmatpush1.bf16.msra.mxu0 %v49_v18  ;;  %145 = vmatpush1.bf16.msra.mxu1 %v49_v18 }
  0x11   :  { %76 = vmatprep.subr.bf16.mxu0 %v152_v0  ;;  %137 = vmatprep.subr.bf16.mxu1 %v152_v0 }
  0x14   :  { %77 = vmatpush1.bf16.msra.mxu0 %v48_v21  ;;  %146 = vmatpush1.bf16.msra.mxu1 %v48_v21 }
  0x15   :  { %78 = vmatprep.subr.bf16.mxu0 %v152_v0  ;;  %138 = vmatprep.subr.bf16.mxu1 %v152_v0 }
  0x18   :  { %79 = vmatpush1.bf16.msra.mxu0 %v47_v24  ;;  %147 = vmatpush1.bf16.msra.mxu1 %v47_v24 }
  0x19   :  { %80 = vmatprep.subr.bf16.mxu0 %v152_v0  ;;  %139 = vmatprep.subr.bf16.mxu1 %v152_v0 }
  0x1c   :  { %81 = vmatpush1.bf16.msra.mxu0 %v46_v27  ;;  %148 = vmatpush1.bf16.msra.mxu1 %v46_v27 }
  0x1d   :  { %82 = vmatprep.subr.bf16.mxu0 %v152_v0  ;;  %140 = vmatprep.subr.bf16.mxu1 %v152_v0 }
  0x20   :  { %83 = vmatpush1.bf16.msra.mxu0 %v45_v30  ;;  %149 = vmatpush1.bf16.msra.mxu1 %v45_v30 }
  0x21   :  { %98 = vmatprep.subr.bf16.mxu0 %v152_v0  ;;  %141 = vmatprep.subr.bf16.mxu1 %v152_v0 }
  0x24   :  { %99 = vmatpush2.bf16.msra.mxu0 %v53_v34  ;;  %150 = vmatpush2.bf16.msra.mxu1 %v53_v34 }
  0x27   :  { %101 = vmatmul.mubr.bf16.vlgmr.msra.gmra.mxu0 %v23_v38  ;;  %109 = vmatmul.mubr.bf16.vlgmr.msra.gmra.mxu1 %v25_v39 }
  0xe7   :  { %v102_v41 = vpop.f32.mrf.mxu0  ;;  %v110_v42 = vpop.f32.mrf.mxu1 }
  0xe8   :  { %v103_v43 = vadd.f32 %v130_v40, %v102_v41  ;;  %v111_v44 = vadd.f32 %v130_v40, %v110_v42 }
  0xe9   :  { %v104_v45 = vpop.f32.mrf.mxu0  ;;  %v112_v46 = vpop.f32.mrf.mxu1 }
  0xea   :  { %v117_v47 = vmax.f32 %v103_v43, 0.0  ;;  %v119_v48 = vmax.f32 %v111_v44, 0.0 }
  0xeb   :  { %v105_v49 = vpop.f32.mrf.mxu0  ;;  %v113_v50 = vpop.f32.mrf.mxu1 }
  0xec   :  { %122 = vst.msk [vmem:[%s291_s3] sm:$0xff] %vm121_vm1, %v117_v47  ;;  %124 = vst.msk [vmem:[%s291_s3 + $0x10] sm:$0xff] %vm121_vm1, %v119_v48  ;;  %v106_v51 = vadd.f32 %v130_v40, %v105_v49  ;;  %v114_v52 = vadd.f32 %v130_v40, %v113_v50 }
  0xed   :  { %v107_v53 = vpop.f32.mrf.mxu0  ;;  %v115_v54 = vpop.f32.mrf.mxu1 }
  0xee   :  { %v118_v55 = vmax.f32 %v106_v51, 0.0  ;;  %v120_v56 = vmax.f32 %v114_v52, 0.0 }
  0xf0   :  { %123 = vst.msk [vmem:[%s291_s3 + $0x8] sm:$0xff] %vm121_vm1, %v118_v55  ;;  %125 = vst.msk [vmem:[%s291_s3 + $0x18] sm:$0xff] %vm121_vm1, %v120_v56 }

// kernel: llm_agent_forward.15
= control target key start
LH: loop header
LB: loop body
LE: loop exit
PB: predicated region body
PF: predicated region fallthrough
CT: control target
= control target key end

     0   :  { %v214_v0 = vmov 0.0   ;;  %vm215_vm0 = vmmov 0   ;;  %vm132_vm1 = vcmask 261120   ;;  %s376_s1 = inlined_call_operand.vmem [shape: f32[128,32], index: 1, kind: input, shape index: {}]   ;;  %s377_s0 = inlined_call_operand.vmem [shape: f32[72,128], index: 0, kind: input, shape index: {}]   ;;  %s378_s2 = inlined_call_operand.vmem [shape: f32[1,32], index: 2, kind: input, shape index: {}]   ;;  %s379_s3 = inlined_call_operand.vmem [shape: f32[72,32], index: 3, kind: output, shape index: {}]  }
   0x1   :  { %160 = vmatprep.subr.bf16.mxu0 %v214_v0  ;;  %v43_v1 = vld [vmem:[%s376_s1 + $0x70] sm:$0xff]  ;;  %v44_v2 = vld [vmem:[%s376_s1 + $0x78] sm:$0xff]  ;;  %196 = vmatprep.subr.bf16.mxu1 %v214_v0  ;;  %v41_v3 = vld [vmem:[%s376_s1 + $0x60] sm:$0xff] }
   0x2   :  { %v52_v4 = vpack.c.bf16 %v44_v2, %v43_v1  ;;  %v42_v5 = vld [vmem:[%s376_s1 + $0x68] sm:$0xff]  ;;  %176 = vmatprep.mubr.msk.bf16.mxu0 %vm215_vm0, %v214_v0  ;;  %188 = vmatprep.mubr.msk.bf16.mxu1 %vm215_vm0, %v214_v0  ;;  %v39_v7 = vld [vmem:[%s376_s1 + $0x50] sm:$0xff]  ;;  %v40_v8 = vld [vmem:[%s376_s1 + $0x58] sm:$0xff] }
   0x3   :  { %v51_v6 = vpack.c.bf16 %v42_v5, %v41_v3  ;;  %v50_v9 = vpack.c.bf16 %v40_v8, %v39_v7  ;;  %v37_v10 = vld [vmem:[%s376_s1 + $0x40] sm:$0xff]  ;;  %v38_v11 = vld [vmem:[%s376_s1 + $0x48] sm:$0xff]  ;;  %v35_v13 = vld [vmem:[%s376_s1 + $0x30] sm:$0xff] }
   0x4   :  { %161 = vmatpush3.bf16.msra.mxu0 %v52_v4  ;;  %204 = vmatpush3.bf16.msra.mxu1 %v52_v4  ;;  %v49_v12 = vpack.c.bf16 %v38_v11, %v37_v10  ;;  %v36_v14 = vld [vmem:[%s376_s1 + $0x38] sm:$0xff]  ;;  %v33_v16 = vld [vmem:[%s376_s1 + $0x20] sm:$0xff]  ;;  %v34_v17 = vld [vmem:[%s376_s1 + $0x28] sm:$0xff] }
   0x5   :  { %162 = vmatprep.subr.bf16.mxu0 %v214_v0  ;;  %197 = vmatprep.subr.bf16.mxu1 %v214_v0  ;;  %v48_v15 = vpack.c.bf16 %v36_v14, %v35_v13  ;;  %v47_v18 = vpack.c.bf16 %v34_v17, %v33_v16  ;;  %v31_v19 = vld [vmem:[%s376_s1 + $0x10] sm:$0xff]  ;;  %v32_v20 = vld [vmem:[%s376_s1 + $0x18] sm:$0xff]  ;;  %v29_v22 = vld [vmem:[%s376_s1] sm:$0xff] }
   0x6   :  { %v46_v21 = vpack.c.bf16 %v32_v20, %v31_v19  ;;  %v30_v23 = vld [vmem:[%s376_s1 + $0x8] sm:$0xff]  ;;  %v15_v24 = vld [vmem:[%s377_s0] sm:$0xff]  ;;  %v21_v27 = vld [vmem:[%s377_s0 + $0x30] sm:$0xff] }
   0x7   :  { %v45_v25 = vpack.c.bf16 %v30_v23, %v29_v22  ;;  %v16_v26 = vld [vmem:[%s377_s0 + $0x8] sm:$0xff]  ;;  %v22_v28 = vld [vmem:[%s377_s0 + $0x38] sm:$0xff]  ;;  %v17_v31 = vld [vmem:[%s377_s0 + $0x10] sm:$0xff] }
   0x8   :  { %163 = vmatpush3.bf16.msra.mxu0 %v51_v6  ;;  %205 = vmatpush3.bf16.msra.mxu1 %v51_v6  ;;  %v24_v29 = vpack.c.bf16 %v16_v26, %v15_v24  ;;  %v27_v30 = vpack.c.bf16 %v22_v28, %v21_v27  ;;  %v18_v32 = vld [vmem:[%s377_s0 + $0x18] sm:$0xff]  ;;  %v23_v33 = vld [vmem:[%s377_s0 + $0x40] sm:$0xff]  ;;  %v20_v37 = vld [vmem:[%s377_s0 + $0x28] sm:$0xff] }
   0x9   :  { %164 = vmatprep.subr.bf16.mxu0 %v214_v0  ;;  %198 = vmatprep.subr.bf16.mxu1 %v214_v0  ;;  %v25_v34 = vpack.c.bf16 %v18_v32, %v17_v31  ;;  %v28_v35 = vpack.c.bf16 %v23_v33, %v23_v33  ;;  %v19_v36 = vld [vmem:[%s377_s0 + $0x20] sm:$0xff] }
   0xa   :  { %v26_v38 = vpack.c.bf16 %v20_v37, %v19_v36  ;;  %v146_v39 = vld [vmem:[%s378_s2] ss:$0 sm:$0xff] }
   0xc   :  { %165 = vmatpush3.bf16.msra.mxu0 %v50_v9  ;;  %206 = vmatpush3.bf16.msra.mxu1 %v50_v9 }
   0xd   :  { %166 = vmatprep.subr.bf16.mxu0 %v214_v0  ;;  %199 = vmatprep.subr.bf16.mxu1 %v214_v0 }
  0x10   :  { %167 = vmatpush3.bf16.msra.mxu0 %v49_v12  ;;  %207 = vmatpush3.bf16.msra.mxu1 %v49_v12 }
  0x11   :  { %168 = vmatprep.subr.bf16.mxu0 %v214_v0  ;;  %200 = vmatprep.subr.bf16.mxu1 %v214_v0 }
  0x14   :  { %169 = vmatpush3.bf16.msra.mxu0 %v48_v15  ;;  %208 = vmatpush3.bf16.msra.mxu1 %v48_v15 }
  0x15   :  { %170 = vmatprep.subr.bf16.mxu0 %v214_v0  ;;  %201 = vmatprep.subr.bf16.mxu1 %v214_v0 }
  0x18   :  { %171 = vmatpush3.bf16.msra.mxu0 %v47_v18  ;;  %209 = vmatpush3.bf16.msra.mxu1 %v47_v18 }
  0x19   :  { %172 = vmatprep.subr.bf16.mxu0 %v214_v0  ;;  %202 = vmatprep.subr.bf16.mxu1 %v214_v0 }
  0x1c   :  { %173 = vmatpush3.bf16.msra.mxu0 %v46_v21  ;;  %210 = vmatpush3.bf16.msra.mxu1 %v46_v21 }
  0x1d   :  { %174 = vmatprep.subr.bf16.mxu0 %v214_v0  ;;  %203 = vmatprep.subr.bf16.mxu1 %v214_v0 }
  0x20   :  { %175 = vmatpush3.bf16.msra.mxu0 %v45_v25  ;;  %211 = vmatpush3.bf16.msra.mxu1 %v45_v25 }
  0x23   :  { %177 = vmatmul.mubr.bf16.vlgmr.msra.gmra.mxu0 %v24_v29  ;;  %189 = vmatmul.mubr.bf16.vlgmr.msra.gmra.mxu1 %v27_v30 }
  0x24   :  { %180 = vmatprep.mubr.msk.bf16.mxu0 %vm215_vm0, %v214_v0  ;;  %192 = vmatprep.mubr.msk.bf16.mxu1 %vm215_vm0, %v214_v0 }
  0x2b   :  { %181 = vmatmul.mubr.bf16.gmra.mxu0 %v25_v34  ;;  %193 = vmatmul.mubr.bf16.gmra.mxu1 %v28_v35 }
  0x2c   :  { %184 = vmatprep.mubr.msk.bf16.mxu0 %vm215_vm0, %v214_v0 }
  0x33   :  { %185 = vmatmul.mubr.bf16.gmra.mxu0 %v26_v38 }
  0xe3   :  { %v94_v40 = vpop.f32.mrf.mxu0  ;;  %v118_v41 = vpop.f32.mrf.mxu1 }
  0xe4   :  { %v95_v42 = vadd.f32 %v146_v39, %v94_v40  ;;  %v119_v43 = vadd.f32 %v146_v39, %v118_v41 }
  0xe5   :  { %v178_v44 = vpop.f32.mrf.mxu0  ;;  %v190_v45 = vpop.f32.mrf.mxu1 }
  0xe6   :  { %133 = vst.msk [vmem:[%s379_s3] sm:$0xff] %vm132_vm1, %v95_v42  ;;  %139 = vst.msk [vmem:[%s379_s3 + $0x30] sm:$0xff] %vm132_vm1, %v119_v43 }
  0xe7   :  { %v97_v46 = vpop.f32.mrf.mxu0  ;;  %v121_v47 = vpop.f32.mrf.mxu1 }
  0xe8   :  { %v98_v48 = vadd.f32 %v146_v39, %v97_v46  ;;  %v122_v49 = vadd.f32 %v146_v39, %v121_v47 }
  0xe9   :  { %v179_v50 = vpop.f32.mrf.mxu0  ;;  %v191_v51 = vpop.f32.mrf.mxu1 }
  0xea   :  { %134 = vst.msk [vmem:[%s379_s3 + $0x8] sm:$0xff] %vm132_vm1, %v98_v48  ;;  %140 = vst.msk [vmem:[%s379_s3 + $0x38] sm:$0xff] %vm132_vm1, %v122_v49 }
  0xeb   :  { %v102_v52 = vpop.f32.mrf.mxu0  ;;  %v126_v53 = vpop.f32.mrf.mxu1 }
  0xec   :  { %v103_v54 = vadd.f32 %v146_v39, %v102_v52  ;;  %v127_v55 = vadd.f32 %v146_v39, %v126_v53 }
  0xed   :  { %v182_v56 = vpop.f32.mrf.mxu0  ;;  %v194_v57 = vpop.f32.mrf.mxu1 }
  0xee   :  { %135 = vst.msk [vmem:[%s379_s3 + $0x10] sm:$0xff] %vm132_vm1, %v103_v54  ;;  %141 = vst.msk [vmem:[%s379_s3 + $0x40] sm:$0xff] %vm132_vm1, %v127_v55 }
  0xef   :  { %v105_v58 = vpop.f32.mrf.mxu0  ;;  %v129_v59 = vpop.f32.mrf.mxu1 }
  0xf0   :  { %v106_v60 = vadd.f32 %v146_v39, %v105_v58 }
  0xf1   :  { %v183_v61 = vpop.f32.mrf.mxu0  ;;  %v195_v62 = vpop.f32.mrf.mxu1 }
  0xf2   :  { %136 = vst.msk [vmem:[%s379_s3 + $0x18] sm:$0xff] %vm132_vm1, %v106_v60 }
  0xf3   :  { %v110_v63 = vpop.f32.mrf.mxu0 }
  0xf4   :  { %v111_v0 = vadd.f32 %v146_v39, %v110_v63 }
  0xf5   :  { %v186_v1 = vpop.f32.mrf.mxu0 }
  0xf6   :  { %137 = vst.msk [vmem:[%s379_s3 + $0x20] sm:$0xff] %vm132_vm1, %v111_v0 }
  0xf7   :  { %v113_v2 = vpop.f32.mrf.mxu0 }
  0xf8   :  { %v114_v3 = vadd.f32 %v146_v39, %v113_v2 }
  0xf9   :  { %v187_v4 = vpop.f32.mrf.mxu0 }
  0xfa   :  { %138 = vst.msk [vmem:[%s379_s3 + $0x28] sm:$0xff] %vm132_vm1, %v114_v3 }

// kernel: llm_agent_forward.17
= control target key start
LH: loop header
LB: loop body
LE: loop exit
PB: predicated region body
PF: predicated region fallthrough
CT: control target
= control target key end

     0   :  { %v196_v0 = vmov 0.0   ;;  %vm197_vm0 = vmmov 0   ;;  %vm53_vm1 = vcmask 261120   ;;  %s330_s1 = inlined_call_operand.vmem [shape: f32[32,32], index: 1, kind: input, shape index: {}]   ;;  %s331_s0 = inlined_call_operand.vmem [shape: f32[72,32], index: 0, kind: input, shape index: {}]   ;;  %s332_s2 = inlined_call_operand.vmem [shape: f32[72,32], index: 2, kind: input, shape index: {}]   ;;  %s333_s3 = inlined_call_operand.vmem [shape: f32[72,32], index: 3, kind: output, shape index: {}]  }
   0x1   :  { %166 = vmatprep.subr.bf16.mxu0 %v196_v0  ;;  %v31_v1 = vld [vmem:[%s330_s1 + $0x10] sm:$0xff]  ;;  %v32_v2 = vld [vmem:[%s330_s1 + $0x18] sm:$0xff]  ;;  %190 = vmatprep.subr.bf16.mxu1 %v196_v0  ;;  %v29_v3 = vld [vmem:[%s330_s1] sm:$0xff] }
   0x2   :  { %v34_v4 = vpack.c.bf16 %v32_v2, %v31_v1  ;;  %v30_v5 = vld [vmem:[%s330_s1 + $0x8] sm:$0xff]  ;;  %170 = vmatprep.mubr.msk.bf16.mxu0 %vm197_vm0, %v196_v0  ;;  %182 = vmatprep.mubr.msk.bf16.mxu1 %vm197_vm0, %v196_v0  ;;  %v15_v6 = vld [vmem:[%s331_s0] sm:$0xff]  ;;  %v21_v9 = vld [vmem:[%s331_s0 + $0x30] sm:$0xff] }
   0x3   :  { %v33_v7 = vpack.c.bf16 %v30_v5, %v29_v3  ;;  %v16_v8 = vld [vmem:[%s331_s0 + $0x8] sm:$0xff]  ;;  %v22_v10 = vld [vmem:[%s331_s0 + $0x38] sm:$0xff]  ;;  %v17_v13 = vld [vmem:[%s331_s0 + $0x10] sm:$0xff] }
   0x4   :  { %167 = vmatpush3.bf16.msra.mxu0 %v34_v4  ;;  %192 = vmatpush3.bf16.msra.mxu1 %v34_v4  ;;  %v24_v11 = vpack.c.bf16 %v16_v8, %v15_v6  ;;  %v27_v12 = vpack.c.bf16 %v22_v10, %v21_v9  ;;  %v18_v14 = vld [vmem:[%s331_s0 + $0x18] sm:$0xff]  ;;  %v23_v15 = vld [vmem:[%s331_s0 + $0x40] sm:$0xff]  ;;  %v20_v19 = vld [vmem:[%s331_s0 + $0x28] sm:$0xff] }
   0x5   :  { %168 = vmatprep.subr.bf16.mxu0 %v196_v0  ;;  %191 = vmatprep.subr.bf16.mxu1 %v196_v0  ;;  %v25_v16 = vpack.c.bf16 %v18_v14, %v17_v13  ;;  %v28_v17 = vpack.c.bf16 %v23_v15, %v23_v15  ;;  %v19_v18 = vld [vmem:[%s331_s0 + $0x20] sm:$0xff]  ;;  %v41_v22 = vld [vmem:[%s332_s2 + $0x30] sm:$0xff]  ;;  %v36_v25 = vld [vmem:[%s332_s2 + $0x8] sm:$0xff] }
   0x6   :  { %v26_v20 = vpack.c.bf16 %v20_v19, %v19_v18  ;;  %v35_v21 = vld [vmem:[%s332_s2] sm:$0xff]  ;;  %v50_v24 = vmax.f32 %v41_v22, 0.0  ;;  %v42_v26 = vld [vmem:[%s332_s2 + $0x38] sm:$0xff]  ;;  %v45_v31 = vmax.f32 %v36_v25, 0.0  ;;  %v37_v35 = vld [vmem:[%s332_s2 + $0x10] sm:$0xff] }
   0x7   :  { %v44_v23 = vmax.f32 %v35_v21, 0.0  ;;  %v51_v32 = vmax.f32 %v42_v26, 0.0  ;;  %v43_v36 = vld [vmem:[%s332_s2 + $0x40] sm:$0xff]  ;;  %v46_v41 = vmax.f32 %v37_v35, 0.0  ;;  %v38_v45 = vld [vmem:[%s332_s2 + $0x18] sm:$0xff]  ;;  %v40_v60 = vld [vmem:[%s332_s2 + $0x28] sm:$0xff] }
   0x8   :  { %169 = vmatpush3.bf16.msra.mxu0 %v33_v7  ;;  %193 = vmatpush3.bf16.msra.mxu1 %v33_v7  ;;  %v52_v42 = vmax.f32 %v43_v36, 0.0  ;;  %v47_v50 = vmax.f32 %v38_v45, 0.0  ;;  %v39_v53 = vld [vmem:[%s332_s2 + $0x20] sm:$0xff]  ;;  %v49_v63 = vmax.f32 %v40_v60, 0.0 }
   0x9   :  { %v48_v57 = vmax.f32 %v39_v53, 0.0 }
   0xb   :  { %171 = vmatmul.mubr.msk.bf16.vlgmr.msra.gmra.mxu0 %vm53_vm1, %v24_v11  ;;  %183 = vmatmul.mubr.msk.bf16.vlgmr.msra.gmra.mxu1 %vm53_vm1, %v27_v12 }
   0xc   :  { %174 = vmatprep.mubr.msk.bf16.mxu0 %vm197_vm0, %v196_v0  ;;  %186 = vmatprep.mubr.msk.bf16.mxu1 %vm197_vm0, %v196_v0 }
  0x13   :  { %175 = vmatmul.mubr.msk.bf16.gmra.mxu0 %vm53_vm1, %v25_v16  ;;  %187 = vmatmul.mubr.msk.bf16.gmra.mxu1 %vm53_vm1, %v28_v17 }
  0x14   :  { %178 = vmatprep.mubr.msk.bf16.mxu0 %vm197_vm0, %v196_v0 }
  0x1b   :  { %179 = vmatmul.mubr.msk.bf16.gmra.mxu0 %vm53_vm1, %v26_v20 }
  0xcb   :  { %v103_v27 = vpop.f32.mrf.mxu0  ;;  %v127_v28 = vpop.f32.mrf.mxu1 }
  0xcc   :  { %v104_v29 = vadd.f32 %v103_v27, %v44_v23  ;;  %v128_v30 = vadd.f32 %v127_v28, %v50_v24 }
  0xcd   :  { %v172_v33 = vpop.f32.mrf.mxu0  ;;  %v184_v34 = vpop.f32.mrf.mxu1 }
  0xce   :  { %141 = vst.msk [vmem:[%s333_s3] sm:$0xff] %vm53_vm1, %v104_v29  ;;  %147 = vst.msk [vmem:[%s333_s3 + $0x30] sm:$0xff] %vm53_vm1, %v128_v30 }
  0xcf   :  { %v106_v37 = vpop.f32.mrf.mxu0  ;;  %v130_v38 = vpop.f32.mrf.mxu1 }
  0xd0   :  { %v107_v39 = vadd.f32 %v106_v37, %v45_v31  ;;  %v131_v40 = vadd.f32 %v130_v38, %v51_v32 }
  0xd1   :  { %v173_v43 = vpop.f32.mrf.mxu0  ;;  %v185_v44 = vpop.f32.mrf.mxu1 }
  0xd2   :  { %142 = vst.msk [vmem:[%s333_s3 + $0x8] sm:$0xff] %vm53_vm1, %v107_v39  ;;  %148 = vst.msk [vmem:[%s333_s3 + $0x38] sm:$0xff] %vm53_vm1, %v131_v40 }
  0xd3   :  { %v111_v46 = vpop.f32.mrf.mxu0  ;;  %v135_v47 = vpop.f32.mrf.mxu1 }
  0xd4   :  { %v112_v48 = vadd.f32 %v111_v46, %v46_v41  ;;  %v136_v49 = vadd.f32 %v135_v47, %v52_v42 }
  0xd5   :  { %v176_v51 = vpop.f32.mrf.mxu0  ;;  %v188_v52 = vpop.f32.mrf.mxu1 }
  0xd6   :  { %143 = vst.msk [vmem:[%s333_s3 + $0x10] sm:$0xff] %vm53_vm1, %v112_v48  ;;  %149 = vst.msk [vmem:[%s333_s3 + $0x40] sm:$0xff] %vm53_vm1, %v136_v49 }
  0xd7   :  { %v114_v54 = vpop.f32.mrf.mxu0  ;;  %v138_v55 = vpop.f32.mrf.mxu1 }
  0xd8   :  { %v115_v56 = vadd.f32 %v114_v54, %v47_v50 }
  0xd9   :  { %v177_v58 = vpop.f32.mrf.mxu0  ;;  %v189_v59 = vpop.f32.mrf.mxu1 }
  0xda   :  { %144 = vst.msk [vmem:[%s333_s3 + $0x18] sm:$0xff] %vm53_vm1, %v115_v56 }
  0xdb   :  { %v119_v61 = vpop.f32.mrf.mxu0 }
  0xdc   :  { %v120_v62 = vadd.f32 %v119_v61, %v48_v57 }
  0xdd   :  { %v180_v0 = vpop.f32.mrf.mxu0 }
  0xde   :  { %145 = vst.msk [vmem:[%s333_s3 + $0x20] sm:$0xff] %vm53_vm1, %v120_v62 }
  0xdf   :  { %v122_v1 = vpop.f32.mrf.mxu0 }
  0xe0   :  { %v123_v2 = vadd.f32 %v122_v1, %v49_v63 }
  0xe1   :  { %v181_v3 = vpop.f32.mrf.mxu0 }
  0xe2   :  { %146 = vst.msk [vmem:[%s333_s3 + $0x28] sm:$0xff] %vm53_vm1, %v123_v2 }

// kernel: llm_agent_forward.16
= control target key start
LH: loop header
LB: loop body
LE: loop exit
PB: predicated region body
PF: predicated region fallthrough
CT: control target
= control target key end

     0   :  { %v401_v3 = vmov 0.0   ;;  %vm402_vm0 = vmmov 0   ;;  %vm135_vm1 = vcmask 261120   ;;  %s660_s1 = inlined_call_operand.vmem [shape: f32[288,32], index: 1, kind: input, shape index: {}]   ;;  %s661_s0 = inlined_call_operand.vmem [shape: f32[72,288], index: 0, kind: input, shape index: {}]   ;;  %s662_s2 = inlined_call_operand.vmem [shape: f32[72,32], index: 2, kind: output, shape index: {}]  }
   0x1   :  { %v111_v0 = vld [vmem:[%s660_s1 + $0xf0] sm:$0xff]  ;;  %v112_v1 = vld [vmem:[%s660_s1 + $0xf8] sm:$0xff]  ;;  %375 = vmatprep.subr.bf16.mxu1 %v401_v3  ;;  %379 = vmatprep.mubr.msk.bf16.mxu1 %vm402_vm0, %v401_v3  ;;  %v109_v6 = vld [vmem:[%s660_s1 + $0xe0] sm:$0xff] }
   0x2   :  { %v95_v2 = vld [vmem:[%s660_s1 + $0x70] sm:$0xff]  ;;  %v132_v4 = vpack.c.bf16 %v112_v1, %v111_v0  ;;  %v96_v5 = vld [vmem:[%s660_s1 + $0x78] sm:$0xff]  ;;  %v110_v7 = vld [vmem:[%s660_s1 + $0xe8] sm:$0xff] }
   0x3   :  { %v124_v8 = vpack.c.bf16 %v96_v5, %v95_v2  ;;  %v131_v9 = vpack.c.bf16 %v110_v7, %v109_v6  ;;  %v93_v10 = vld [vmem:[%s660_s1 + $0x60] sm:$0xff]  ;;  %v94_v11 = vld [vmem:[%s660_s1 + $0x68] sm:$0xff]  ;;  %v107_v12 = vld [vmem:[%s660_s1 + $0xd0] sm:$0xff] }
   0x4   :  { %322 = vmatprep.subr.bf16.mxu0 %v132_v4  ;;  %v108_v13 = vld [vmem:[%s660_s1 + $0xd8] sm:$0xff]  ;;  %v123_v14 = vpack.c.bf16 %v94_v11, %v93_v10  ;;  %v91_v16 = vld [vmem:[%s660_s1 + $0x50] sm:$0xff]  ;;  %v105_v18 = vld [vmem:[%s660_s1 + $0xc0] sm:$0xff] }
   0x5   :  { %323 = vmatpush3.bf16.msra.mxu0 %v124_v8  ;;  %v130_v15 = vpack.c.bf16 %v108_v13, %v107_v12  ;;  %v92_v17 = vld [vmem:[%s660_s1 + $0x58] sm:$0xff]  ;;  %v106_v19 = vld [vmem:[%s660_s1 + $0xc8] sm:$0xff]  ;;  %v115_v21 = vld [vmem:[%s660_s1 + $0x110] sm:$0xff] }
   0x6   :  { %324 = vmatprep.subr.bf16.mxu0 %v131_v9  ;;  %v122_v20 = vpack.c.bf16 %v92_v17, %v91_v16  ;;  %v116_v22 = vld [vmem:[%s660_s1 + $0x118] sm:$0xff]  ;;  %v129_v23 = vpack.c.bf16 %v106_v19, %v105_v18  ;;  %v89_v24 = vld [vmem:[%s660_s1 + $0x40] sm:$0xff]  ;;  %v90_v25 = vld [vmem:[%s660_s1 + $0x48] sm:$0xff] }
   0x7   :  { %v103_v26 = vld [vmem:[%s660_s1 + $0xb0] sm:$0xff]  ;;  %v134_v27 = vpack.c.bf16 %v116_v22, %v115_v21  ;;  %v104_v28 = vld [vmem:[%s660_s1 + $0xb8] sm:$0xff]  ;;  %v113_v29 = vld [vmem:[%s660_s1 + $0x100] sm:$0xff]  ;;  %v121_v32 = vpack.c.bf16 %v90_v25, %v89_v24 }
   0x8   :  { %v114_v30 = vld [vmem:[%s660_s1 + $0x108] sm:$0xff]  ;;  %v14_v33 = vld [vmem:[%s661_s0 + $0x10] sm:$0xff]  ;;  %v128_v36 = vpack.c.bf16 %v104_v28, %v103_v26  ;;  %v88_v38 = vld [vmem:[%s660_s1 + $0x38] sm:$0xff] }
   0x9   :  { %325 = vmatpush3.bf16.msra.mxu0 %v123_v14  ;;  %376 = vmatpush3.bf16.msra.mxu1 %v134_v27  ;;  %v133_v31 = vpack.c.bf16 %v114_v30, %v113_v29  ;;  %v17_v34 = vld [vmem:[%s661_s0 + $0x28] sm:$0xff]  ;;  %v87_v37 = vld [vmem:[%s660_s1 + $0x30] sm:$0xff]  ;;  %v41_v39 = vmax.f32 %v14_v33, 0.0  ;;  %v16_v41 = vld [vmem:[%s661_s0 + $0x20] sm:$0xff] }
   0xa   :  { %326 = vmatprep.subr.bf16.mxu0 %v130_v15  ;;  %377 = vmatprep.subr.bf16.mxu1 %v401_v3  ;;  %v13_v35 = vld [vmem:[%s661_s0 + $0x8] sm:$0xff]  ;;  %v44_v40 = vmax.f32 %v17_v34, 0.0  ;;  %v101_v43 = vld [vmem:[%s660_s1 + $0xa0] sm:$0xff]  ;;  %v43_v45 = vmax.f32 %v16_v41, 0.0  ;;  %v23_v48 = vld [vmem:[%s661_s0 + $0x58] sm:$0xff]  ;;  %v120_v49 = vpack.c.bf16 %v88_v38, %v87_v37 }
   0xb   :  { %v40_v42 = vmax.f32 %v13_v35, 0.0  ;;  %v102_v44 = vld [vmem:[%s660_s1 + $0xa8] sm:$0xff]  ;;  %v20_v47 = vld [vmem:[%s661_s0 + $0x40] sm:$0xff]  ;;  %v99_v54 = vld [vmem:[%s660_s1 + $0x90] sm:$0xff]  ;;  %v50_v57 = vmax.f32 %v23_v48, 0.0 }
   0xc   :  { %v68_v46 = vpack.c.bf16 %v44_v40, %v41_v39  ;;  %v127_v51 = vpack.c.bf16 %v102_v44, %v101_v43  ;;  %v85_v52 = vld [vmem:[%s660_s1 + $0x20] sm:$0xff]  ;;  %v86_v53 = vld [vmem:[%s660_s1 + $0x28] sm:$0xff]  ;;  %v100_v55 = vld [vmem:[%s660_s1 + $0x98] sm:$0xff]  ;;  %v47_v56 = vmax.f32 %v20_v47, 0.0 }
   0xd   :  { %327 = vmatpush3.bf16.msra.mxu0 %v122_v20  ;;  %378 = vmatpush3.bf16.msra.mxu1 %v133_v31  ;;  %v67_v50 = vpack.c.bf16 %v43_v45, %v40_v42  ;;  %v119_v58 = vpack.c.bf16 %v86_v53, %v85_v52  ;;  %v126_v59 = vpack.c.bf16 %v100_v55, %v99_v54  ;;  %v83_v60 = vld [vmem:[%s660_s1 + $0x10] sm:$0xff]  ;;  %v84_v61 = vld [vmem:[%s660_s1 + $0x18] sm:$0xff]  ;;  %v97_v62 = vld [vmem:[%s660_s1 + $0x80] sm:$0xff] }
   0xe   :  { %328 = vmatprep.subr.bf16.mxu0 %v129_v23  ;;  %v98_v63 = vld [vmem:[%s660_s1 + $0x88] sm:$0xff]  ;;  %v71_v0 = vpack.c.bf16 %v50_v57, %v47_v56  ;;  %v26_v1 = vld [vmem:[%s661_s0 + $0x70] sm:$0xff]  ;;  %v118_v4 = vpack.c.bf16 %v84_v61, %v83_v60  ;;  %v81_v5 = vld [vmem:[%s660_s1] sm:$0xff] }
   0xf   :  { %183 = vmatprep.mubr.bf16.mxu0 %v67_v50  ;;  %v29_v2 = vld [vmem:[%s661_s0 + $0x88] sm:$0xff]  ;;  %v12_v6 = vld [vmem:[%s661_s0] sm:$0xff]  ;;  %v15_v7 = vld [vmem:[%s661_s0 + $0x18] sm:$0xff]  ;;  %v125_v8 = vpack.c.bf16 %v98_v63, %v97_v62  ;;  %v53_v12 = vmax.f32 %v26_v1, 0.0 }
  0x10   :  { %380 = vmatmul.mubr.msk.bf16.vlgmr.msra.gmra.mxu1 %vm135_vm1, %v68_v46  ;;  %v82_v9 = vld [vmem:[%s660_s1 + $0x8] sm:$0xff]  ;;  %v19_v10 = vld [vmem:[%s661_s0 + $0x38] sm:$0xff]  ;;  %v22_v11 = vld [vmem:[%s661_s0 + $0x50] sm:$0xff]  ;;  %v56_v13 = vmax.f32 %v29_v2, 0.0  ;;  %v39_v14 = vmax.f32 %v12_v6, 0.0  ;;  %v42_v15 = vmax.f32 %v15_v7, 0.0 }
  0x11   :  { %329 = vmatpush3.bf16.msra.mxu0 %v121_v32  ;;  %383 = vmatprep.mubr.msk.bf16.mxu1 %vm402_vm0, %v401_v3  ;;  %v117_v16 = vpack.c.bf16 %v82_v9, %v81_v5  ;;  %v46_v17 = vmax.f32 %v19_v10, 0.0  ;;  %v49_v18 = vmax.f32 %v22_v11, 0.0  ;;  %v32_v21 = vld [vmem:[%s661_s0 + $0xa0] sm:$0xff]  ;;  %v35_v22 = vld [vmem:[%s661_s0 + $0xb8] sm:$0xff]  ;;  %v18_v24 = vld [vmem:[%s661_s0 + $0x30] sm:$0xff] }
  0x12   :  { %330 = vmatprep.subr.bf16.mxu0 %v128_v36  ;;  %v74_v19 = vpack.c.bf16 %v56_v13, %v53_v12  ;;  %v66_v20 = vpack.c.bf16 %v42_v15, %v39_v14  ;;  %v21_v25 = vld [vmem:[%s661_s0 + $0x48] sm:$0xff]  ;;  %v28_v27 = vld [vmem:[%s661_s0 + $0x80] sm:$0xff]  ;;  %v59_v28 = vmax.f32 %v32_v21, 0.0  ;;  %v62_v29 = vmax.f32 %v35_v22, 0.0  ;;  %v38_v36 = vld [vmem:[%s661_s0 + $0xd0] sm:$0xff] }
  0x13   :  { %v70_v23 = vpack.c.bf16 %v49_v18, %v46_v17  ;;  %v25_v26 = vld [vmem:[%s661_s0 + $0x68] sm:$0xff]  ;;  %v45_v30 = vmax.f32 %v18_v24, 0.0  ;;  %v48_v31 = vmax.f32 %v21_v25, 0.0  ;;  %v55_v33 = vmax.f32 %v28_v27, 0.0  ;;  %v24_v38 = vld [vmem:[%s661_s0 + $0x60] sm:$0xff]  ;;  %v27_v39 = vld [vmem:[%s661_s0 + $0x78] sm:$0xff] }
  0x14   :  { %v52_v32 = vmax.f32 %v25_v26, 0.0  ;;  %v77_v34 = vpack.c.bf16 %v62_v29, %v59_v28  ;;  %v31_v40 = vld [vmem:[%s661_s0 + $0x98] sm:$0xff]  ;;  %v34_v41 = vld [vmem:[%s661_s0 + $0xb0] sm:$0xff]  ;;  %v65_v42 = vmax.f32 %v38_v36, 0.0  ;;  %v51_v43 = vmax.f32 %v24_v38, 0.0  ;;  %v37_v52 = vld [vmem:[%s661_s0 + $0xc8] sm:$0xff] }
  0x15   :  { %331 = vmatpush3.bf16.msra.mxu0 %v120_v49  ;;  %v69_v35 = vpack.c.bf16 %v48_v31, %v45_v30  ;;  %v54_v44 = vmax.f32 %v27_v39, 0.0  ;;  %v58_v45 = vmax.f32 %v31_v40, 0.0  ;;  %v61_v46 = vmax.f32 %v34_v41, 0.0  ;;  %v30_v50 = vld [vmem:[%s661_s0 + $0x90] sm:$0xff]  ;;  %v36_v57 = vld [vmem:[%s661_s0 + $0xc0] sm:$0xff] }
  0x16   :  { %332 = vmatprep.subr.bf16.mxu0 %v127_v51  ;;  %v73_v37 = vpack.c.bf16 %v55_v33, %v52_v32  ;;  %v80_v47 = vpack.c.bf16 %v65_v42, %v65_v42  ;;  %v33_v51 = vld [vmem:[%s661_s0 + $0xa8] sm:$0xff]  ;;  %v64_v54 = vmax.f32 %v37_v52, 0.0 }
  0x17   :  { %v72_v48 = vpack.c.bf16 %v54_v44, %v51_v43  ;;  %v76_v49 = vpack.c.bf16 %v61_v46, %v58_v45  ;;  %v60_v53 = vmax.f32 %v33_v51, 0.0 }
  0x18   :  { %384 = vmatmul.mubr.msk.bf16.gmra.mxu1 %vm135_vm1, %v71_v0  ;;  %v79_v56 = vpack.c.bf16 %v64_v54, %v64_v54 }
  0x19   :  { %333 = vmatpush3.bf16.msra.mxu0 %v119_v58  ;;  %387 = vmatprep.mubr.msk.bf16.mxu1 %vm402_vm0, %v401_v3  ;;  %v63_v58 = vmax.f32 %v36_v57, 0.0 }
  0x1a   :  { %334 = vmatprep.subr.bf16.mxu0 %v126_v59 }
  0x1b   :  { %v78_v59 = vpack.c.bf16 %v63_v58, %v63_v58 }
  0x1d   :  { %335 = vmatpush3.bf16.msra.mxu0 %v118_v4 }
  0x1e   :  { %336 = vmatprep.subr.bf16.mxu0 %v125_v8 }
  0x20   :  { %388 = vmatmul.mubr.msk.bf16.gmra.mxu1 %vm135_vm1, %v74_v19 }
  0x21   :  { %337 = vmatpush3.bf16.msra.mxu0 %v117_v16  ;;  %391 = vmatprep.mubr.msk.bf16.mxu1 %vm402_vm0, %v401_v3 }
  0x24   :  { %184 = vmatmul.mubr.bf16.vlgmr.msra.gmra.mxu0 %v66_v20 }
  0x25   :  { %191 = vmatprep.mubr.bf16.mxu0 %v70_v23 }
  0x28   :  { %392 = vmatmul.mubr.msk.bf16.gmra.mxu1 %vm135_vm1, %v77_v34 }
  0x29   :  { %395 = vmatprep.mubr.msk.bf16.mxu1 %vm402_vm0, %v401_v3  ;;  %v57_v3 = vmax.f32 %v30_v50, 0.0 }
  0x2b   :  { %v75_v55 = vpack.c.bf16 %v60_v53, %v57_v3 }
  0x2c   :  { %192 = vmatmul.mubr.bf16.gmra.mxu0 %v69_v35 }
  0x2d   :  { %199 = vmatprep.mubr.bf16.mxu0 %v73_v37 }
  0x30   :  { %396 = vmatmul.mubr.msk.bf16.gmra.mxu1 %vm135_vm1, %v80_v47 }
  0x34   :  { %200 = vmatmul.mubr.bf16.gmra.mxu0 %v72_v48 }
  0x35   :  { %207 = vmatprep.mubr.bf16.mxu0 %v76_v49 }
  0x3c   :  { %208 = vmatmul.mubr.bf16.gmra.mxu0 %v75_v55 }
  0x3d   :  { %215 = vmatprep.mubr.bf16.mxu0 %v79_v56 }
  0x44   :  { %216 = vmatmul.mubr.bf16.gmra.mxu0 %v78_v59 }
  0xd0   :  { %v257_v60 = vpop.f32.mrf.mxu1 }
  0xd2   :  { %v381_v61 = vpop.f32.mrf.mxu1 }
  0xd4   :  { %v260_v62 = vpop.f32.mrf.mxu1 }
  0xd6   :  { %v382_v63 = vpop.f32.mrf.mxu1 }
  0xd8   :  { %v265_v0 = vpop.f32.mrf.mxu1 }
  0xda   :  { %v385_v1 = vpop.f32.mrf.mxu1 }
  0xdc   :  { %v268_v2 = vpop.f32.mrf.mxu1 }
  0xde   :  { %v386_v4 = vpop.f32.mrf.mxu1 }
  0xe0   :  { %v273_v5 = vpop.f32.mrf.mxu1 }
  0xe2   :  { %v389_v7 = vpop.f32.mrf.mxu1 }
  0xe4   :  { %v338_v6 = vpop.f32.mrf.mxu0  ;;  %v276_v10 = vpop.f32.mrf.mxu1 }
  0xe6   :  { %v339_v8 = vpop.f32.mrf.mxu0  ;;  %v390_v13 = vpop.f32.mrf.mxu1 }
  0xe7   :  { %v340_v9 = vadd.f32 %v339_v8, %v338_v6 }
  0xe8   :  { %v341_v11 = vpop.f32.mrf.mxu0  ;;  %v281_v17 = vpop.f32.mrf.mxu1 }
  0xe9   :  { %v258_v12 = vadd.f32 %v340_v9, %v257_v60 }
  0xea   :  { %v342_v14 = vpop.f32.mrf.mxu0  ;;  %v393_v20 = vpop.f32.mrf.mxu1 }
  0xeb   :  { %v295_v15 = vmax.f32 %v258_v12, 0.0  ;;  %v343_v16 = vadd.f32 %v342_v14, %v341_v11 }
  0xec   :  { %v344_v18 = vpop.f32.mrf.mxu0  ;;  %v284_v24 = vpop.f32.mrf.mxu1 }
  0xed   :  { %304 = vst.msk [vmem:[%s662_s2] sm:$0xff] %vm135_vm1, %v295_v15  ;;  %v261_v19 = vadd.f32 %v343_v16, %v260_v62 }
  0xee   :  { %v345_v21 = vpop.f32.mrf.mxu0  ;;  %v394_v27 = vpop.f32.mrf.mxu1 }
  0xef   :  { %v296_v22 = vmax.f32 %v261_v19, 0.0  ;;  %v346_v23 = vadd.f32 %v345_v21, %v344_v18 }
  0xf0   :  { %v347_v25 = vpop.f32.mrf.mxu0  ;;  %v289_v31 = vpop.f32.mrf.mxu1 }
  0xf1   :  { %305 = vst.msk [vmem:[%s662_s2 + $0x8] sm:$0xff] %vm135_vm1, %v296_v22  ;;  %v266_v26 = vadd.f32 %v346_v23, %v265_v0 }
  0xf2   :  { %v348_v28 = vpop.f32.mrf.mxu0  ;;  %v397_v34 = vpop.f32.mrf.mxu1 }
  0xf3   :  { %v297_v29 = vmax.f32 %v266_v26, 0.0  ;;  %v349_v30 = vadd.f32 %v348_v28, %v347_v25 }
  0xf4   :  { %v350_v32 = vpop.f32.mrf.mxu0  ;;  %v292_v38 = vpop.f32.mrf.mxu1 }
  0xf5   :  { %306 = vst.msk [vmem:[%s662_s2 + $0x10] sm:$0xff] %vm135_vm1, %v297_v29  ;;  %v269_v33 = vadd.f32 %v349_v30, %v268_v2 }
  0xf6   :  { %v351_v35 = vpop.f32.mrf.mxu0  ;;  %v398_v41 = vpop.f32.mrf.mxu1 }
  0xf7   :  { %v298_v36 = vmax.f32 %v269_v33, 0.0  ;;  %v352_v37 = vadd.f32 %v351_v35, %v350_v32 }
  0xf8   :  { %v353_v39 = vpop.f32.mrf.mxu0 }
  0xf9   :  { %307 = vst.msk [vmem:[%s662_s2 + $0x18] sm:$0xff] %vm135_vm1, %v298_v36  ;;  %v274_v40 = vadd.f32 %v352_v37, %v273_v5 }
  0xfa   :  { %v354_v42 = vpop.f32.mrf.mxu0 }
  0xfb   :  { %v299_v43 = vmax.f32 %v274_v40, 0.0  ;;  %v355_v44 = vadd.f32 %v354_v42, %v353_v39 }
  0xfc   :  { %v356_v45 = vpop.f32.mrf.mxu0 }
  0xfd   :  { %308 = vst.msk [vmem:[%s662_s2 + $0x20] sm:$0xff] %vm135_vm1, %v299_v43  ;;  %v277_v46 = vadd.f32 %v355_v44, %v276_v10 }
  0xfe   :  { %v357_v47 = vpop.f32.mrf.mxu0 }
  0xff   :  { %v300_v48 = vmax.f32 %v277_v46, 0.0  ;;  %v358_v49 = vadd.f32 %v357_v47, %v356_v45 }
 0x100   :  { %v359_v50 = vpop.f32.mrf.mxu0 }
 0x101   :  { %309 = vst.msk [vmem:[%s662_s2 + $0x28] sm:$0xff] %vm135_vm1, %v300_v48  ;;  %v282_v51 = vadd.f32 %v358_v49, %v281_v17 }
 0x102   :  { %v360_v52 = vpop.f32.mrf.mxu0 }
 0x103   :  { %v301_v3 = vmax.f32 %v282_v51, 0.0  ;;  %v361_v53 = vadd.f32 %v360_v52, %v359_v50 }
 0x104   :  { %v362_v54 = vpop.f32.mrf.mxu0 }
 0x105   :  { %310 = vst.msk [vmem:[%s662_s2 + $0x30] sm:$0xff] %vm135_vm1, %v301_v3  ;;  %v285_v55 = vadd.f32 %v361_v53, %v284_v24 }
 0x106   :  { %v363_v56 = vpop.f32.mrf.mxu0 }
 0x107   :  { %v302_v57 = vmax.f32 %v285_v55, 0.0  ;;  %v364_v58 = vadd.f32 %v363_v56, %v362_v54 }
 0x108   :  { %v365_v59 = vpop.f32.mrf.mxu0 }
 0x109   :  { %311 = vst.msk [vmem:[%s662_s2 + $0x38] sm:$0xff] %vm135_vm1, %v302_v57  ;;  %v290_v60 = vadd.f32 %v364_v58, %v289_v31 }
 0x10a   :  { %v366_v61 = vpop.f32.mrf.mxu0 }
 0x10b   :  { %v303_v62 = vmax.f32 %v290_v60, 0.0 }
 0x10d   :  { %312 = vst.msk [vmem:[%s662_s2 + $0x40] sm:$0xff] %vm135_vm1, %v303_v62 }

// kernel: llm_agent_forward.20
= control target key start
LH: loop header
LB: loop body
LE: loop exit
PB: predicated region body
PF: predicated region fallthrough
CT: control target
= control target key end

     0   :  { %v195_v0 = vmov 0.0   ;;  %vm196_vm0 = vmmov 0   ;;  %vm51_vm1 = vcmask 261120   ;;  %s305_s1 = inlined_call_operand.vmem [shape: f32[32,32], index: 1, kind: input, shape index: {}]   ;;  %s306_s0 = inlined_call_operand.vmem [shape: f32[72,32], index: 0, kind: input, shape index: {}]   ;;  %s307_s2 = inlined_call_operand.vmem [shape: f32[1,32], index: 2, kind: input, shape index: {}]   ;;  %s308_s3 = inlined_call_operand.vmem [shape: f32[72,32], index: 3, kind: output, shape index: {}]  }
   0x1   :  { %165 = vmatprep.subr.bf16.mxu0 %v195_v0  ;;  %v40_v1 = vld [vmem:[%s305_s1 + $0x10] sm:$0xff]  ;;  %v41_v2 = vld [vmem:[%s305_s1 + $0x18] sm:$0xff]  ;;  %189 = vmatprep.subr.bf16.mxu1 %v195_v0  ;;  %v38_v3 = vld [vmem:[%s305_s1] sm:$0xff] }
   0x2   :  { %v43_v4 = vpack.c.bf16 %v41_v2, %v40_v1  ;;  %v39_v5 = vld [vmem:[%s305_s1 + $0x8] sm:$0xff]  ;;  %169 = vmatprep.mubr.msk.bf16.mxu0 %vm196_vm0, %v195_v0  ;;  %v15_v6 = vld [vmem:[%s306_s0] sm:$0xff]  ;;  %181 = vmatprep.mubr.msk.bf16.mxu1 %vm196_vm0, %v195_v0  ;;  %v21_v10 = vld [vmem:[%s306_s0 + $0x30] sm:$0xff] }
   0x3   :  { %v16_v7 = vld [vmem:[%s306_s0 + $0x8] sm:$0xff]  ;;  %v24_v8 = vmax.f32 %v15_v6, 0.0  ;;  %v22_v11 = vld [vmem:[%s306_s0 + $0x38] sm:$0xff]  ;;  %v42_v12 = vpack.c.bf16 %v39_v5, %v38_v3  ;;  %v30_v13 = vmax.f32 %v21_v10, 0.0  ;;  %v17_v17 = vld [vmem:[%s306_s0 + $0x10] sm:$0xff] }
   0x4   :  { %v25_v9 = vmax.f32 %v16_v7, 0.0  ;;  %166 = vmatpush3.bf16.msra.mxu0 %v43_v4  ;;  %191 = vmatpush3.bf16.msra.mxu1 %v43_v4  ;;  %v31_v14 = vmax.f32 %v22_v11, 0.0  ;;  %v18_v18 = vld [vmem:[%s306_s0 + $0x18] sm:$0xff]  ;;  %v23_v19 = vld [vmem:[%s306_s0 + $0x40] sm:$0xff]  ;;  %v26_v20 = vmax.f32 %v17_v17, 0.0  ;;  %v20_v26 = vld [vmem:[%s306_s0 + $0x28] sm:$0xff] }
   0x5   :  { %167 = vmatprep.subr.bf16.mxu0 %v195_v0  ;;  %190 = vmatprep.subr.bf16.mxu1 %v195_v0  ;;  %v27_v21 = vmax.f32 %v18_v18, 0.0  ;;  %v32_v22 = vmax.f32 %v23_v19, 0.0  ;;  %v19_v25 = vld [vmem:[%s306_s0 + $0x20] sm:$0xff]  ;;  %v29_v28 = vmax.f32 %v20_v26, 0.0 }
   0x6   :  { %v33_v15 = vpack.c.bf16 %v25_v9, %v24_v8  ;;  %v36_v16 = vpack.c.bf16 %v31_v14, %v30_v13  ;;  %v28_v27 = vmax.f32 %v19_v25, 0.0  ;;  %v152_v30 = vld [vmem:[%s307_s2] ss:$0 sm:$0xff] }
   0x7   :  { %v34_v23 = vpack.c.bf16 %v27_v21, %v26_v20  ;;  %v37_v24 = vpack.c.bf16 %v32_v22, %v32_v22 }
   0x8   :  { %168 = vmatpush3.bf16.msra.mxu0 %v42_v12  ;;  %192 = vmatpush3.bf16.msra.mxu1 %v42_v12  ;;  %v35_v29 = vpack.c.bf16 %v29_v28, %v28_v27 }
   0xb   :  { %170 = vmatmul.mubr.msk.bf16.vlgmr.msra.gmra.mxu0 %vm51_vm1, %v33_v15  ;;  %182 = vmatmul.mubr.msk.bf16.vlgmr.msra.gmra.mxu1 %vm51_vm1, %v36_v16 }
   0xc   :  { %173 = vmatprep.mubr.msk.bf16.mxu0 %vm196_vm0, %v195_v0  ;;  %185 = vmatprep.mubr.msk.bf16.mxu1 %vm196_vm0, %v195_v0 }
  0x13   :  { %174 = vmatmul.mubr.msk.bf16.gmra.mxu0 %vm51_vm1, %v34_v23  ;;  %186 = vmatmul.mubr.msk.bf16.gmra.mxu1 %vm51_vm1, %v37_v24 }
  0x14   :  { %177 = vmatprep.mubr.msk.bf16.mxu0 %vm196_vm0, %v195_v0 }
  0x1b   :  { %178 = vmatmul.mubr.msk.bf16.gmra.mxu0 %vm51_vm1, %v35_v29 }
  0xcb   :  { %v101_v31 = vpop.f32.mrf.mxu0  ;;  %v125_v32 = vpop.f32.mrf.mxu1 }
  0xcc   :  { %v102_v33 = vadd.f32 %v152_v30, %v101_v31  ;;  %v126_v34 = vadd.f32 %v152_v30, %v125_v32 }
  0xcd   :  { %v171_v35 = vpop.f32.mrf.mxu0  ;;  %v183_v36 = vpop.f32.mrf.mxu1 }
  0xce   :  { %139 = vst.msk [vmem:[%s308_s3] sm:$0xff] %vm51_vm1, %v102_v33  ;;  %145 = vst.msk [vmem:[%s308_s3 + $0x30] sm:$0xff] %vm51_vm1, %v126_v34 }
  0xcf   :  { %v104_v37 = vpop.f32.mrf.mxu0  ;;  %v128_v38 = vpop.f32.mrf.mxu1 }
  0xd0   :  { %v105_v39 = vadd.f32 %v152_v30, %v104_v37  ;;  %v129_v40 = vadd.f32 %v152_v30, %v128_v38 }
  0xd1   :  { %v172_v41 = vpop.f32.mrf.mxu0  ;;  %v184_v42 = vpop.f32.mrf.mxu1 }
  0xd2   :  { %140 = vst.msk [vmem:[%s308_s3 + $0x8] sm:$0xff] %vm51_vm1, %v105_v39  ;;  %146 = vst.msk [vmem:[%s308_s3 + $0x38] sm:$0xff] %vm51_vm1, %v129_v40 }
  0xd3   :  { %v109_v43 = vpop.f32.mrf.mxu0  ;;  %v133_v44 = vpop.f32.mrf.mxu1 }
  0xd4   :  { %v110_v45 = vadd.f32 %v152_v30, %v109_v43  ;;  %v134_v46 = vadd.f32 %v152_v30, %v133_v44 }
  0xd5   :  { %v175_v47 = vpop.f32.mrf.mxu0  ;;  %v187_v48 = vpop.f32.mrf.mxu1 }
  0xd6   :  { %141 = vst.msk [vmem:[%s308_s3 + $0x10] sm:$0xff] %vm51_vm1, %v110_v45  ;;  %147 = vst.msk [vmem:[%s308_s3 + $0x40] sm:$0xff] %vm51_vm1, %v134_v46 }
  0xd7   :  { %v112_v49 = vpop.f32.mrf.mxu0  ;;  %v136_v50 = vpop.f32.mrf.mxu1 }
  0xd8   :  { %v113_v51 = vadd.f32 %v152_v30, %v112_v49 }
  0xd9   :  { %v176_v52 = vpop.f32.mrf.mxu0  ;;  %v188_v53 = vpop.f32.mrf.mxu1 }
  0xda   :  { %142 = vst.msk [vmem:[%s308_s3 + $0x18] sm:$0xff] %vm51_vm1, %v113_v51 }
  0xdb   :  { %v117_v54 = vpop.f32.mrf.mxu0 }
  0xdc   :  { %v118_v55 = vadd.f32 %v152_v30, %v117_v54 }
  0xdd   :  { %v179_v56 = vpop.f32.mrf.mxu0 }
  0xde   :  { %143 = vst.msk [vmem:[%s308_s3 + $0x20] sm:$0xff] %vm51_vm1, %v118_v55 }
  0xdf   :  { %v120_v57 = vpop.f32.mrf.mxu0 }
  0xe0   :  { %v121_v58 = vadd.f32 %v152_v30, %v120_v57 }
  0xe1   :  { %v180_v59 = vpop.f32.mrf.mxu0 }
  0xe2   :  { %144 = vst.msk [vmem:[%s308_s3 + $0x28] sm:$0xff] %vm51_vm1, %v121_v58 }

// kernel: llm_agent_forward.21
= control target key start
LH: loop header
LB: loop body
LE: loop exit
PB: predicated region body
PF: predicated region fallthrough
CT: control target
= control target key end

     0   :  { %vm42_vm0 = vcmask 130048   ;;  %v901_v3 = vmov 0   ;;  %v902_v7 = vmov 0.0   ;;  %vm903_vm1 = vmmov 0   ;;  %s1158_s2 = inlined_call_operand.vmem [shape: f32[16,32], index: 2, kind: input, shape index: {}]   ;;  %s1159_s1 = inlined_call_operand.vmem [shape: f32[10,16], index: 1, kind: input, shape index: {}]   ;;  %s1160_s3 = inlined_call_operand.vmem [shape: f32[10,1], index: 3, kind: input, shape index: {}]   ;;  %s1161_s0 = inlined_call_operand.vmem [shape: f32[72,32], index: 0, kind: input, shape index: {}]   ;;  %s1162_s4 = inlined_call_operand.vmem [shape: f32[8,32], index: 4, kind: output, shape index: {}]  }
   0x1   :  { %v29_v0 = vld [vmem:[%s1158_s2 + $0x8] sm:$0xff]  ;;  %v28_v1 = vld [vmem:[%s1158_s2] sm:$0xff]  ;;  %900 = vset.pattern.permute.xlu0 %v901_v3  ;;  %837 = vmatprep.subr.mxu0 %v902_v7  ;;  %vm124_vm2 = vcmask 261120   ;;  %v19_v16 = vld [vmem:[%s1161_s0 + $0x10] sm:$0xff]  ;;  %v206_v23 = vlaneseq  ;;  %vm217_vm5 = vcmask 74752   ;;  %vm215_vm6 = vcmask 80896  }
   0x2   :  { %v26_v2 = vld [vmem:[%s1159_s1] sm:$0xff]  ;;  %823 = vmatprep.subr.mxu1 %v29_v0  ;;  %v31_v4 = vld [vmem:[%s1160_s3 + $0x8] sm:$0x3]  ;;  %841 = vmatprep.mubr.msk.f32.mxu0 %vm903_vm1, %v902_v7  ;;  %v20_v17 = vld [vmem:[%s1161_s0 + $0x18] sm:$0xff] }
   0x3   :  { %827 = vmatprep.mubr.msk.f32.mxu1 %vm42_vm0, %v26_v2  ;;  %824 = vmatpush3.msra.mxu1 %v29_v0  ;;  %v27_v5 = vld [vmem:[%s1159_s1 + $0x8] sm:$0x3]  ;;  %v30_v6 = vld [vmem:[%s1160_s3] sm:$0xff]  ;;  %v23_v20 = vld [vmem:[%s1161_s0 + $0x30] sm:$0xff]  ;;  %v1029_v24 = vshrl.u32 %v206_v23, 7  ;;  %v1032_v26 = vand.u32 127, %v206_v23 }
   0x4   :  { %39 = vperm.xlu0 %900, %v31_v4   ;;  %825 = vmatprep.subr.mxu1 %v28_v1  ;;  %v17_v14 = vld [vmem:[%s1161_s0] sm:$0xff]  ;;  %v18_v15 = vld [vmem:[%s1161_s0 + $0x8] sm:$0xff]  ;;  %v24_v21 = vld [vmem:[%s1161_s0 + $0x38] sm:$0xff] }
   0x5   :  { %826 = vmatpush3.msra.mxu1 %v28_v1  ;;  %v21_v18 = vld [vmem:[%s1161_s0 + $0x20] sm:$0xff]  ;;  %v22_v19 = vld [vmem:[%s1161_s0 + $0x28] sm:$0xff]  ;;  %v208_v25 = vadd.s32 8, %v1029_v24  ;;  %vm211_vm4 = vcmp.eq.s32.totalorder %v1029_v24, %v1032_v26 }
   0x6   :  { %828 = vmatmul.mubr.msk.f32.vlgmr.msra.gmra.mxu1 %vm42_vm0, %v27_v5  ;;  %v25_v22 = vld [vmem:[%s1161_s0 + $0x40] sm:$0xff] }
   0x7   :  { %vm212_vm3 = vcmp.eq.s32.totalorder %v208_v25, %v1032_v26 }
   0x8   :  { %34 = vperm.xlu0 %900, %v30_v6  }
  0x7f   :  { %v40_v8 = vpop.permute.xlu0 %39 }
  0x83   :  { %v35_v11 = vpop.permute.xlu0 %34 }
  0xc6   :  { %v829_v9 = vpop.f32.mrf.mxu1 }
  0xc7   :  { %v953_v10 = vadd.f32 %v829_v9, %v40_v8 }
  0xc8   :  { %v115_v12 = vpop.f32.mrf.mxu1 }
  0xc9   :  { %v955_v13 = vadd.f32 %v115_v12, %v35_v11  ;;  %830 = vmatprep.subr.msk.mxu1 %vm124_vm2, %v953_v10  ;;  %838 = vmatpush3.xpose.msk.msra.mxu0 %vm124_vm2, %v953_v10 }
  0xca   :  { %831 = vmatpush3.xpose.msk.msra.mxu1 %vm124_vm2, %v953_v10  ;;  %839 = vmatprep.subr.mxu0 %v902_v7 }
  0xcb   :  { %832 = vmatprep.subr.msk.mxu1 %vm124_vm2, %v955_v13  ;;  %834 = vmatprep.mubr.msk.f32.mxu1 %vm124_vm2, %v955_v13 }
  0xcd   :  { %840 = vmatpush3.xpose.msk.msra.mxu0 %vm124_vm2, %v955_v13 }
  0xce   :  { %833 = vmatpush3.xpose.msk.msra.mxu1 %vm124_vm2, %v955_v13 }
  0xcf   :  { %868 = vmatprep.subr.mxu1 %v902_v7 }
  0xd0   :  { %842 = vmatmul.mubr.msk.f32.vlgmr.msra.gmra.mxu0 %vm124_vm2, %v17_v14 }
  0xd1   :  { %835 = vmatmul.mubr.msk.f32.vlgmr.msra.gmra.mxu1 %vm124_vm2, %v953_v10  ;;  %844 = vmatprep.mubr.msk.f32.mxu0 %vm903_vm1, %v902_v7 }
  0xd2   :  { %886 = vmatprep.mubr.msk.f32.mxu1 %vm903_vm1, %v902_v7 }
  0xd4   :  { %845 = vmatmul.mubr.msk.f32.gmra.mxu0 %vm124_vm2, %v18_v15 }
  0xd5   :  { %847 = vmatprep.mubr.msk.f32.mxu0 %vm903_vm1, %v902_v7 }
  0xd8   :  { %848 = vmatmul.mubr.msk.f32.gmra.mxu0 %vm124_vm2, %v19_v16 }
  0xd9   :  { %850 = vmatprep.mubr.msk.f32.mxu0 %vm903_vm1, %v902_v7 }
  0xdc   :  { %851 = vmatmul.mubr.msk.f32.gmra.mxu0 %vm124_vm2, %v20_v17 }
  0xdd   :  { %853 = vmatprep.mubr.msk.f32.mxu0 %vm903_vm1, %v902_v7 }
  0xe0   :  { %854 = vmatmul.mubr.msk.f32.gmra.mxu0 %vm124_vm2, %v21_v18 }
  0xe1   :  { %856 = vmatprep.mubr.msk.f32.mxu0 %vm903_vm1, %v902_v7 }
  0xe4   :  { %857 = vmatmul.mubr.msk.f32.gmra.mxu0 %vm124_vm2, %v22_v19 }
  0xe5   :  { %859 = vmatprep.mubr.msk.f32.mxu0 %vm903_vm1, %v902_v7 }
  0xe8   :  { %860 = vmatmul.mubr.msk.f32.gmra.mxu0 %vm124_vm2, %v23_v20 }
  0xe9   :  { %862 = vmatprep.mubr.msk.f32.mxu0 %vm903_vm1, %v902_v7 }
  0xec   :  { %863 = vmatmul.mubr.msk.f32.gmra.mxu0 %vm124_vm2, %v24_v21 }
  0xed   :  { %865 = vmatprep.mubr.msk.f32.mxu0 %vm903_vm1, %v902_v7 }
  0xf0   :  { %866 = vmatmul.mubr.msk.f32.gmra.mxu0 %vm124_vm2, %v25_v22 }
 0x190   :  { %v1035_v27 = vpop.f32.mrf.mxu0 }
 0x191   :  { %v836_v28 = vpop.f32.mrf.mxu1  ;;  %v363_v20 = vmul.f32 2.0, %v1035_v27 }
 0x192   :  { %v214_v29 = vsel %vm212_vm3, %v836_v28, 0.0  ;;  %v843_v30 = vpop.f32.mrf.mxu0 }
 0x193   :  { %v197_v31 = vpop.f32.mrf.mxu1  ;;  %v218_v34 = vsel %vm217_vm5, %v214_v29, 0.0 }
 0x194   :  { %v213_v32 = vsel %vm211_vm4, %v197_v31, 0.0  ;;  %v324_v33 = vpop.f32.mrf.mxu0 }
 0x195   :  { %v216_v35 = vsel %vm215_vm6, %v213_v32, 0.0  ;;  %v364_v17 = vmul.f32 2.0, %v324_v33 }
 0x196   :  { %v219_v36 = vadd.f32 %v218_v34, %v216_v35  ;;  %v846_v37 = vpop.f32.mrf.mxu0 }
 0x198   :  { %v220_v38 = vrot.slane %v219_v36, 4  ;;  %v329_v39 = vpop.f32.mrf.mxu0 }
 0x199   :  { %v365_v14 = vmul.f32 2.0, %v329_v39 }
 0x19a   :  { %v221_v40 = vadd.f32 %v220_v38, %v219_v36  ;;  %v849_v41 = vpop.f32.mrf.mxu0 }
 0x19c   :  { %v222_v42 = vrot.slane %v221_v40, 2  ;;  %v334_v43 = vpop.f32.mrf.mxu0 }
 0x19d   :  { %v366_v8 = vmul.f32 2.0, %v334_v43 }
 0x19e   :  { %v223_v44 = vadd.f32 %v222_v42, %v221_v40  ;;  %v852_v45 = vpop.f32.mrf.mxu0 }
 0x1a0   :  { %v339_v46 = vpop.f32.mrf.mxu0  ;;  %v224_v47 = vrot.slane %v223_v44, 1 }
 0x1a1   :  { %v367_v51 = vmul.f32 2.0, %v339_v46 }
 0x1a2   :  { %v855_v48 = vpop.f32.mrf.mxu0  ;;  %v225_v50 = vadd.f32 %v224_v47, %v223_v44 }
 0x1a4   :  { %v344_v49 = vpop.f32.mrf.mxu0  ;;  %v376_v58 = vsub.f32 %v225_v50, %v367_v51  ;;  %v375_v12 = vsub.f32 %v225_v50, %v366_v8  ;;  %v374_v16 = vsub.f32 %v225_v50, %v365_v14  ;;  %v373_v19 = vsub.f32 %v225_v50, %v364_v17 }
 0x1a5   :  { %v368_v52 = vmul.f32 2.0, %v344_v49  ;;  %v372_v22 = vsub.f32 %v225_v50, %v363_v20 }
 0x1a6   :  { %v858_v53 = vpop.f32.mrf.mxu0  ;;  %v393_v63 = vsel %vm215_vm6, %v376_v58, inf  ;;  %v390_v15 = vsel %vm215_vm6, %v375_v12, inf  ;;  %v387_v18 = vsel %vm215_vm6, %v374_v16, inf  ;;  %v384_v21 = vsel %vm215_vm6, %v373_v19, inf }
 0x1a7   :  { %v1040_v54 = vsub.f32 %v225_v50, %v368_v52  ;;  %v381_v23 = vsel %vm215_vm6, %v372_v22, inf }
 0x1a8   :  { %v349_v55 = vpop.f32.mrf.mxu0 }
 0x1a9   :  { %v369_v56 = vmul.f32 2.0, %v349_v55  ;;  %v396_v57 = vsel %vm215_vm6, %v1040_v54, inf }
 0x1aa   :  { %397 = vmin.xlane.f32.xlu1 %v396_v57  ;;  %v861_v59 = vpop.f32.mrf.mxu0 }
 0x1ab   :  { %v378_v60 = vsub.f32 %v225_v50, %v369_v56 }
 0x1ac   :  { %v354_v61 = vpop.f32.mrf.mxu0 }
 0x1ad   :  { %v370_v62 = vmul.f32 2.0, %v354_v61  ;;  %v399_v0 = vsel %vm215_vm6, %v378_v60, inf }
 0x1ae   :  { %394 = vmin.xlane.f32.xlu1 %v393_v63  ;;  %400 = vmin.xlane.f32.xlu0 %v399_v0  ;;  %v864_v1 = vpop.f32.mrf.mxu0 }
 0x1af   :  { %v379_v2 = vsub.f32 %v225_v50, %v370_v62 }
 0x1b0   :  { %v359_v3 = vpop.f32.mrf.mxu0 }
 0x1b1   :  { %v371_v4 = vmul.f32 2.0, %v359_v3  ;;  %v402_v5 = vsel %vm215_vm6, %v379_v2, inf }
 0x1b2   :  { %403 = vmin.xlane.f32.xlu1 %v402_v5  ;;  %v867_v6 = vpop.f32.mrf.mxu0 }
 0x1b3   :  { %v380_v9 = vsub.f32 %v225_v50, %v371_v4 }
 0x1b5   :  { %v405_v11 = vsel %vm215_vm6, %v380_v9, inf }
 0x1b6   :  { %406 = vmin.xlane.f32.xlu1 %v405_v11 }
 0x1ba   :  { %391 = vmin.xlane.f32.xlu1 %v390_v15 }
 0x1be   :  { %388 = vmin.xlane.f32.xlu1 %v387_v18 }
 0x1c2   :  { %385 = vmin.xlane.f32.xlu1 %v384_v21 }
 0x1c6   :  { %382 = vmin.xlane.f32.xlu1 %v381_v23 }
 0x233   :  { %v398_v25 = vpop.xlane.xlu1 %397 }
 0x234   :  { %vm413_vm10 = vcmp.eq.f32.partialorder %v1040_v54, %v398_v25 }
 0x235   :  { %v422_v43 = vsel %vm413_vm10, %v1032_v26, 10 }
 0x236   :  { %v501_v48 = vsel %vm215_vm6, %v422_v43, 2147483647 }
 0x237   :  { %v395_v28 = vpop.xlane.xlu1 %394  ;;  %v401_v29 = vpop.xlane.xlu0 %400  ;;  %v503_v53 = vshra.s32 %v501_v48, 16 }
 0x238   :  { %vm412_vm7 = vcmp.eq.f32.partialorder %v376_v58, %v395_v28  ;;  %vm414_vm8 = vcmp.eq.f32.partialorder %v378_v60, %v401_v29 }
 0x239   :  { %v421_v30 = vsel %vm412_vm7, %v1032_v26, 10  ;;  %v423_v31 = vsel %vm414_vm8, %v1032_v26, 10  ;;  %v505_v59 = vcvt.s32.f32 %v503_v53 }
 0x23a   :  { %v1056_v32 = vsel %vm215_vm6, %v421_v30, 2147483647  ;;  %v1059_v27 = vsel %vm215_vm6, %v423_v31, 2147483647 }
 0x23b   :  { %v404_v33 = vpop.xlane.xlu1 %403  ;;  %v518_v34 = vshra.s32 %v1059_v27, 16  ;;  %v488_v36 = vshra.s32 %v1056_v32, 16  ;;  %v517_v14 = vand.u32 65535, %v1059_v27  ;;  %v487_v21 = vand.u32 65535, %v1056_v32 }
 0x23c   :  { %vm415_vm9 = vcmp.eq.f32.partialorder %v379_v2, %v404_v33 }
 0x23d   :  { %v1062_v35 = vcvt.s32.f32 %v518_v34  ;;  %v424_v37 = vsel %vm415_vm9, %v1032_v26, 10  ;;  %v1069_v40 = vcvt.s32.f32 %v488_v36  ;;  %v489_v30 = vcvt.s32.f32 %v487_v21 }
 0x23e   :  { %v531_v41 = vsel %vm215_vm6, %v424_v37, 2147483647  ;;  %v588_v21 = vmul.u32 9, %v1029_v24 }
 0x23f   :  { %521 = vmin.xlane.f32.xlu0 %v1062_v35  ;;  %v407_v38 = vpop.xlane.xlu1 %406  ;;  %v533_v47 = vshra.s32 %v531_v41, 16  ;;  %v532_v15 = vand.u32 65535, %v531_v41 }
 0x240   :  { %vm416_vm11 = vcmp.eq.f32.partialorder %v380_v9, %v407_v38 }
 0x241   :  { %v425_v39 = vsel %vm416_vm11, %v1032_v26, 10  ;;  %v535_v52 = vcvt.s32.f32 %v533_v47  ;;  %v534_v20 = vcvt.s32.f32 %v532_v15 }
 0x242   :  { %v546_v42 = vsel %vm215_vm6, %v425_v39, 2147483647 }
 0x243   :  { %491 = vmin.xlane.f32.xlu0 %v1069_v40  ;;  %v392_v44 = vpop.xlane.xlu1 %391  ;;  %v548_v45 = vshra.s32 %v546_v42, 16  ;;  %v547_v8 = vand.u32 65535, %v546_v42 }
 0x244   :  { %vm411_vm12 = vcmp.eq.f32.partialorder %v375_v12, %v392_v44 }
 0x245   :  { %v550_v46 = vcvt.s32.f32 %v548_v45  ;;  %v420_v49 = vsel %vm411_vm12, %v1032_v26, 10  ;;  %v549_v12 = vcvt.s32.f32 %v547_v8  ;;  %v590_v8 = vadd.s32 1, %v1029_v24 }
 0x246   :  { %v471_v54 = vsel %vm215_vm6, %v420_v49, 2147483647 }
 0x247   :  { %551 = vmin.xlane.f32.xlu1 %v550_v46  ;;  %v389_v50 = vpop.xlane.xlu1 %388  ;;  %v473_v61 = vshra.s32 %v471_v54, 16  ;;  %v472_v33 = vand.u32 65535, %v471_v54 }
 0x248   :  { %vm410_vm13 = vcmp.eq.f32.partialorder %v374_v16, %v389_v50 }
 0x249   :  { %v419_v51 = vsel %vm410_vm13, %v1032_v26, 10  ;;  %v475_v1 = vcvt.s32.f32 %v473_v61  ;;  %v474_v37 = vcvt.s32.f32 %v472_v33 }
 0x24a   :  { %v456_v55 = vsel %vm215_vm6, %v419_v51, 2147483647 }
 0x24b   :  { %536 = vmin.xlane.f32.xlu1 %v535_v52  ;;  %v386_v56 = vpop.xlane.xlu1 %385  ;;  %v458_v57 = vshra.s32 %v456_v55, 16  ;;  %v457_v27 = vand.u32 65535, %v456_v55 }
 0x24c   :  { %vm409_vm14 = vcmp.eq.f32.partialorder %v373_v19, %v386_v56  ;;  %v519_v19 = vcvt.s32.f32 %v517_v14 }
 0x24d   :  { %v418_v58 = vsel %vm409_vm14, %v1032_v26, 10  ;;  %v460_v60 = vcvt.s32.f32 %v458_v57  ;;  %v459_v36 = vcvt.s32.f32 %v457_v27 }
 0x24e   :  { %v441_v62 = vsel %vm215_vm6, %v418_v58, 2147483647 }
 0x24f   :  { %506 = vmin.xlane.f32.xlu1 %v505_v59  ;;  %461 = vmin.xlane.f32.xlu0 %v460_v60  ;;  %v383_v63 = vpop.xlane.xlu1 %382  ;;  %v443_v2 = vshra.s32 %v441_v62, 16  ;;  %v442_v39 = vand.u32 65535, %v441_v62 }
 0x250   :  { %vm408_vm15 = vcmp.eq.f32.partialorder %v372_v22, %v383_v63  ;;  %v502_v22 = vand.u32 65535, %v501_v48  ;;  %v904_v63 = vmov 1.0  }
 0x251   :  { %v417_v0 = vsel %vm408_vm15, %v1032_v26, 10  ;;  %v445_v5 = vcvt.s32.f32 %v443_v2  ;;  %v444_v45 = vcvt.s32.f32 %v442_v39 }
 0x252   :  { %v426_v3 = vsel %vm215_vm6, %v417_v0, 2147483647  ;;  %v504_v31 = vcvt.s32.f32 %v502_v22  ;;  %v591_v22 = vmul.u32 9, %v590_v8 }
 0x253   :  { %476 = vmin.xlane.f32.xlu1 %v475_v1  ;;  %v428_v4 = vshra.s32 %v426_v3, 16  ;;  %v427_v38 = vand.u32 65535, %v426_v3 }
 0x255   :  { %v430_v6 = vcvt.s32.f32 %v428_v4  ;;  %v429_v44 = vcvt.s32.f32 %v427_v38 }
 0x257   :  { %446 = vmin.xlane.f32.xlu1 %v445_v5  ;;  %431 = vmin.xlane.f32.xlu0 %v430_v6 }
 0x2c8   :  { %v522_v9 = vpop.xlane.xlu0 %521 }
 0x2c9   :  { %vm523_vm3 = vcmp.eq.f32.partialorder %v1062_v35, %v522_v9  ;;  %v528_v49 = vcvt.f32.s32 %v522_v9 }
 0x2ca   :  { %v524_v23 = vsel %vm523_vm3, %v519_v19, inf  ;;  %vm1121_vm3 = vcmp.ge.s32.totalorder %v1032_v26, %v588_v21 }
 0x2cb   :  { %v529_v55 = vshll.u32 %v528_v49, 16 }
 0x2cc   :  { %v1086_v17 = vpop.xlane.xlu0 %491 }
 0x2cd   :  { %vm493_vm5 = vcmp.eq.f32.partialorder %v1069_v40, %v1086_v17  ;;  %v498_v56 = vcvt.f32.s32 %v1086_v17 }
 0x2ce   :  { %v494_v34 = vsel %vm493_vm5, %v489_v30, inf }
 0x2cf   :  { %v499_v3 = vshll.u32 %v498_v56, 16 }
 0x2d0   :  { %v552_v11 = vpop.xlane.xlu1 %551 }
 0x2d1   :  { %vm553_vm0 = vcmp.eq.f32.partialorder %v550_v46, %v552_v11  ;;  %v558_v48 = vcvt.f32.s32 %v552_v11 }
 0x2d2   :  { %v554_v16 = vsel %vm553_vm0, %v549_v12, inf }
 0x2d3   :  { %555 = vmin.xlane.f32.xlu1 %v554_v16 }
 0x2d4   :  { %v537_v18 = vpop.xlane.xlu1 %536 }
 0x2d5   :  { %vm538_vm4 = vcmp.eq.f32.partialorder %v535_v52, %v537_v18  ;;  %v543_v50 = vcvt.f32.s32 %v537_v18  ;;  %v559_v52 = vshll.u32 %v558_v48, 16 }
 0x2d6   :  { %v539_v25 = vsel %vm538_vm4, %v534_v20, inf  ;;  %vm1126_vm4 = vcmp.lt.s32.totalorder %v1032_v26, %v591_v22 }
 0x2d7   :  { %525 = vmin.xlane.f32.xlu1 %v524_v23  ;;  %540 = vmin.xlane.f32.xlu0 %v539_v25  ;;  %v544_v57 = vshll.u32 %v543_v50, 16 }
 0x2d8   :  { %v1091_v28 = vpop.xlane.xlu0 %461  ;;  %v507_v29 = vpop.xlane.xlu1 %506 }
 0x2d9   :  { %vm508_vm7 = vcmp.eq.f32.partialorder %v505_v59, %v507_v29  ;;  %vm463_vm8 = vcmp.eq.f32.partialorder %v460_v60, %v1091_v28  ;;  %v513_v60 = vcvt.f32.s32 %v507_v29  ;;  %v468_v0 = vcvt.f32.s32 %v1091_v28 }
 0x2da   :  { %v509_v35 = vsel %vm508_vm7, %v504_v31, inf  ;;  %v464_v40 = vsel %vm463_vm8, %v459_v36, inf  ;;  %vm593_vm8 = vmand %vm1121_vm3, %vm1126_vm4 }
 0x2db   :  { %495 = vmin.xlane.f32.xlu1 %v494_v34  ;;  %510 = vmin.xlane.f32.xlu0 %v509_v35  ;;  %v514_v9 = vshll.u32 %v513_v60, 16  ;;  %v469_v14 = vshll.u32 %v468_v0, 16  ;;  %v778_v39 = vsel %vm593_vm8, 1.0, %v902_v7 }
 0x2dc   :  { %v477_v32 = vpop.xlane.xlu1 %476 }
 0x2dd   :  { %vm478_vm9 = vcmp.eq.f32.partialorder %v475_v1, %v477_v32  ;;  %v483_v4 = vcvt.f32.s32 %v477_v32 }
 0x2de   :  { %v479_v41 = vsel %vm478_vm9, %v474_v37, inf }
 0x2df   :  { %465 = vmin.xlane.f32.xlu1 %v464_v40  ;;  %480 = vmin.xlane.f32.xlu0 %v479_v41  ;;  %v484_v17 = vshll.u32 %v483_v4, 16 }
 0x2e0   :  { %v1094_v42 = vpop.xlane.xlu0 %431  ;;  %v1096_v43 = vpop.xlane.xlu1 %446 }
 0x2e1   :  { %vm433_vm10 = vcmp.eq.f32.partialorder %v430_v6, %v1094_v42  ;;  %vm448_vm11 = vcmp.eq.f32.partialorder %v445_v5, %v1096_v43  ;;  %v438_v18 = vcvt.f32.s32 %v1094_v42  ;;  %v453_v23 = vcvt.f32.s32 %v1096_v43 }
 0x2e2   :  { %v434_v46 = vsel %vm433_vm10, %v429_v44, inf  ;;  %v449_v47 = vsel %vm448_vm11, %v444_v45, inf  ;;  %vm596_vm10 = vcmask 588800  }
 0x2e3   :  { %435 = vmin.xlane.f32.xlu1 %v434_v46  ;;  %450 = vmin.xlane.f32.xlu0 %v449_v47  ;;  %v439_v31 = vshll.u32 %v438_v18, 16  ;;  %v454_v35 = vshll.u32 %v453_v23, 16 }
 0x35c   :  { %v556_v51 = vpop.xlane.xlu1 %555 }
 0x35d   :  { %v557_v53 = vcvt.f32.s32 %v556_v51 }
 0x35f   :  { %v560_v54 = vadd.s32 %v559_v52, %v557_v53 }
 0x360   :  { %v541_v58 = vpop.xlane.xlu0 %540  ;;  %v526_v59 = vpop.xlane.xlu1 %525 }
 0x361   :  { %vm569_vm12 = vcmp.eq.s32.totalorder %v1032_v26, %v560_v54  ;;  %v542_v61 = vcvt.f32.s32 %v541_v58  ;;  %v527_v62 = vcvt.f32.s32 %v526_v59 }
 0x362   :  { %869 = vmatpush3.msk.msra.mxu1 %vm569_vm12, %v904_v63  ;;  %vm673_vm12 = vcmask 1041408  }
 0x363   :  { %v545_v1 = vadd.s32 %v544_v57, %v542_v61  ;;  %v530_v2 = vadd.s32 %v529_v55, %v527_v62  ;;  %870 = vmatprep.subr.mxu1 %v902_v7 }
 0x364   :  { %v511_v5 = vpop.xlane.xlu0 %510  ;;  %v496_v6 = vpop.xlane.xlu1 %495 }
 0x365   :  { %vm568_vm13 = vcmp.eq.s32.totalorder %v1032_v26, %v545_v1  ;;  %v512_v11 = vcvt.f32.s32 %v511_v5  ;;  %v497_v12 = vcvt.f32.s32 %v496_v6  ;;  %vm567_vm14 = vcmp.eq.s32.totalorder %v1032_v26, %v530_v2 }
 0x366   :  { %871 = vmatpush3.msk.msra.mxu1 %vm568_vm13, %v904_v63 }
 0x367   :  { %v515_v15 = vadd.s32 %v514_v9, %v512_v11  ;;  %v500_v16 = vadd.s32 %v499_v3, %v497_v12  ;;  %872 = vmatprep.subr.mxu1 %v902_v7 }
 0x368   :  { %v481_v19 = vpop.xlane.xlu0 %480  ;;  %873 = vmatpush3.msk.msra.mxu1 %vm567_vm14, %v904_v63  ;;  %v466_v20 = vpop.xlane.xlu1 %465 }
 0x369   :  { %vm566_vm15 = vcmp.eq.s32.totalorder %v1032_v26, %v515_v15  ;;  %v482_v25 = vcvt.f32.s32 %v481_v19  ;;  %v467_v28 = vcvt.f32.s32 %v466_v20  ;;  %874 = vmatprep.subr.mxu1 %v902_v7  ;;  %vm565_vm0 = vcmp.eq.s32.totalorder %v1032_v26, %v500_v16 }
 0x36a   :  { %875 = vmatpush3.msk.msra.mxu1 %vm566_vm15, %v904_v63 }
 0x36b   :  { %v485_v29 = vadd.s32 %v484_v17, %v482_v25  ;;  %v470_v30 = vadd.s32 %v469_v14, %v467_v28  ;;  %876 = vmatprep.subr.mxu1 %v902_v7 }
 0x36c   :  { %v451_v27 = vpop.xlane.xlu0 %450  ;;  %877 = vmatpush3.msk.msra.mxu1 %vm565_vm0, %v904_v63  ;;  %v436_v24 = vpop.xlane.xlu1 %435 }
 0x36d   :  { %vm564_vm5 = vcmp.eq.s32.totalorder %v1032_v26, %v485_v29  ;;  %v452_v32 = vcvt.f32.s32 %v451_v27  ;;  %v437_v36 = vcvt.f32.s32 %v436_v24  ;;  %878 = vmatprep.subr.mxu1 %v902_v7  ;;  %vm563_vm7 = vcmp.eq.s32.totalorder %v1032_v26, %v470_v30 }
 0x36e   :  { %879 = vmatpush3.msk.msra.mxu1 %vm564_vm5, %v904_v63 }
 0x36f   :  { %v455_v37 = vadd.s32 %v454_v35, %v452_v32  ;;  %v440_v38 = vadd.s32 %v439_v31, %v437_v36  ;;  %880 = vmatprep.subr.mxu1 %v902_v7 }
 0x370   :  { %881 = vmatpush3.msk.msra.mxu1 %vm563_vm7, %v904_v63 }
 0x371   :  { %vm562_vm9 = vcmp.eq.s32.totalorder %v1032_v26, %v455_v37  ;;  %882 = vmatprep.subr.mxu1 %v902_v7  ;;  %vm561_vm11 = vcmp.eq.s32.totalorder %v1032_v26, %v440_v38 }
 0x372   :  { %883 = vmatpush3.msk.msra.mxu1 %vm562_vm9, %v904_v63 }
 0x373   :  { %884 = vmatprep.subr.mxu1 %v902_v7 }
 0x374   :  { %885 = vmatpush3.msk.msra.mxu1 %vm561_vm11, %v904_v63 }
 0x375   :  { %887 = vmatmul.mubr.msk.f32.vlgmr.msra.gmra.mxu1 %vm596_vm10, %v778_v39  ;;  %889 = vmatprep.subr.mxu1 %v902_v7 }
 0x376   :  { %890 = vmatpush3.msk.msra.mxu1 %vm673_vm12, %v953_v10  ;;  %893 = vmatprep.mubr.msk.f32.mxu1 %vm903_vm1, %v902_v7 }
 0x377   :  { %891 = vmatprep.subr.mxu1 %v902_v7 }
 0x378   :  { %892 = vmatpush3.msra.mxu1 %v955_v13 }
 0x435   :  { %v666_v40 = vpop.f32.mrf.mxu1 }
 0x436   :  { %894 = vmatmul.mubr.msk.f32.vlgmr.msra.gmra.mxu1 %vm215_vm6, %v666_v40 }
 0x437   :  { %v888_v26 = vpop.f32.mrf.mxu1 }
 0x4f6   :  { %v742_v41 = vpop.f32.mrf.mxu1 }
 0x4f7   :  { %v746_v42 = vmul.f32 0.11111111, %v742_v41 }
 0x4f8   :  { %v895_v43 = vpop.f32.mrf.mxu1 }
 0x4f9   :  { %747 = vst.msk [vmem:[%s1162_s4] sm:$0xff] %vm124_vm2, %v746_v42 }

// kernel: llm_agent_forward.22
= control target key start
LH: loop header
LB: loop body
LE: loop exit
PB: predicated region body
PF: predicated region fallthrough
CT: control target
= control target key end

     0   :  { %vm36_vm0 = vcmask 392192   ;;  %vm97_vm1 = vcmask 123904   ;;  %vm94_vm2 = vcmask 130048   ;;  %s180_s1 = inlined_call_operand.vmem [shape: f32[48,16], index: 1, kind: input, shape index: {}]   ;;  %s181_s0 = inlined_call_operand.vmem [shape: f32[18,48], index: 0, kind: input, shape index: {}]   ;;  %s182_s2 = inlined_call_operand.vmem [shape: f32[1,16], index: 2, kind: input, shape index: {}]   ;;  %s183_s3 = inlined_call_operand.vmem [shape: f32[18,16], index: 3, kind: output, shape index: {}]  }
   0x1   :  { %v24_v0 = vld [vmem:[%s180_s1 + $0x20] sm:$0xff]  ;;  %v25_v1 = vld [vmem:[%s180_s1 + $0x28] sm:$0xff]  ;;  %v22_v2 = vld [vmem:[%s180_s1 + $0x10] sm:$0xff] }
   0x2   :  { %v28_v3 = vpack.c.bf16 %v25_v1, %v24_v0  ;;  %v23_v4 = vld [vmem:[%s180_s1 + $0x18] sm:$0xff]  ;;  %v20_v5 = vld [vmem:[%s180_s1] sm:$0xff]  ;;  %v21_v7 = vld [vmem:[%s180_s1 + $0x8] sm:$0xff] }
   0x3   :  { %v27_v6 = vpack.c.bf16 %v23_v4, %v22_v2  ;;  %v15_v8 = vld [vmem:[%s181_s0] sm:$0xff]  ;;  %v16_v9 = vld [vmem:[%s181_s0 + $0x8] sm:$0xff]  ;;  %v26_v11 = vpack.c.bf16 %v21_v7, %v20_v5  ;;  %v17_v12 = vld [vmem:[%s181_s0 + $0x10] sm:$0x3] }
   0x4   :  { %111 = vmatprep.subr.bf16.mxu0 %v28_v3  ;;  %v18_v10 = vpack.c.bf16 %v16_v9, %v15_v8  ;;  %v19_v13 = vpack.c.bf16 %v17_v12, %v17_v12  ;;  %v103_v14 = vld [vmem:[%s182_s2] ss:$0 sm:$0xff] }
   0x5   :  { %112 = vmatpush3.bf16.msra.mxu0 %v28_v3 }
   0x6   :  { %113 = vmatprep.subr.bf16.mxu0 %v27_v6  ;;  %117 = vmatprep.mubr.msk.bf16.mxu0 %vm36_vm0, %v18_v10 }
   0x9   :  { %114 = vmatpush3.bf16.msra.mxu0 %v27_v6 }
   0xa   :  { %115 = vmatprep.subr.bf16.mxu0 %v26_v11 }
   0xd   :  { %116 = vmatpush3.bf16.msra.mxu0 %v26_v11 }
  0x10   :  { %118 = vmatmul.mubr.msk.bf16.vlgmr.msra.gmra.mxu0 %vm36_vm0, %v19_v13 }
  0xd0   :  { %v119_v15 = vpop.f32.mrf.mxu0 }
  0xd1   :  { %v86_v16 = vadd.f32 %v119_v15, %v103_v14 }
  0xd2   :  { %v77_v17 = vpop.f32.mrf.mxu0 }
  0xd3   :  { %v93_v18 = vmax.f32 %v86_v16, 0.0  ;;  %v78_v19 = vadd.f32 %v103_v14, %v77_v17 }
  0xd4   :  { %v120_v20 = vpop.f32.mrf.mxu0 }
  0xd5   :  { %98 = vst.msk [vmem:[%s183_s3 + $0x10] sm:$0x3] %vm97_vm1, %v93_v18  ;;  %v91_v21 = vmax.f32 %v78_v19, 0.0 }
  0xd6   :  { %v80_v22 = vpop.f32.mrf.mxu0 }
  0xd7   :  { %95 = vst.msk [vmem:[%s183_s3] sm:$0xff] %vm94_vm2, %v91_v21  ;;  %v81_v23 = vadd.f32 %v103_v14, %v80_v22 }
  0xd9   :  { %v92_v24 = vmax.f32 %v81_v23, 0.0 }
  0xdb   :  { %96 = vst.msk [vmem:[%s183_s3 + $0x8] sm:$0xff] %vm94_vm2, %v92_v24 }

// kernel: llm_agent_forward.23
= control target key start
LH: loop header
LB: loop body
LE: loop exit
PB: predicated region body
PF: predicated region fallthrough
CT: control target
= control target key end

     0   :  { %v108_v0 = vmov 0.0   ;;  %vm109_vm0 = vmmov 0   ;;  %vm36_vm1 = vcmask 523264   ;;  %vm81_vm2 = vcmask 261120   ;;  %s163_s1 = inlined_call_operand.vmem [shape: f32[64,32], index: 1, kind: input, shape index: {}]   ;;  %s164_s0 = inlined_call_operand.vmem [shape: f32[8,64], index: 0, kind: input, shape index: {}]   ;;  %s165_s2 = inlined_call_operand.vmem [shape: f32[1,32], index: 2, kind: input, shape index: {}]   ;;  %s166_s3 = inlined_call_operand.vmem [shape: f32[8,32], index: 3, kind: output, shape index: {}]  }
   0x1   :  { %94 = vmatprep.subr.bf16.mxu0 %v108_v0  ;;  %v23_v1 = vld [vmem:[%s163_s1 + $0x30] sm:$0xff]  ;;  %v24_v2 = vld [vmem:[%s163_s1 + $0x38] sm:$0xff]  ;;  %v21_v3 = vld [vmem:[%s163_s1 + $0x20] sm:$0xff]  ;;  %102 = vmatprep.mubr.msk.bf16.mxu0 %vm109_vm0, %v108_v0 }
   0x2   :  { %v28_v4 = vpack.c.bf16 %v24_v2, %v23_v1  ;;  %v22_v5 = vld [vmem:[%s163_s1 + $0x28] sm:$0xff]  ;;  %v19_v7 = vld [vmem:[%s163_s1 + $0x10] sm:$0xff]  ;;  %v20_v8 = vld [vmem:[%s163_s1 + $0x18] sm:$0xff] }
   0x3   :  { %v27_v6 = vpack.c.bf16 %v22_v5, %v21_v3  ;;  %v26_v9 = vpack.c.bf16 %v20_v8, %v19_v7  ;;  %v17_v10 = vld [vmem:[%s163_s1] sm:$0xff]  ;;  %v18_v11 = vld [vmem:[%s163_s1 + $0x8] sm:$0xff] }
   0x4   :  { %95 = vmatpush3.bf16.msra.mxu0 %v28_v4  ;;  %v25_v12 = vpack.c.bf16 %v18_v11, %v17_v10  ;;  %v15_v13 = vld [vmem:[%s164_s0] sm:$0xff] }
   0x5   :  { %96 = vmatprep.subr.bf16.mxu0 %v108_v0  ;;  %v16_v14 = vpack.c.bf16 %v15_v13, %v15_v13  ;;  %v87_v15 = vld [vmem:[%s165_s2] ss:$0 sm:$0xff] }
   0x8   :  { %97 = vmatpush3.bf16.msra.mxu0 %v27_v6 }
   0x9   :  { %98 = vmatprep.subr.bf16.mxu0 %v108_v0 }
   0xc   :  { %99 = vmatpush3.bf16.msra.mxu0 %v26_v9 }
   0xd   :  { %100 = vmatprep.subr.bf16.mxu0 %v108_v0 }
  0x10   :  { %101 = vmatpush3.bf16.msra.mxu0 %v25_v12 }
  0x13   :  { %103 = vmatmul.mubr.msk.bf16.vlgmr.msra.gmra.mxu0 %vm36_vm1, %v16_v14 }
  0xd3   :  { %v74_v16 = vpop.f32.mrf.mxu0 }
  0xd4   :  { %v75_v17 = vadd.f32 %v87_v15, %v74_v16 }
  0xd5   :  { %v104_v18 = vpop.f32.mrf.mxu0 }
  0xd6   :  { %v80_v19 = vmax.f32 %v75_v17, 0.0 }
  0xd7   :  { %v77_v20 = vpop.f32.mrf.mxu0 }
  0xd8   :  { %82 = vst.msk [vmem:[%s166_s3] sm:$0xff] %vm81_vm2, %v80_v19 }
  0xd9   :  { %v105_v21 = vpop.f32.mrf.mxu0 }

// kernel: llm_agent_forward.24
= control target key start
LH: loop header
LB: loop body
LE: loop exit
PB: predicated region body
PF: predicated region fallthrough
CT: control target
= control target key end

     0   :  { %v127_v0 = vmov 0.0   ;;  %vm128_vm0 = vmmov 0   ;;  %vm89_vm1 = vcmask 254976   ;;  %s206_s1 = inlined_call_operand.vmem [shape: f32[128,32], index: 1, kind: input, shape index: {}]   ;;  %s207_s0 = inlined_call_operand.vmem [shape: f32[2,128], index: 0, kind: input, shape index: {}]   ;;  %s208_s2 = inlined_call_operand.vmem [shape: f32[1,32], index: 2, kind: input, shape index: {}]   ;;  %s209_s3 = inlined_call_operand.vmem [shape: f32[2,32], index: 3, kind: output, shape index: {}]  }
   0x1   :  { %105 = vmatprep.subr.bf16.mxu0 %v127_v0  ;;  %v31_v1 = vld [vmem:[%s206_s1 + $0x70] sm:$0xff]  ;;  %v32_v2 = vld [vmem:[%s206_s1 + $0x78] sm:$0xff]  ;;  %v29_v3 = vld [vmem:[%s206_s1 + $0x60] sm:$0xff]  ;;  %121 = vmatprep.mubr.msk.bf16.mxu0 %vm128_vm0, %v127_v0 }
   0x2   :  { %v40_v4 = vpack.c.bf16 %v32_v2, %v31_v1  ;;  %v30_v5 = vld [vmem:[%s206_s1 + $0x68] sm:$0xff]  ;;  %v27_v7 = vld [vmem:[%s206_s1 + $0x50] sm:$0xff]  ;;  %v28_v8 = vld [vmem:[%s206_s1 + $0x58] sm:$0xff] }
   0x3   :  { %v39_v6 = vpack.c.bf16 %v30_v5, %v29_v3  ;;  %v38_v9 = vpack.c.bf16 %v28_v8, %v27_v7  ;;  %v25_v10 = vld [vmem:[%s206_s1 + $0x40] sm:$0xff]  ;;  %v26_v11 = vld [vmem:[%s206_s1 + $0x48] sm:$0xff]  ;;  %v23_v13 = vld [vmem:[%s206_s1 + $0x30] sm:$0xff] }
   0x4   :  { %106 = vmatpush3.bf16.msra.mxu0 %v40_v4  ;;  %v37_v12 = vpack.c.bf16 %v26_v11, %v25_v10  ;;  %v24_v14 = vld [vmem:[%s206_s1 + $0x38] sm:$0xff]  ;;  %v21_v16 = vld [vmem:[%s206_s1 + $0x20] sm:$0xff]  ;;  %v22_v17 = vld [vmem:[%s206_s1 + $0x28] sm:$0xff] }
   0x5   :  { %107 = vmatprep.subr.bf16.mxu0 %v127_v0  ;;  %v36_v15 = vpack.c.bf16 %v24_v14, %v23_v13  ;;  %v35_v18 = vpack.c.bf16 %v22_v17, %v21_v16  ;;  %v19_v19 = vld [vmem:[%s206_s1 + $0x10] sm:$0xff]  ;;  %v20_v20 = vld [vmem:[%s206_s1 + $0x18] sm:$0xff]  ;;  %v17_v22 = vld [vmem:[%s206_s1] sm:$0xff] }
   0x6   :  { %v34_v21 = vpack.c.bf16 %v20_v20, %v19_v19  ;;  %v18_v23 = vld [vmem:[%s206_s1 + $0x8] sm:$0xff]  ;;  %v15_v25 = vld [vmem:[%s207_s0] sm:$0x3] }
   0x7   :  { %v33_v24 = vpack.c.bf16 %v18_v23, %v17_v22  ;;  %v16_v26 = vpack.c.bf16 %v15_v25, %v15_v25  ;;  %v95_v27 = vld [vmem:[%s208_s2] ss:$0 sm:$0xff] }
   0x8   :  { %108 = vmatpush3.bf16.msra.mxu0 %v39_v6 }
   0x9   :  { %109 = vmatprep.subr.bf16.mxu0 %v127_v0 }
   0xc   :  { %110 = vmatpush3.bf16.msra.mxu0 %v38_v9 }
   0xd   :  { %111 = vmatprep.subr.bf16.mxu0 %v127_v0 }
  0x10   :  { %112 = vmatpush3.bf16.msra.mxu0 %v37_v12 }
  0x11   :  { %113 = vmatprep.subr.bf16.mxu0 %v127_v0 }
  0x14   :  { %114 = vmatpush3.bf16.msra.mxu0 %v36_v15 }
  0x15   :  { %115 = vmatprep.subr.bf16.mxu0 %v127_v0 }
  0x18   :  { %116 = vmatpush3.bf16.msra.mxu0 %v35_v18 }
  0x19   :  { %117 = vmatprep.subr.bf16.mxu0 %v127_v0 }
  0x1c   :  { %118 = vmatpush3.bf16.msra.mxu0 %v34_v21 }
  0x1d   :  { %119 = vmatprep.subr.bf16.mxu0 %v127_v0 }
  0x20   :  { %120 = vmatpush3.bf16.msra.mxu0 %v33_v24 }
  0x23   :  { %122 = vmatmul.mubr.bf16.vlgmr.msra.gmra.mxu0 %v16_v26 }
  0xe3   :  { %v82_v28 = vpop.f32.mrf.mxu0 }
  0xe4   :  { %v83_v29 = vadd.f32 %v95_v27, %v82_v28 }
  0xe5   :  { %v123_v30 = vpop.f32.mrf.mxu0 }
  0xe6   :  { %v88_v31 = vmax.f32 %v83_v29, 0.0 }
  0xe7   :  { %v85_v32 = vpop.f32.mrf.mxu0 }
  0xe8   :  { %90 = vst.msk [vmem:[%s209_s3] sm:$0x3] %vm89_vm1, %v88_v31 }
  0xe9   :  { %v124_v33 = vpop.f32.mrf.mxu0 }

// kernel: llm_agent_forward.25
= control target key start
LH: loop header
LB: loop body
LE: loop exit
PB: predicated region body
PF: predicated region fallthrough
CT: control target
= control target key end

     0   :  { %v2056_v0 = vmov 0.0   ;;  %vm2057_vm0 = vmmov 0   ;;  %vm64_vm1 = vcmask 523264   ;;  %vm108_vm2 = vcmask 1041408   ;;  %s4383_s1 = inlined_call_operand.vmem [shape: f32[64,128], index: 1, kind: input, shape index: {}]   ;;  %s4384_s0 = inlined_call_operand.vmem [shape: f32[2,64], index: 0, kind: input, shape index: {}]   ;;  %s4385_s2 = inlined_call_operand.vmem [shape: f32[1,128], index: 2, kind: input, shape index: {}]   ;;  %s4386_s5 = inlined_call_operand.vmem [shape: f32[64,1024], index: 5, kind: input, shape index: {}]   ;;  %s4387_s3 = inlined_call_operand.vmem [shape: f32[128,6], index: 3, kind: input, shape index: {}]   ;;  %s4388_s6 = inlined_call_operand.vmem [shape: f32[1,1024], index: 6, kind: input, shape index: {}]   ;;  %s4389_s7 = inlined_call_operand.vmem [shape: f32[1024,512], index: 7, kind: input, shape index: {}]   ;;  %s4390_s8 = inlined_call_operand.vmem [shape: f32[1,512], index: 8, kind: input, shape index: {}]   ;;  %s4391_s4 = inlined_call_operand.vmem [shape: f32[1,6], index: 4, kind: input, shape index: {}]   ;;  %s4392_s9 = inlined_call_operand.vmem [shape: f32[512,1], index: 9, kind: input, shape index: {}]   ;;  %s4393_s11 = inlined_call_operand.vmem [shape: f32[2,6], index: 11, kind: output, shape index: {0}]   ;;  %s4394_s10 = inlined_call_operand.<no memory space> [shape: f32[1,1], index: 10, kind: input, shape index: {}]   ;;  %s4395_s12 = inlined_call_operand.vmem [shape: f32[2,1], index: 12, kind: output, shape index: {1}]  }
   0x1   :  { %2011 = vmatprep.subr.bf16.mxu0 %v2056_v0  ;;  %v51_v1 = vld [vmem:[%s4383_s1 + $0x30] sm:$0xff]  ;;  %v52_v2 = vld [vmem:[%s4383_s1 + $0x38] sm:$0xff]  ;;  %v49_v3 = vld [vmem:[%s4383_s1 + $0x20] sm:$0xff]  ;;  %2019 = vmatprep.mubr.msk.bf16.mxu0 %vm2057_vm0, %v2056_v0  ;;  %v2058_v25 = vmov 0   ;;  %vm196_vm3 = vcmask 41984   ;;  %vm1935_vm4 = vcmask 1024  }
   0x2   :  { %v56_v4 = vpack.c.bf16 %v52_v2, %v51_v1  ;;  %v50_v5 = vld [vmem:[%s4383_s1 + $0x28] sm:$0xff]  ;;  %2023 = vmatprep.subr.bf16.mxu1 %v2056_v0  ;;  %2039 = vmatprep.mubr.msk.bf16.mxu1 %vm2057_vm0, %v2056_v0  ;;  %v47_v7 = vld [vmem:[%s4383_s1 + $0x10] sm:$0xff]  ;;  %v48_v8 = vld [vmem:[%s4383_s1 + $0x18] sm:$0xff] }
   0x3   :  { %v55_v6 = vpack.c.bf16 %v50_v5, %v49_v3  ;;  %v54_v9 = vpack.c.bf16 %v48_v8, %v47_v7  ;;  %v45_v10 = vld [vmem:[%s4383_s1] sm:$0xff]  ;;  %v46_v11 = vld [vmem:[%s4383_s1 + $0x8] sm:$0xff]  ;;  %v139_v37 = vld [vmem:[%s4387_s3 + $0x70] sm:$0xff] }
   0x4   :  { %2012 = vmatpush3.bf16.msra.mxu0 %v56_v4  ;;  %v53_v12 = vpack.c.bf16 %v46_v11, %v45_v10  ;;  %v43_v13 = vld [vmem:[%s4384_s0] sm:$0x3]  ;;  %v259_v22 = vld [vmem:[%s4386_s5 + $0x188] sm:$0xff]  ;;  %v140_v38 = vld [vmem:[%s4387_s3 + $0x78] sm:$0xff] }
   0x5   :  { %2013 = vmatprep.subr.bf16.mxu0 %v2056_v0  ;;  %v2158_v14 = vpack.c.bf16 %v43_v13, %v43_v13  ;;  %v1945_v15 = vld [vmem:[%s4385_s2] ss:$0 sm:$0xff]  ;;  %v267_v23 = vld [vmem:[%s4386_s5 + $0x1c8] sm:$0xff]  ;;  %v148_v42 = vpack.c.bf16 %v140_v38, %v139_v37  ;;  %v261_v52 = vld [vmem:[%s4386_s5 + $0x198] sm:$0xff] }
   0x6   :  { %v258_v24 = vld [vmem:[%s4386_s5 + $0x180] sm:$0xff]  ;;  %v299_v26 = vpack.c.bf16 %v267_v23, %v259_v22  ;;  %v243_v28 = vld [vmem:[%s4386_s5 + $0x108] sm:$0xff]  ;;  %v269_v53 = vld [vmem:[%s4386_s5 + $0x1d8] sm:$0xff] }
   0x7   :  { %v266_v27 = vld [vmem:[%s4386_s5 + $0x1c0] sm:$0xff]  ;;  %v251_v29 = vld [vmem:[%s4386_s5 + $0x148] sm:$0xff]  ;;  %2024 = vmatpush3.bf16.msra.mxu1 %v148_v42  ;;  %v301_v55 = vpack.c.bf16 %v269_v53, %v261_v52  ;;  %v260_v56 = vld [vmem:[%s4386_s5 + $0x190] sm:$0xff] }
   0x8   :  { %2014 = vmatpush3.bf16.msra.mxu0 %v55_v6  ;;  %v298_v30 = vpack.c.bf16 %v266_v27, %v258_v24  ;;  %v291_v31 = vpack.c.bf16 %v251_v29, %v243_v28  ;;  %v242_v32 = vld [vmem:[%s4386_s5 + $0x100] sm:$0xff]  ;;  %v227_v34 = vld [vmem:[%s4386_s5 + $0x88] sm:$0xff]  ;;  %2025 = vmatprep.subr.bf16.mxu1 %v2056_v0  ;;  %v268_v57 = vld [vmem:[%s4386_s5 + $0x1d0] sm:$0xff] }
   0x9   :  { %2015 = vmatprep.subr.bf16.mxu0 %v2056_v0  ;;  %v250_v33 = vld [vmem:[%s4386_s5 + $0x140] sm:$0xff]  ;;  %v235_v35 = vld [vmem:[%s4386_s5 + $0xc8] sm:$0xff]  ;;  %v300_v58 = vpack.c.bf16 %v268_v57, %v260_v56  ;;  %v135_v1 = vld [vmem:[%s4387_s3 + $0x50] sm:$0xff] }
   0xa   :  { %v290_v36 = vpack.c.bf16 %v250_v33, %v242_v32  ;;  %v283_v39 = vpack.c.bf16 %v235_v35, %v227_v34  ;;  %v226_v40 = vld [vmem:[%s4386_s5 + $0x80] sm:$0xff]  ;;  %v211_v43 = vld [vmem:[%s4386_s5 + $0x8] sm:$0xff]  ;;  %v136_v2 = vld [vmem:[%s4387_s3 + $0x58] sm:$0xff] }
   0xb   :  { %v234_v41 = vld [vmem:[%s4386_s5 + $0xc0] sm:$0xff]  ;;  %v219_v44 = vld [vmem:[%s4386_s5 + $0x48] sm:$0xff]  ;;  %v146_v3 = vpack.c.bf16 %v136_v2, %v135_v1  ;;  %v245_v4 = vld [vmem:[%s4386_s5 + $0x118] sm:$0xff] }
   0xc   :  { %2016 = vmatpush3.bf16.msra.mxu0 %v54_v9  ;;  %v137_v45 = vld [vmem:[%s4387_s3 + $0x60] sm:$0xff]  ;;  %v138_v46 = vld [vmem:[%s4387_s3 + $0x68] sm:$0xff]  ;;  %v282_v48 = vpack.c.bf16 %v234_v41, %v226_v40  ;;  %v275_v49 = vpack.c.bf16 %v219_v44, %v211_v43  ;;  %v253_v5 = vld [vmem:[%s4386_s5 + $0x158] sm:$0xff] }
   0xd   :  { %2017 = vmatprep.subr.bf16.mxu0 %v2056_v0  ;;  %v147_v47 = vpack.c.bf16 %v138_v46, %v137_v45  ;;  %v210_v50 = vld [vmem:[%s4386_s5] sm:$0xff]  ;;  %v293_v6 = vpack.c.bf16 %v253_v5, %v245_v4  ;;  %v244_v7 = vld [vmem:[%s4386_s5 + $0x110] sm:$0xff]  ;;  %v134_v11 = vld [vmem:[%s4387_s3 + $0x48] sm:$0xff] }
   0xe   :  { %v218_v51 = vld [vmem:[%s4386_s5 + $0x40] sm:$0xff]  ;;  %v252_v8 = vld [vmem:[%s4386_s5 + $0x150] sm:$0xff]  ;;  %v229_v13 = vld [vmem:[%s4386_s5 + $0x98] sm:$0xff] }
   0xf   :  { %2026 = vmatpush3.bf16.msra.mxu1 %v147_v47  ;;  %v274_v54 = vpack.c.bf16 %v218_v51, %v210_v50  ;;  %v292_v9 = vpack.c.bf16 %v252_v8, %v244_v7  ;;  %v133_v10 = vld [vmem:[%s4387_s3 + $0x40] sm:$0xff]  ;;  %v213_v22 = vld [vmem:[%s4386_s5 + $0x18] sm:$0xff]  ;;  %v212_v27 = vld [vmem:[%s4386_s5 + $0x10] sm:$0xff] }
  0x10   :  { %2018 = vmatpush3.bf16.msra.mxu0 %v53_v12  ;;  %2027 = vmatprep.subr.bf16.mxu1 %v2056_v0  ;;  %v145_v12 = vpack.c.bf16 %v134_v11, %v133_v10  ;;  %v221_v23 = vld [vmem:[%s4386_s5 + $0x58] sm:$0xff]  ;;  %v220_v28 = vld [vmem:[%s4386_s5 + $0x50] sm:$0xff]  ;;  %v129_v29 = vld [vmem:[%s4387_s3 + $0x20] sm:$0xff] }
  0x11   :  { %356 = vmatprep.subr.bf16.mxu0 %v299_v26  ;;  %v277_v26 = vpack.c.bf16 %v221_v23, %v213_v22  ;;  %v127_v33 = vld [vmem:[%s4387_s3 + $0x10] sm:$0xff]  ;;  %v128_v34 = vld [vmem:[%s4387_s3 + $0x18] sm:$0xff]  ;;  %v125_v42 = vld [vmem:[%s4387_s3] sm:$0xff] }
  0x12   :  { %v265_v35 = vld [vmem:[%s4386_s5 + $0x1b8] sm:$0xff]  ;;  %v264_v37 = vld [vmem:[%s4386_s5 + $0x1b0] sm:$0xff]  ;;  %v142_v41 = vpack.c.bf16 %v128_v34, %v127_v33  ;;  %v126_v43 = vld [vmem:[%s4387_s3 + $0x8] sm:$0xff] }
  0x13   :  { %2020 = vmatmul.mubr.msk.bf16.vlgmr.msra.gmra.mxu0 %vm64_vm1, %v2158_v14  ;;  %2028 = vmatpush3.bf16.msra.mxu1 %v146_v3  ;;  %v272_v38 = vld [vmem:[%s4386_s5 + $0x1f0] sm:$0xff]  ;;  %v263_v44 = vld [vmem:[%s4386_s5 + $0x1a8] sm:$0xff]  ;;  %v141_v46 = vpack.c.bf16 %v126_v43, %v125_v42  ;;  %v233_v53 = vld [vmem:[%s4386_s5 + $0xb8] sm:$0xff]  ;;  %v308_v43 = vlaneseq }
  0x14   :  { %380 = vmatprep.mubr.bf16.mxu0 %v2058_v25  ;;  %357 = vmatpush1.bf16.msra.mxu0 %v298_v30  ;;  %v276_v30 = vpack.c.bf16 %v220_v28, %v212_v27  ;;  %v304_v40 = vpack.c.bf16 %v272_v38, %v264_v37  ;;  %v271_v45 = vld [vmem:[%s4386_s5 + $0x1e8] sm:$0xff]  ;;  %v248_v51 = vld [vmem:[%s4386_s5 + $0x130] sm:$0xff]  ;;  %v230_v27 = vld [vmem:[%s4386_s5 + $0xa0] sm:$0xff] }
  0x15   :  { %358 = vmatprep.subr.bf16.mxu0 %v291_v31  ;;  %2029 = vmatprep.subr.bf16.mxu1 %v2056_v0  ;;  %v130_v31 = vld [vmem:[%s4387_s3 + $0x28] sm:$0xff]  ;;  %v303_v47 = vpack.c.bf16 %v271_v45, %v263_v44  ;;  %v232_v56 = vld [vmem:[%s4386_s5 + $0xb0] sm:$0xff]  ;;  %v238_v28 = vld [vmem:[%s4386_s5 + $0xe0] sm:$0xff]  ;;  %v2435_v44 = vshrl.u32 %v308_v43, 7 }
  0x16   :  { %v143_v32 = vpack.c.bf16 %v130_v31, %v129_v29  ;;  %v240_v57 = vld [vmem:[%s4386_s5 + $0xf0] sm:$0xff]  ;;  %v231_v22 = vld [vmem:[%s4386_s5 + $0xa8] sm:$0xff]  ;;  %v222_v33 = vld [vmem:[%s4386_s5 + $0x60] sm:$0xff] }
  0x17   :  { %2030 = vmatpush3.bf16.msra.mxu1 %v145_v12  ;;  %v224_v1 = vld [vmem:[%s4386_s5 + $0x70] sm:$0xff]  ;;  %v262_v12 = vld [vmem:[%s4386_s5 + $0x1a0] sm:$0xff]  ;;  %v239_v23 = vld [vmem:[%s4386_s5 + $0xe8] sm:$0xff]  ;;  %v310_v45 = vsub.s32 0, %v2435_v44 }
  0x18   :  { %359 = vmatpush1.bf16.msra.mxu0 %v290_v36  ;;  %2031 = vmatprep.subr.bf16.mxu1 %v2056_v0  ;;  %v273_v36 = vld [vmem:[%s4386_s5 + $0x1f8] sm:$0xff]  ;;  %v215_v29 = vld [vmem:[%s4386_s5 + $0x28] sm:$0xff] }
  0x19   :  { %360 = vmatprep.subr.bf16.mxu0 %v283_v39  ;;  %v305_v39 = vpack.c.bf16 %v273_v36, %v265_v35  ;;  %v768_v43 = vld [vmem:[%s4389_s7 + $0x588] sm:$0xff] }
  0x1c   :  { %361 = vmatpush1.bf16.msra.mxu0 %v282_v48  ;;  %v249_v48 = vld [vmem:[%s4386_s5 + $0x138] sm:$0xff] }
  0x1d   :  { %362 = vmatprep.subr.bf16.mxu0 %v275_v49  ;;  %v257_v49 = vld [vmem:[%s4386_s5 + $0x178] sm:$0xff] }
  0x1e   :  { %v297_v50 = vpack.c.bf16 %v257_v49, %v249_v48  ;;  %v318_v49 = vsub.s32 2, %v2435_v44 }
  0x20   :  { %363 = vmatpush1.bf16.msra.mxu0 %v274_v54  ;;  %v241_v54 = vld [vmem:[%s4386_s5 + $0xf8] sm:$0xff] }
  0x21   :  { %397 = vmatprep.subr.bf16.mxu0 %v301_v55  ;;  %v289_v55 = vpack.c.bf16 %v241_v54, %v233_v53  ;;  %v322_v54 = vsub.s32 3, %v2435_v44 }
  0x23   :  { %1948 = vmatmul.mubr.msk.bf16.vlgmr.msra.gmra.mxu0 %vm64_vm1, %v2158_v14 }
  0x24   :  { %398 = vmatpush1.bf16.msra.mxu0 %v300_v58  ;;  %421 = vmatprep.mubr.bf16.mxu0 %v2058_v25  ;;  %v288_v58 = vpack.c.bf16 %v240_v57, %v232_v56 }
  0x25   :  { %399 = vmatprep.subr.bf16.mxu0 %v293_v6 }
  0x28   :  { %400 = vmatpush1.bf16.msra.mxu0 %v292_v9 }
  0xd3   :  { %v102_v16 = vpop.f32.mrf.mxu0 }
  0xd4   :  { %v2165_v17 = vadd.f32 %v1945_v15, %v102_v16  ;;  %v237_v15 = vld [vmem:[%s4386_s5 + $0xd8] sm:$0xff] }
  0xd5   :  { %v2021_v18 = vpop.f32.mrf.mxu0  ;;  %v285_v16 = vpack.c.bf16 %v237_v15, %v229_v13  ;;  %v270_v13 = vld [vmem:[%s4386_s5 + $0x1e0] sm:$0xff]  ;;  %v247_v15 = vld [vmem:[%s4386_s5 + $0x128] sm:$0xff] }
  0xd6   :  { %v109_v19 = vsel %vm108_vm2, %v2165_v17, 0.0  ;;  %v236_v18 = vld [vmem:[%s4386_s5 + $0xd0] sm:$0xff] }
  0xd7   :  { %110 = vadd.xlane.f32.xlu0 %v109_v19  ;;  %v105_v20 = vpop.f32.mrf.mxu0  ;;  %v131_v19 = vld [vmem:[%s4387_s3 + $0x30] sm:$0xff]  ;;  %401 = vmatprep.subr.bf16.mxu0 %v285_v16  ;;  %v255_v16 = vld [vmem:[%s4386_s5 + $0x168] sm:$0xff] }
  0xd9   :  { %v2022_v21 = vpop.f32.mrf.mxu0 }
  0xda   :  { %v132_v21 = vld [vmem:[%s4387_s3 + $0x38] sm:$0xff] }
  0xdb   :  { %v144_v24 = vpack.c.bf16 %v132_v21, %v131_v19  ;;  %v254_v21 = vld [vmem:[%s4386_s5 + $0x160] sm:$0xff] }
  0xdd   :  { %2032 = vmatpush3.bf16.msra.mxu1 %v144_v24 }
  0xde   :  { %2033 = vmatprep.subr.bf16.mxu1 %v2056_v0 }
  0xe1   :  { %2034 = vmatpush3.bf16.msra.mxu1 %v143_v32  ;;  %v214_v32 = vld [vmem:[%s4386_s5 + $0x20] sm:$0xff] }
  0xe2   :  { %2035 = vmatprep.subr.bf16.mxu1 %v2056_v0  ;;  %v278_v34 = vpack.c.bf16 %v222_v33, %v214_v32  ;;  %v780_v33 = vld [vmem:[%s4389_s7 + $0x5e8] sm:$0xff] }
  0xe3   :  { %v382_v3 = vpop.f32.mrf.mxu0 }
  0xe5   :  { %2036 = vmatpush3.bf16.msra.mxu1 %v142_v41  ;;  %v384_v4 = vpop.f32.mrf.mxu0 }
  0xe6   :  { %2037 = vmatprep.subr.bf16.mxu1 %v2056_v0  ;;  %v256_v0 = vld [vmem:[%s4386_s5 + $0x170] sm:$0xff] }
  0xe7   :  { %v296_v52 = vpack.c.bf16 %v256_v0, %v248_v51  ;;  %v386_v5 = vpop.f32.mrf.mxu0 }
  0xe9   :  { %2038 = vmatpush3.bf16.msra.mxu1 %v141_v46  ;;  %v387_v6 = vpop.f32.mrf.mxu0  ;;  %v314_v46 = vsub.s32 1, %v2435_v44 }
  0xea   :  { %438 = vmatprep.subr.bf16.mxu1 %v303_v47  ;;  %v306_v47 = vld [vmem:[%s4388_s6] sm:$0xff] }
  0xeb   :  { %v315_v48 = vrot.slane %v306_v47, %v314_v46  ;;  %v319_v53 = vrot.slane %v306_v47, %v318_v49 }
 0x160   :  { %v111_v59 = vpop.xlane.xlu0 %110 }
 0x161   :  { %v113_v60 = vmul.f32 0.0078125, %v111_v59  ;;  %v217_v59 = vld [vmem:[%s4386_s5 + $0x38] sm:$0xff] }
 0x163   :  { %v2248_v61 = vsub.f32 %v2165_v17, %v113_v60  ;;  %v228_v17 = vld [vmem:[%s4386_s5 + $0x90] sm:$0xff]  ;;  %v225_v60 = vld [vmem:[%s4386_s5 + $0x78] sm:$0xff] }
 0x164   :  { %v284_v20 = vpack.c.bf16 %v236_v18, %v228_v17  ;;  %v302_v18 = vpack.c.bf16 %v270_v13, %v262_v12 }
 0x165   :  { %v115_v62 = vmul.f32 %v2248_v61, %v2248_v61 }
 0x166   :  { %402 = vmatpush1.bf16.msra.mxu0 %v284_v20  ;;  %v246_v20 = vld [vmem:[%s4386_s5 + $0x120] sm:$0xff] }
 0x167   :  { %v116_v63 = vsel %vm108_vm2, %v115_v62, 0.0  ;;  %403 = vmatprep.subr.bf16.mxu0 %v277_v26  ;;  %v281_v62 = vpack.c.bf16 %v225_v60, %v217_v59  ;;  %v294_v24 = vpack.c.bf16 %v254_v21, %v246_v20  ;;  %v287_v26 = vpack.c.bf16 %v239_v23, %v231_v22 }
 0x168   :  { %117 = vadd.xlane.f32.xlu0 %v116_v63  ;;  %v216_v63 = vld [vmem:[%s4386_s5 + $0x30] sm:$0xff]  ;;  %v323_v60 = vrot.slane %v306_v47, %v322_v54 }
 0x169   :  { %v280_v2 = vpack.c.bf16 %v224_v1, %v216_v63  ;;  %v326_v63 = vsub.s32 4, %v2435_v44 }
 0x16a   :  { %404 = vmatpush1.bf16.msra.mxu0 %v276_v30  ;;  %v223_v30 = vld [vmem:[%s4386_s5 + $0x68] sm:$0xff] }
 0x16b   :  { %479 = vmatprep.subr.bf16.mxu0 %v305_v39  ;;  %v279_v31 = vpack.c.bf16 %v223_v30, %v215_v29  ;;  %v327_v6 = vrot.slane %v306_v47, %v326_v63  ;;  %v648_v30 = vld [vmem:[%s4389_s7 + $0x1c8] sm:$0xff] }
 0x16d   :  { %1949 = vmatmul.mubr.msk.bf16.vlgmr.msra.gmra.mxu0 %vm64_vm1, %v2158_v14 }
 0x16e   :  { %480 = vmatpush1.bf16.msra.mxu0 %v304_v40  ;;  %503 = vmatprep.mubr.bf16.mxu0 %v2058_v25 }
 0x16f   :  { %481 = vmatprep.subr.bf16.mxu0 %v297_v50 }
 0x172   :  { %482 = vmatpush1.bf16.msra.mxu0 %v296_v52  ;;  %v2451_v52 = vadd.f32 %v384_v4, %v315_v48  ;;  %v330_v4 = vsub.s32 5, %v2435_v44 }
 0x173   :  { %483 = vmatprep.subr.bf16.mxu0 %v289_v55 }
 0x176   :  { %484 = vmatpush1.bf16.msra.mxu0 %v288_v58  ;;  %v513_v58 = vsel %vm108_vm2, %v2451_v52, 0.0 }
 0x177   :  { %485 = vmatprep.subr.bf16.mxu0 %v281_v62  ;;  %v334_v62 = vsub.s32 6, %v2435_v44 }
 0x179   :  { %v335_v5 = vrot.slane %v306_v47, %v334_v62 }
 0x17a   :  { %486 = vmatpush1.bf16.msra.mxu0 %v280_v2 }
 0x17d   :  { %1951 = vmatmul.mubr.msk.bf16.vlgmr.msra.gmra.mxu0 %vm64_vm1, %v2158_v14 }
 0x1f1   :  { %v118_v7 = vpop.xlane.xlu0 %117 }
 0x1f2   :  { %v119_v8 = vmul.f32 0.0078125, %v118_v7  ;;  %v338_v7 = vsub.s32 7, %v2435_v44 }
 0x1f4   :  { %v120_v9 = vadd.f32 1e-05, %v119_v8 }
 0x1f6   :  { %2046 = vrsqrt.f32 %v120_v9 }
 0x203   :  { %v2047_v10 = vpop.eup %2046 }
 0x204   :  { %v122_v11 = vmul.f32 %v2047_v10, %v2248_v61  ;;  %v295_v61 = vpack.c.bf16 %v255_v16, %v247_v15  ;;  %v331_v10 = vrot.slane %v306_v47, %v330_v4  ;;  %v339_v15 = vrot.slane %v306_v47, %v338_v7  ;;  %v631_v4 = vld [vmem:[%s4389_s7 + $0x140] sm:$0xff] }
 0x205   :  { %v759_v7 = vld [vmem:[%s4389_s7 + $0x540] sm:$0xff] }
 0x206   :  { %v123_v17 = vmax.f32 %v122_v11, 0.0 }
 0x208   :  { %v124_v19 = vpack.c.bf16 %v123_v17, %v123_v17 }
 0x20a   :  { %2040 = vmatmul.mubr.bf16.vlgmr.msra.gmra.mxu1 %v124_v19 }
 0x20b   :  { %439 = vmatpush1.bf16.msra.mxu1 %v302_v18  ;;  %462 = vmatprep.mubr.bf16.mxu1 %v2058_v25  ;;  %v286_v25 = vpack.c.bf16 %v238_v28, %v230_v27 }
 0x20c   :  { %440 = vmatprep.subr.bf16.mxu1 %v295_v61 }
 0x20f   :  { %441 = vmatpush1.bf16.msra.mxu1 %v294_v24 }
 0x210   :  { %442 = vmatprep.subr.bf16.mxu1 %v287_v26 }
 0x213   :  { %443 = vmatpush1.bf16.msra.mxu1 %v286_v25  ;;  %v652_v25 = vld [vmem:[%s4389_s7 + $0x1e8] sm:$0xff] }
 0x214   :  { %444 = vmatprep.subr.bf16.mxu1 %v279_v31  ;;  %v776_v31 = vld [vmem:[%s4389_s7 + $0x5c8] sm:$0xff]  ;;  %v1132_v32 = vpack.c.bf16 %v652_v25, %v648_v30 }
 0x217   :  { %445 = vmatpush1.bf16.msra.mxu1 %v278_v34  ;;  %v647_v34 = vld [vmem:[%s4389_s7 + $0x1c0] sm:$0xff] }
 0x218   :  { %1381 = vmatprep.subr.bf16.mxu1 %v1132_v32  ;;  %v615_v32 = vld [vmem:[%s4389_s7 + $0xc0] sm:$0xff] }
 0x21a   :  { %1950 = vmatmul.mubr.msk.bf16.vlgmr.msra.gmra.mxu1 %vm64_vm1, %v2158_v14  ;;  %v311_v14 = vrot.slane %v306_v47, %v310_v45  ;;  %v772_v47 = vld [vmem:[%s4389_s7 + $0x5a8] sm:$0xff] }
 0x21b   :  { %v1192_v48 = vpack.c.bf16 %v772_v47, %v768_v43  ;;  %v607_v47 = vld [vmem:[%s4389_s7 + $0x80] sm:$0xff] }
 0x21c   :  { %v2449_v0 = vadd.f32 %v382_v3, %v311_v14 }
 0x21e   :  { %v512_v57 = vsel %vm108_vm2, %v2449_v0, 0.0 }
 0x21f   :  { %v514_v1 = vadd.f32 %v513_v58, %v512_v57  ;;  %v771_v57 = vld [vmem:[%s4389_s7 + $0x5a0] sm:$0xff]  ;;  %v632_v58 = vld [vmem:[%s4389_s7 + $0x148] sm:$0xff] }
 0x22d   :  { %v423_v35 = vpop.f32.mrf.mxu0 }
 0x22e   :  { %v2460_v59 = vadd.f32 %v423_v35, %v319_v53  ;;  %v651_v35 = vld [vmem:[%s4389_s7 + $0x1e0] sm:$0xff] }
 0x22f   :  { %v425_v36 = vpop.f32.mrf.mxu0  ;;  %v643_v53 = vld [vmem:[%s4389_s7 + $0x1a0] sm:$0xff] }
 0x230   :  { %v515_v2 = vsel %vm108_vm2, %v2460_v59, 0.0  ;;  %v2468_v3 = vadd.f32 %v425_v36, %v323_v60  ;;  %v1196_v36 = vpack.c.bf16 %v780_v33, %v776_v31  ;;  %v636_v60 = vld [vmem:[%s4389_s7 + $0x168] sm:$0xff]  ;;  %v619_v33 = vld [vmem:[%s4389_s7 + $0xe0] sm:$0xff] }
 0x231   :  { %v427_v37 = vpop.f32.mrf.mxu0  ;;  %v516_v8 = vadd.f32 %v515_v2, %v514_v1  ;;  %v1124_v63 = vpack.c.bf16 %v636_v60, %v632_v58  ;;  %v760_v1 = vld [vmem:[%s4389_s7 + $0x548] sm:$0xff] }
 0x232   :  { %v517_v9 = vsel %vm108_vm2, %v2468_v3, 0.0  ;;  %v1131_v37 = vpack.c.bf16 %v651_v35, %v647_v34  ;;  %1422 = vmatprep.subr.bf16.mxu0 %v1196_v36  ;;  %v764_v2 = vld [vmem:[%s4389_s7 + $0x568] sm:$0xff]  ;;  %v743_v34 = vld [vmem:[%s4389_s7 + $0x4c0] sm:$0xff] }
 0x233   :  { %v428_v38 = vpop.f32.mrf.mxu0  ;;  %v518_v16 = vadd.f32 %v517_v9, %v516_v8  ;;  %v763_v8 = vld [vmem:[%s4389_s7 + $0x560] sm:$0xff]  ;;  %v732_v58 = vld [vmem:[%s4389_s7 + $0x468] sm:$0xff] }
 0x234   :  { %v775_v38 = vld [vmem:[%s4389_s7 + $0x5c0] sm:$0xff]  ;;  %1382 = vmatpush1.bf16.msra.mxu1 %v1131_v37  ;;  %v608_v37 = vld [vmem:[%s4389_s7 + $0x88] sm:$0xff] }
 0x235   :  { %v747_v36 = vld [vmem:[%s4389_s7 + $0x4e0] sm:$0xff] }
 0x23d   :  { %v505_v39 = vpop.f32.mrf.mxu0 }
 0x23e   :  { %v2474_v12 = vadd.f32 %v505_v39, %v335_v5  ;;  %v779_v39 = vld [vmem:[%s4389_s7 + $0x5e0] sm:$0xff]  ;;  %v1188_v5 = vpack.c.bf16 %v764_v2, %v760_v1 }
 0x23f   :  { %v507_v40 = vpop.f32.mrf.mxu0  ;;  %v599_v1 = vld [vmem:[%s4389_s7 + $0x40] sm:$0xff] }
 0x240   :  { %v523_v21 = vsel %vm108_vm2, %v2474_v12, 0.0  ;;  %v2484_v22 = vadd.f32 %v507_v40, %v339_v15  ;;  %v640_v40 = vld [vmem:[%s4389_s7 + $0x188] sm:$0xff]  ;;  %v603_v2 = vld [vmem:[%s4389_s7 + $0x60] sm:$0xff] }
 0x241   :  { %v509_v41 = vpop.f32.mrf.mxu0  ;;  %v752_v15 = vld [vmem:[%s4389_s7 + $0x508] sm:$0xff] }
 0x242   :  { %v525_v28 = vsel %vm108_vm2, %v2484_v22, 0.0  ;;  %v1195_v41 = vpack.c.bf16 %v779_v39, %v775_v38  ;;  %v612_v38 = vld [vmem:[%s4389_s7 + $0xa8] sm:$0xff] }
 0x243   :  { %v510_v42 = vpop.f32.mrf.mxu0  ;;  %v736_v39 = vld [vmem:[%s4389_s7 + $0x488] sm:$0xff]  ;;  %v1112_v43 = vpack.c.bf16 %v612_v38, %v608_v37 }
 0x244   :  { %v644_v42 = vld [vmem:[%s4389_s7 + $0x1a8] sm:$0xff]  ;;  %1423 = vmatpush1.bf16.msra.mxu0 %v1195_v41  ;;  %v1115_v41 = vpack.c.bf16 %v619_v33, %v615_v32  ;;  %v839_v32 = vld [vmem:[%s4389_s7 + $0x7c0] sm:$0xff] }
 0x245   :  { %v1128_v14 = vpack.c.bf16 %v644_v42, %v640_v40  ;;  %1424 = vmatprep.subr.bf16.mxu0 %v1192_v48  ;;  %v740_v40 = vld [vmem:[%s4389_s7 + $0x4a8] sm:$0xff]  ;;  %v1179_v42 = vpack.c.bf16 %v747_v36, %v743_v34  ;;  %v735_v48 = vld [vmem:[%s4389_s7 + $0x480] sm:$0xff] }
 0x246   :  { %v843_v34 = vld [vmem:[%s4389_s7 + $0x7e0] sm:$0xff]  ;;  %v708_v36 = vld [vmem:[%s4389_s7 + $0x3a8] sm:$0xff] }
 0x247   :  { %1383 = vmatprep.subr.bf16.mxu1 %v1128_v14  ;;  %v611_v14 = vld [vmem:[%s4389_s7 + $0xa0] sm:$0xff]  ;;  %v832_v37 = vld [vmem:[%s4389_s7 + $0x788] sm:$0xff] }
 0x248   :  { %v1111_v60 = vpack.c.bf16 %v611_v14, %v607_v47  ;;  %v836_v38 = vld [vmem:[%s4389_s7 + $0x7a8] sm:$0xff]  ;;  %v831_v14 = vld [vmem:[%s4389_s7 + $0x780] sm:$0xff] }
 0x249   :  { %v1224_v47 = vpack.c.bf16 %v836_v38, %v832_v37  ;;  %v692_v37 = vld [vmem:[%s4389_s7 + $0x328] sm:$0xff] }
 0x24a   :  { %v816_v38 = vld [vmem:[%s4389_s7 + $0x708] sm:$0xff] }
 0x2ca   :  { %v2447_v50 = vpop.f32.mrf.mxu1 }
 0x2cc   :  { %v2041_v51 = vpop.f32.mrf.mxu1 }
 0x2cd   :  { %v639_v51 = vld [vmem:[%s4389_s7 + $0x180] sm:$0xff] }
 0x2ce   :  { %v193_v55 = vpop.f32.mrf.mxu1 }
 0x2cf   :  { %v767_v55 = vld [vmem:[%s4389_s7 + $0x580] sm:$0xff] }
 0x2d0   :  { %v2042_v56 = vpop.f32.mrf.mxu1  ;;  %v1191_v62 = vpack.c.bf16 %v771_v57, %v767_v55  ;;  %v600_v55 = vld [vmem:[%s4389_s7 + $0x48] sm:$0xff] }
 0x2d1   :  { %v1127_v56 = vpack.c.bf16 %v643_v53, %v639_v51  ;;  %v1176_v51 = vpack.c.bf16 %v740_v40, %v736_v39  ;;  %v739_v53 = vld [vmem:[%s4389_s7 + $0x4a0] sm:$0xff]  ;;  %v728_v57 = vld [vmem:[%s4389_s7 + $0x448] sm:$0xff]  ;;  %v1227_v40 = vpack.c.bf16 %v843_v34, %v839_v32 }
 0x2d2   :  { %1425 = vmatpush1.bf16.msra.mxu0 %v1191_v62  ;;  %v1175_v62 = vpack.c.bf16 %v739_v53, %v735_v48  ;;  %v835_v48 = vld [vmem:[%s4389_s7 + $0x7a0] sm:$0xff] }
 0x2d3   :  { %1384 = vmatpush1.bf16.msra.mxu1 %v1127_v56  ;;  %1426 = vmatprep.subr.bf16.mxu0 %v1188_v5  ;;  %v604_v56 = vld [vmem:[%s4389_s7 + $0x68] sm:$0xff]  ;;  %v1172_v5 = vpack.c.bf16 %v732_v58, %v728_v57  ;;  %v1223_v53 = vpack.c.bf16 %v835_v48, %v831_v14  ;;  %v827_v34 = vld [vmem:[%s4389_s7 + $0x760] sm:$0xff] }
 0x2d4   :  { %1385 = vmatprep.subr.bf16.mxu1 %v1124_v63  ;;  %v1108_v63 = vpack.c.bf16 %v604_v56, %v600_v55  ;;  %v815_v14 = vld [vmem:[%s4389_s7 + $0x700] sm:$0xff] }
 0x2d5   :  { %v819_v48 = vld [vmem:[%s4389_s7 + $0x720] sm:$0xff] }
 0x2da   :  { %v464_v11 = vpop.f32.mrf.mxu1 }
 0x2db   :  { %v2476_v13 = vadd.f32 %v464_v11, %v327_v6  ;;  %v635_v6 = vld [vmem:[%s4389_s7 + $0x160] sm:$0xff]  ;;  %v628_v11 = vld [vmem:[%s4389_s7 + $0x128] sm:$0xff] }
 0x2dc   :  { %v466_v17 = vpop.f32.mrf.mxu1  ;;  %v1123_v9 = vpack.c.bf16 %v635_v6, %v631_v4  ;;  %v727_v4 = vld [vmem:[%s4389_s7 + $0x440] sm:$0xff] }
 0x2dd   :  { %v519_v18 = vsel %vm108_vm2, %v2476_v13, 0.0  ;;  %v2480_v19 = vadd.f32 %v466_v17, %v331_v10  ;;  %v624_v10 = vld [vmem:[%s4389_s7 + $0x108] sm:$0xff]  ;;  %v731_v6 = vld [vmem:[%s4389_s7 + $0x460] sm:$0xff] }
 0x2de   :  { %v520_v61 = vadd.f32 %v519_v18, %v518_v16  ;;  %v468_v20 = vpop.f32.mrf.mxu1  ;;  %v1187_v16 = vpack.c.bf16 %v763_v8, %v759_v7  ;;  %v1120_v17 = vpack.c.bf16 %v628_v11, %v624_v10  ;;  %v756_v18 = vld [vmem:[%s4389_s7 + $0x528] sm:$0xff]  ;;  %1386 = vmatpush1.bf16.msra.mxu1 %v1123_v9  ;;  %v1107_v11 = vpack.c.bf16 %v603_v2, %v599_v1 }
 0x2df   :  { %v521_v23 = vsel %vm108_vm2, %v2480_v19, 0.0  ;;  %v627_v20 = vld [vmem:[%s4389_s7 + $0x120] sm:$0xff]  ;;  %v592_v7 = vld [vmem:[%s4389_s7 + $0x8] sm:$0xff] }
 0x2e0   :  { %v522_v24 = vadd.f32 %v521_v23, %v520_v61  ;;  %v469_v26 = vpop.f32.mrf.mxu1  ;;  %v623_v61 = vld [vmem:[%s4389_s7 + $0x100] sm:$0xff]  ;;  %1427 = vmatpush1.bf16.msra.mxu0 %v1187_v16  ;;  %1387 = vmatprep.subr.bf16.mxu1 %v1120_v17  ;;  %v596_v8 = vld [vmem:[%s4389_s7 + $0x28] sm:$0xff] }
 0x2e1   :  { %v751_v23 = vld [vmem:[%s4389_s7 + $0x500] sm:$0xff]  ;;  %v616_v26 = vld [vmem:[%s4389_s7 + $0xc8] sm:$0xff]  ;;  %v1119_v30 = vpack.c.bf16 %v627_v20, %v623_v61  ;;  %v1104_v16 = vpack.c.bf16 %v596_v8, %v592_v7 }
 0x2e2   :  { %v524_v27 = vadd.f32 %v523_v21, %v522_v24  ;;  %v1184_v21 = vpack.c.bf16 %v756_v18, %v752_v15  ;;  %v755_v24 = vld [vmem:[%s4389_s7 + $0x520] sm:$0xff]  ;;  %v720_v9 = vld [vmem:[%s4389_s7 + $0x408] sm:$0xff]  ;;  %v1171_v15 = vpack.c.bf16 %v731_v6, %v727_v4 }
 0x2e3   :  { %v1183_v25 = vpack.c.bf16 %v755_v24, %v751_v23  ;;  %1388 = vmatpush1.bf16.msra.mxu1 %v1119_v30  ;;  %v724_v10 = vld [vmem:[%s4389_s7 + $0x428] sm:$0xff]  ;;  %v591_v17 = vld [vmem:[%s4389_s7] sm:$0xff] }
 0x2e4   :  { %v526_v29 = vadd.f32 %v525_v28, %v524_v27  ;;  %v620_v27 = vld [vmem:[%s4389_s7 + $0xe8] sm:$0xff]  ;;  %1428 = vmatprep.subr.bf16.mxu0 %v1184_v21  ;;  %v595_v18 = vld [vmem:[%s4389_s7 + $0x20] sm:$0xff]  ;;  %v1168_v20 = vpack.c.bf16 %v724_v10, %v720_v9 }
 0x2e5   :  { %v744_v28 = vld [vmem:[%s4389_s7 + $0x4c8] sm:$0xff]  ;;  %v1116_v31 = vpack.c.bf16 %v620_v27, %v616_v26  ;;  %1429 = vmatpush1.bf16.msra.mxu0 %v1183_v25  ;;  %v719_v61 = vld [vmem:[%s4389_s7 + $0x400] sm:$0xff] }
 0x2e6   :  { %527 = vadd.xlane.f32.xlu1 %v526_v29  ;;  %v748_v29 = vld [vmem:[%s4389_s7 + $0x4e8] sm:$0xff]  ;;  %v723_v21 = vld [vmem:[%s4389_s7 + $0x420] sm:$0xff] }
 0x2e7   :  { %v1180_v35 = vpack.c.bf16 %v748_v29, %v744_v28  ;;  %1389 = vmatprep.subr.bf16.mxu1 %v1116_v31  ;;  %v712_v23 = vld [vmem:[%s4389_s7 + $0x3c8] sm:$0xff]  ;;  %v1103_v28 = vpack.c.bf16 %v595_v18, %v591_v17  ;;  %v1167_v29 = vpack.c.bf16 %v723_v21, %v719_v61  ;;  %v711_v25 = vld [vmem:[%s4389_s7 + $0x3c0] sm:$0xff] }
 0x2e8   :  { %1390 = vmatpush1.bf16.msra.mxu1 %v1115_v41  ;;  %v716_v24 = vld [vmem:[%s4389_s7 + $0x3e8] sm:$0xff]  ;;  %v715_v31 = vld [vmem:[%s4389_s7 + $0x3e0] sm:$0xff] }
 0x2e9   :  { %1430 = vmatprep.subr.bf16.mxu0 %v1180_v35  ;;  %1391 = vmatprep.subr.bf16.mxu1 %v1112_v43  ;;  %v840_v26 = vld [vmem:[%s4389_s7 + $0x7c8] sm:$0xff]  ;;  %v1164_v30 = vpack.c.bf16 %v716_v24, %v712_v23  ;;  %v1163_v39 = vpack.c.bf16 %v715_v31, %v711_v25  ;;  %v707_v43 = vld [vmem:[%s4389_s7 + $0x3a0] sm:$0xff] }
 0x2ea   :  { %1431 = vmatpush1.bf16.msra.mxu0 %v1179_v42  ;;  %v844_v27 = vld [vmem:[%s4389_s7 + $0x7e8] sm:$0xff]  ;;  %v703_v42 = vld [vmem:[%s4389_s7 + $0x380] sm:$0xff] }
 0x2eb   :  { %1432 = vmatprep.subr.bf16.mxu0 %v1176_v51  ;;  %v1228_v33 = vpack.c.bf16 %v844_v27, %v840_v26  ;;  %v704_v35 = vld [vmem:[%s4389_s7 + $0x388] sm:$0xff]  ;;  %v1159_v51 = vpack.c.bf16 %v707_v43, %v703_v42  ;;  %v699_v25 = vld [vmem:[%s4389_s7 + $0x360] sm:$0xff] }
 0x2ec   :  { %1392 = vmatpush1.bf16.msra.mxu1 %v1111_v60  ;;  %v1160_v41 = vpack.c.bf16 %v708_v36, %v704_v35  ;;  %v696_v24 = vld [vmem:[%s4389_s7 + $0x348] sm:$0xff]  ;;  %v691_v42 = vld [vmem:[%s4389_s7 + $0x320] sm:$0xff] }
 0x2ed   :  { %1393 = vmatprep.subr.bf16.mxu1 %v1108_v63  ;;  %v700_v26 = vld [vmem:[%s4389_s7 + $0x368] sm:$0xff] }
 0x2ee   :  { %1433 = vmatpush1.bf16.msra.mxu0 %v1175_v62  ;;  %v824_v27 = vld [vmem:[%s4389_s7 + $0x748] sm:$0xff] }
 0x2ef   :  { %1434 = vmatprep.subr.bf16.mxu0 %v1172_v5  ;;  %v688_v36 = vld [vmem:[%s4389_s7 + $0x308] sm:$0xff] }
 0x2f0   :  { %1394 = vmatpush1.bf16.msra.mxu1 %v1107_v11 }
 0x2f1   :  { %1395 = vmatprep.subr.bf16.mxu1 %v1104_v16 }
 0x2f2   :  { %1435 = vmatpush1.bf16.msra.mxu0 %v1171_v15 }
 0x2f3   :  { %1436 = vmatprep.subr.bf16.mxu0 %v1168_v20 }
 0x2f4   :  { %1396 = vmatpush1.bf16.msra.mxu1 %v1103_v28  ;;  %v1156_v28 = vpack.c.bf16 %v700_v26, %v696_v24 }
 0x2f5   :  { %1397 = vmatprep.subr.bf16.mxu1 %v1164_v30  ;;  %v695_v30 = vld [vmem:[%s4389_s7 + $0x340] sm:$0xff] }
 0x2f6   :  { %1437 = vmatpush1.bf16.msra.mxu0 %v1167_v29  ;;  %v828_v29 = vld [vmem:[%s4389_s7 + $0x768] sm:$0xff]  ;;  %v1155_v32 = vpack.c.bf16 %v699_v25, %v695_v30  ;;  %v791_v25 = vld [vmem:[%s4389_s7 + $0x640] sm:$0xff] }
 0x2f7   :  { %1438 = vmatprep.subr.bf16.mxu0 %v1228_v33  ;;  %v1220_v31 = vpack.c.bf16 %v828_v29, %v824_v27  ;;  %v823_v33 = vld [vmem:[%s4389_s7 + $0x740] sm:$0xff]  ;;  %v796_v27 = vld [vmem:[%s4389_s7 + $0x668] sm:$0xff] }
 0x2f8   :  { %1398 = vmatpush2.bf16.msra.mxu1 %v1163_v39  ;;  %v1219_v35 = vpack.c.bf16 %v827_v34, %v823_v33  ;;  %v1152_v39 = vpack.c.bf16 %v692_v37, %v688_v36  ;;  %v667_v29 = vld [vmem:[%s4389_s7 + $0x260] sm:$0xff]  ;;  %v660_v33 = vld [vmem:[%s4389_s7 + $0x228] sm:$0xff] }
 0x2f9   :  { %1399 = vmatprep.subr.bf16.mxu1 %v1160_v41  ;;  %v687_v41 = vld [vmem:[%s4389_s7 + $0x300] sm:$0xff]  ;;  %v784_v34 = vld [vmem:[%s4389_s7 + $0x608] sm:$0xff] }
 0x2fa   :  { %1439 = vmatpush2.bf16.msra.mxu0 %v1227_v40  ;;  %v820_v40 = vld [vmem:[%s4389_s7 + $0x728] sm:$0xff] }
 0x2fb   :  { %1440 = vmatprep.subr.bf16.mxu0 %v1224_v47  ;;  %v1216_v43 = vpack.c.bf16 %v820_v40, %v816_v38  ;;  %v1151_v47 = vpack.c.bf16 %v691_v42, %v687_v41  ;;  %v659_v40 = vld [vmem:[%s4389_s7 + $0x220] sm:$0xff] }
 0x2fc   :  { %1400 = vmatpush2.bf16.msra.mxu1 %v1159_v51  ;;  %v680_v51 = vld [vmem:[%s4389_s7 + $0x2c8] sm:$0xff]  ;;  %v783_v42 = vld [vmem:[%s4389_s7 + $0x600] sm:$0xff] }
 0x2fd   :  { %1401 = vmatprep.subr.bf16.mxu1 %v1156_v28  ;;  %v663_v28 = vld [vmem:[%s4389_s7 + $0x240] sm:$0xff] }
 0x2fe   :  { %1441 = vmatpush2.bf16.msra.mxu0 %v1223_v53  ;;  %v1215_v53 = vpack.c.bf16 %v819_v48, %v815_v14  ;;  %v1139_v36 = vpack.c.bf16 %v667_v29, %v663_v28  ;;  %v904_v48 = vld [vmem:[%s4389_s7 + $0x9c8] sm:$0xff]  ;;  %v899_v28 = vld [vmem:[%s4389_s7 + $0x9a0] sm:$0xff] }
 0x2ff   :  { %1442 = vmatprep.subr.bf16.mxu0 %v1220_v31  ;;  %v795_v31 = vld [vmem:[%s4389_s7 + $0x660] sm:$0xff] }
 0x300   :  { %1402 = vmatpush2.bf16.msra.mxu1 %v1155_v32  ;;  %v656_v32 = vld [vmem:[%s4389_s7 + $0x208] sm:$0xff]  ;;  %v1203_v37 = vpack.c.bf16 %v795_v31, %v791_v25  ;;  %v1023_v29 = vld [vmem:[%s4389_s7 + $0xd80] sm:$0xff] }
 0x301   :  { %1403 = vmatprep.subr.bf16.mxu1 %v1152_v39  ;;  %v1136_v38 = vpack.c.bf16 %v660_v33, %v656_v32  ;;  %v655_v39 = vld [vmem:[%s4389_s7 + $0x200] sm:$0xff]  ;;  %v888_v25 = vld [vmem:[%s4389_s7 + $0x948] sm:$0xff] }
 0x302   :  { %1443 = vmatpush2.bf16.msra.mxu0 %v1219_v35  ;;  %v788_v35 = vld [vmem:[%s4389_s7 + $0x628] sm:$0xff] }
 0x303   :  { %1444 = vmatprep.subr.bf16.mxu0 %v1216_v43  ;;  %v1200_v41 = vpack.c.bf16 %v788_v35, %v784_v34  ;;  %v787_v43 = vld [vmem:[%s4389_s7 + $0x620] sm:$0xff]  ;;  %v892_v33 = vld [vmem:[%s4389_s7 + $0x968] sm:$0xff] }
 0x304   :  { %1404 = vmatpush2.bf16.msra.mxu1 %v1151_v47  ;;  %v1135_v47 = vpack.c.bf16 %v659_v40, %v655_v39  ;;  %v1199_v14 = vpack.c.bf16 %v787_v43, %v783_v42  ;;  %v1016_v34 = vld [vmem:[%s4389_s7 + $0xd48] sm:$0xff]  ;;  %v887_v40 = vld [vmem:[%s4389_s7 + $0x940] sm:$0xff]  ;;  %v1252_v42 = vpack.c.bf16 %v892_v33, %v888_v25 }
 0x305   :  { %v1020_v35 = vld [vmem:[%s4389_s7 + $0xd68] sm:$0xff]  ;;  %v995_v25 = vld [vmem:[%s4389_s7 + $0xca0] sm:$0xff] }
 0x306   :  { %1445 = vmatpush2.bf16.msra.mxu0 %v1215_v53  ;;  %v1032_v53 = vld [vmem:[%s4389_s7 + $0xdc8] sm:$0xff]  ;;  %v1316_v43 = vpack.c.bf16 %v1020_v35, %v1016_v34 }
 0x307   :  { %v984_v33 = vld [vmem:[%s4389_s7 + $0xc48] sm:$0xff] }
 0x308   :  { %v988_v34 = vld [vmem:[%s4389_s7 + $0xc68] sm:$0xff] }
 0x36f   :  { %v528_v55 = vpop.xlane.xlu1 %527 }
 0x370   :  { %v530_v56 = vmul.f32 0.0009765625, %v528_v55  ;;  %v684_v55 = vld [vmem:[%s4389_s7 + $0x2e8] sm:$0xff] }
 0x372   :  { %v2731_v57 = vsub.f32 %v2449_v0, %v530_v56  ;;  %v2734_v58 = vsub.f32 %v2451_v52, %v530_v56  ;;  %v2737_v60 = vsub.f32 %v2460_v59, %v530_v56  ;;  %v2740_v62 = vsub.f32 %v2468_v3, %v530_v56 }
 0x373   :  { %v2743_v63 = vsub.f32 %v2476_v13, %v530_v56  ;;  %v2752_v52 = vsub.f32 %v2480_v19, %v530_v56  ;;  %v2759_v5 = vsub.f32 %v2474_v12, %v530_v56  ;;  %v2765_v19 = vsub.f32 %v2484_v22, %v530_v56  ;;  %v808_v56 = vld [vmem:[%s4389_s7 + $0x6c8] sm:$0xff] }
 0x374   :  { %v539_v1 = vmul.f32 %v2731_v57, %v2731_v57  ;;  %v540_v2 = vmul.f32 %v2734_v58, %v2734_v58  ;;  %v541_v0 = vmul.f32 %v2737_v60, %v2737_v60  ;;  %v542_v59 = vmul.f32 %v2740_v62, %v2740_v62 }
 0x375   :  { %v543_v6 = vmul.f32 %v2743_v63, %v2743_v63  ;;  %v544_v9 = vmul.f32 %v2752_v52, %v2752_v52  ;;  %v545_v15 = vmul.f32 %v2759_v5, %v2759_v5  ;;  %v546_v17 = vmul.f32 %v2765_v19, %v2765_v19 }
 0x376   :  { %v547_v3 = vsel %vm108_vm2, %v539_v1, 0.0  ;;  %v548_v13 = vsel %vm108_vm2, %v540_v2, 0.0  ;;  %v550_v7 = vsel %vm108_vm2, %v541_v0, 0.0  ;;  %v552_v10 = vsel %vm108_vm2, %v542_v59, 0.0  ;;  %v812_v1 = vld [vmem:[%s4389_s7 + $0x6e8] sm:$0xff]  ;;  %v679_v59 = vld [vmem:[%s4389_s7 + $0x2c0] sm:$0xff] }
 0x377   :  { %v549_v4 = vadd.f32 %v548_v13, %v547_v3  ;;  %v554_v12 = vsel %vm108_vm2, %v543_v6, 0.0  ;;  %v556_v18 = vsel %vm108_vm2, %v544_v9, 0.0  ;;  %v558_v22 = vsel %vm108_vm2, %v545_v15, 0.0  ;;  %v683_v3 = vld [vmem:[%s4389_s7 + $0x2e0] sm:$0xff]  ;;  %v804_v15 = vld [vmem:[%s4389_s7 + $0x6a8] sm:$0xff] }
 0x378   :  { %v560_v21 = vsel %vm108_vm2, %v546_v17, 0.0  ;;  %v1148_v2 = vpack.c.bf16 %v684_v55, %v680_v51  ;;  %v1212_v0 = vpack.c.bf16 %v812_v1, %v808_v56  ;;  %v807_v13 = vld [vmem:[%s4389_s7 + $0x6c0] sm:$0xff]  ;;  %v908_v51 = vld [vmem:[%s4389_s7 + $0x9e8] sm:$0xff] }
 0x379   :  { %v551_v8 = vadd.f32 %v550_v7, %v549_v4  ;;  %v1147_v4 = vpack.c.bf16 %v683_v3, %v679_v59  ;;  %v811_v6 = vld [vmem:[%s4389_s7 + $0x6e0] sm:$0xff]  ;;  %v672_v7 = vld [vmem:[%s4389_s7 + $0x288] sm:$0xff]  ;;  %v1260_v55 = vpack.c.bf16 %v908_v51, %v904_v48 }
 0x37a   :  { %1405 = vmatprep.subr.bf16.mxu1 %v1148_v2  ;;  %1446 = vmatprep.subr.bf16.mxu0 %v1212_v0  ;;  %v1211_v9 = vpack.c.bf16 %v811_v6, %v807_v13  ;;  %v675_v17 = vld [vmem:[%s4389_s7 + $0x2a0] sm:$0xff]  ;;  %v1036_v56 = vld [vmem:[%s4389_s7 + $0xde8] sm:$0xff] }
 0x37b   :  { %v553_v11 = vadd.f32 %v552_v10, %v551_v8  ;;  %v676_v8 = vld [vmem:[%s4389_s7 + $0x2a8] sm:$0xff]  ;;  %1406 = vmatpush2.bf16.msra.mxu1 %v1147_v4  ;;  %v1324_v1 = vpack.c.bf16 %v1036_v56, %v1032_v53  ;;  %v903_v13 = vld [vmem:[%s4389_s7 + $0x9c0] sm:$0xff] }
 0x37c   :  { %v1144_v10 = vpack.c.bf16 %v676_v8, %v672_v7  ;;  %1447 = vmatpush2.bf16.msra.mxu0 %v1211_v9  ;;  %v907_v9 = vld [vmem:[%s4389_s7 + $0x9e0] sm:$0xff]  ;;  %v880_v48 = vld [vmem:[%s4389_s7 + $0x908] sm:$0xff] }
 0x37d   :  { %v555_v16 = vadd.f32 %v554_v12, %v553_v11  ;;  %v800_v11 = vld [vmem:[%s4389_s7 + $0x688] sm:$0xff]  ;;  %v671_v12 = vld [vmem:[%s4389_s7 + $0x280] sm:$0xff] }
 0x37e   :  { %1407 = vmatprep.subr.bf16.mxu1 %v1144_v10  ;;  %v1031_v10 = vld [vmem:[%s4389_s7 + $0xdc0] sm:$0xff]  ;;  %v884_v51 = vld [vmem:[%s4389_s7 + $0x928] sm:$0xff] }
 0x37f   :  { %v557_v61 = vadd.f32 %v556_v18, %v555_v16  ;;  %v1208_v16 = vpack.c.bf16 %v804_v15, %v800_v11  ;;  %v799_v18 = vld [vmem:[%s4389_s7 + $0x680] sm:$0xff]  ;;  %v1008_v53 = vld [vmem:[%s4389_s7 + $0xd08] sm:$0xff] }
 0x381   :  { %v559_v20 = vadd.f32 %v558_v22, %v557_v61  ;;  %v803_v61 = vld [vmem:[%s4389_s7 + $0x6a0] sm:$0xff]  ;;  %v1143_v22 = vpack.c.bf16 %v675_v17, %v671_v12  ;;  %1448 = vmatprep.subr.bf16.mxu0 %v1208_v16  ;;  %v896_v16 = vld [vmem:[%s4389_s7 + $0x988] sm:$0xff]  ;;  %v1259_v17 = vpack.c.bf16 %v907_v9, %v903_v13 }
 0x382   :  { %v1207_v24 = vpack.c.bf16 %v803_v61, %v799_v18  ;;  %v1000_v9 = vld [vmem:[%s4389_s7 + $0xcc8] sm:$0xff] }
 0x383   :  { %v561_v23 = vadd.f32 %v560_v21, %v559_v20  ;;  %v664_v20 = vld [vmem:[%s4389_s7 + $0x248] sm:$0xff]  ;;  %1408 = vmatpush2.bf16.msra.mxu1 %v1143_v22 }
 0x384   :  { %v668_v21 = vld [vmem:[%s4389_s7 + $0x268] sm:$0xff]  ;;  %1449 = vmatpush2.bf16.msra.mxu0 %v1207_v24 }
 0x385   :  { %562 = vadd.xlane.f32.xlu1 %v561_v23  ;;  %v792_v23 = vld [vmem:[%s4389_s7 + $0x648] sm:$0xff]  ;;  %v1140_v26 = vpack.c.bf16 %v668_v21, %v664_v20 }
 0x386   :  { %v1204_v30 = vpack.c.bf16 %v796_v27, %v792_v23  ;;  %v900_v20 = vld [vmem:[%s4389_s7 + $0x9a8] sm:$0xff]  ;;  %v895_v27 = vld [vmem:[%s4389_s7 + $0x980] sm:$0xff] }
 0x387   :  { %1409 = vmatprep.subr.bf16.mxu1 %v1140_v26  ;;  %v1256_v31 = vpack.c.bf16 %v900_v20, %v896_v16  ;;  %v1003_v16 = vld [vmem:[%s4389_s7 + $0xce0] sm:$0xff] }
 0x388   :  { %1450 = vmatprep.subr.bf16.mxu0 %v1204_v30  ;;  %1410 = vmatpush2.bf16.msra.mxu1 %v1139_v36  ;;  %v1027_v30 = vld [vmem:[%s4389_s7 + $0xda0] sm:$0xff] }
 0x389   :  { %1451 = vmatpush2.bf16.msra.mxu0 %v1203_v37  ;;  %1411 = vmatprep.subr.bf16.mxu1 %v1136_v38  ;;  %v1255_v38 = vpack.c.bf16 %v899_v28, %v895_v27  ;;  %v1319_v39 = vpack.c.bf16 %v1027_v30, %v1023_v29  ;;  %v867_v27 = vld [vmem:[%s4389_s7 + $0x8a0] sm:$0xff] }
 0x38a   :  { %1452 = vmatprep.subr.bf16.mxu0 %v1200_v41  ;;  %v891_v41 = vld [vmem:[%s4389_s7 + $0x960] sm:$0xff] }
 0x38b   :  { %v1251_v56 = vpack.c.bf16 %v891_v41, %v887_v40  ;;  %v991_v30 = vld [vmem:[%s4389_s7 + $0xc80] sm:$0xff] }
 0x38c   :  { %1412 = vmatpush2.bf16.msra.mxu1 %v1135_v47  ;;  %v1015_v47 = vld [vmem:[%s4389_s7 + $0xd40] sm:$0xff] }
 0x38d   :  { %1453 = vmatpush2.bf16.msra.mxu0 %v1199_v14  ;;  %1463 = vmatprep.subr.bf16.mxu1 %v1260_v55  ;;  %v1019_v14 = vld [vmem:[%s4389_s7 + $0xd60] sm:$0xff]  ;;  %v1012_v55 = vld [vmem:[%s4389_s7 + $0xd28] sm:$0xff] }
 0x38e   :  { %1504 = vmatprep.subr.bf16.mxu0 %v1324_v1  ;;  %v1315_v1 = vpack.c.bf16 %v1019_v14, %v1015_v47  ;;  %v1312_v13 = vpack.c.bf16 %v1012_v55, %v1008_v53  ;;  %v859_v40 = vld [vmem:[%s4389_s7 + $0x860] sm:$0xff]  ;;  %v848_v14 = vld [vmem:[%s4389_s7 + $0x808] sm:$0xff] }
 0x38f   :  { %v987_v47 = vld [vmem:[%s4389_s7 + $0xc60] sm:$0xff]  ;;  %v980_v53 = vld [vmem:[%s4389_s7 + $0xc28] sm:$0xff] }
 0x40e   :  { %v563_v2 = vpop.xlane.xlu1 %562 }
 0x40f   :  { %v564_v0 = vmul.f32 0.0009765625, %v563_v2  ;;  %v879_v2 = vld [vmem:[%s4389_s7 + $0x900] sm:$0xff] }
 0x411   :  { %v565_v59 = vadd.f32 1e-05, %v564_v0  ;;  %v883_v0 = vld [vmem:[%s4389_s7 + $0x920] sm:$0xff] }
 0x413   :  { %2048 = vrsqrt.f32 %v565_v59  ;;  %v1248_v59 = vpack.c.bf16 %v884_v51, %v880_v48  ;;  %v852_v48 = vld [vmem:[%s4389_s7 + $0x828] sm:$0xff] }
 0x414   :  { %v976_v51 = vld [vmem:[%s4389_s7 + $0xc08] sm:$0xff] }
 0x420   :  { %v2934_v3 = vpop.eup %2048 }
 0x421   :  { %v568_v4 = vmul.f32 %v2934_v3, %v2734_v58  ;;  %v570_v6 = vmul.f32 %v2934_v3, %v2740_v62  ;;  %v567_v7 = vmul.f32 %v2934_v3, %v2731_v57  ;;  %v569_v8 = vmul.f32 %v2934_v3, %v2737_v60  ;;  %v1035_v58 = vld [vmem:[%s4389_s7 + $0xde0] sm:$0xff] }
 0x422   :  { %v572_v62 = vmul.f32 %v2934_v3, %v2752_v52  ;;  %v574_v57 = vmul.f32 %v2934_v3, %v2765_v19  ;;  %v1323_v18 = vpack.c.bf16 %v1035_v58, %v1031_v10  ;;  %v1024_v52 = vld [vmem:[%s4389_s7 + $0xd88] sm:$0xff]  ;;  %v1247_v58 = vpack.c.bf16 %v883_v0, %v879_v2  ;;  %v851_v2 = vld [vmem:[%s4389_s7 + $0x820] sm:$0xff] }
 0x423   :  { %v576_v11 = vmax.f32 %v568_v4, 0.0  ;;  %v578_v60 = vmax.f32 %v570_v6, 0.0  ;;  %v575_v15 = vmax.f32 %v567_v7, 0.0  ;;  %v577_v12 = vmax.f32 %v569_v8, 0.0  ;;  %v1028_v19 = vld [vmem:[%s4389_s7 + $0xda8] sm:$0xff]  ;;  %v1007_v4 = vld [vmem:[%s4389_s7 + $0xd00] sm:$0xff] }
 0x424   :  { %v580_v61 = vmax.f32 %v572_v62, 0.0  ;;  %v582_v22 = vmax.f32 %v574_v57, 0.0  ;;  %v1320_v32 = vpack.c.bf16 %v1028_v19, %v1024_v52  ;;  %v1011_v6 = vld [vmem:[%s4389_s7 + $0xd20] sm:$0xff]  ;;  %v872_v7 = vld [vmem:[%s4389_s7 + $0x8c8] sm:$0xff]  ;;  %v1232_v0 = vpack.c.bf16 %v852_v48, %v848_v14 }
 0x425   :  { %v2972_v21 = vpack.c.bf16 %v576_v11, %v576_v11  ;;  %v2974_v23 = vpack.c.bf16 %v578_v60, %v578_v60  ;;  %v2976_v24 = vpack.c.bf16 %v575_v15, %v575_v15  ;;  %v2978_v26 = vpack.c.bf16 %v577_v12, %v577_v12  ;;  %v876_v8 = vld [vmem:[%s4389_s7 + $0x8e8] sm:$0xff]  ;;  %v871_v57 = vld [vmem:[%s4389_s7 + $0x8c0] sm:$0xff] }
 0x426   :  { %v3008_v36 = vpack.c.bf16 %v580_v61, %v580_v61  ;;  %v3010_v37 = vpack.c.bf16 %v582_v22, %v582_v22  ;;  %v1004_v10 = vld [vmem:[%s4389_s7 + $0xce8] sm:$0xff]  ;;  %v1311_v62 = vpack.c.bf16 %v1011_v6, %v1007_v4  ;;  %v875_v11 = vld [vmem:[%s4389_s7 + $0x8e0] sm:$0xff]  ;;  %v1244_v60 = vpack.c.bf16 %v876_v8, %v872_v7 }
 0x427   :  { %1413 = vmatprep.mubr.bf16.mxu1 %v2972_v21  ;;  %1454 = vmatprep.mubr.bf16.mxu0 %v2974_v23  ;;  %v1308_v15 = vpack.c.bf16 %v1004_v10, %v1000_v9  ;;  %v999_v12 = vld [vmem:[%s4389_s7 + $0xcc0] sm:$0xff]  ;;  %v992_v61 = vld [vmem:[%s4389_s7 + $0xc88] sm:$0xff]  ;;  %v1243_v20 = vpack.c.bf16 %v875_v11, %v871_v57 }
 0x428   :  { %1414 = vmatmul.mubr.bf16.vlgmr.msra.gmra.mxu1 %v2976_v24  ;;  %1455 = vmatmul.mubr.bf16.vlgmr.msra.gmra.mxu0 %v2978_v26  ;;  %v996_v22 = vld [vmem:[%s4389_s7 + $0xca8] sm:$0xff]  ;;  %v1307_v52 = vpack.c.bf16 %v1003_v16, %v999_v12  ;;  %v863_v19 = vld [vmem:[%s4389_s7 + $0x880] sm:$0xff] }
 0x429   :  { %1464 = vmatpush1.bf16.msra.mxu1 %v1259_v17  ;;  %1505 = vmatpush1.bf16.msra.mxu0 %v1323_v18  ;;  %v864_v17 = vld [vmem:[%s4389_s7 + $0x888] sm:$0xff]  ;;  %v1304_v29 = vpack.c.bf16 %v996_v22, %v992_v61  ;;  %v1239_v35 = vpack.c.bf16 %v867_v27, %v863_v19  ;;  %v979_v4 = vld [vmem:[%s4389_s7 + $0xc20] sm:$0xff] }
 0x42a   :  { %1495 = vmatprep.mubr.bf16.mxu1 %v3008_v36  ;;  %1536 = vmatprep.mubr.bf16.mxu0 %v3010_v37  ;;  %v868_v18 = vld [vmem:[%s4389_s7 + $0x8a8] sm:$0xff]  ;;  %v971_v57 = vld [vmem:[%s4389_s7 + $0xbe0] sm:$0xff] }
 0x42b   :  { %1465 = vmatprep.subr.bf16.mxu1 %v1256_v31  ;;  %1506 = vmatprep.subr.bf16.mxu0 %v1320_v32  ;;  %v1240_v28 = vpack.c.bf16 %v868_v18, %v864_v17  ;;  %v856_v31 = vld [vmem:[%s4389_s7 + $0x848] sm:$0xff]  ;;  %v1099_v12 = vld [vmem:[%s4389_s7 + $0xfe0] sm:$0xff] }
 0x42c   :  { %v860_v32 = vld [vmem:[%s4389_s7 + $0x868] sm:$0xff]  ;;  %v963_v19 = vld [vmem:[%s4389_s7 + $0xba0] sm:$0xff] }
 0x42d   :  { %1466 = vmatpush1.bf16.msra.mxu1 %v1255_v38  ;;  %1507 = vmatpush1.bf16.msra.mxu0 %v1319_v39  ;;  %v1303_v38 = vpack.c.bf16 %v995_v25, %v991_v30  ;;  %v855_v39 = vld [vmem:[%s4389_s7 + $0x840] sm:$0xff]  ;;  %v1236_v41 = vpack.c.bf16 %v860_v32, %v856_v31  ;;  %v968_v6 = vld [vmem:[%s4389_s7 + $0xbc8] sm:$0xff] }
 0x42e   :  { %1467 = vmatprep.subr.bf16.mxu1 %v1252_v42  ;;  %1508 = vmatprep.subr.bf16.mxu0 %v1316_v43  ;;  %v1300_v42 = vpack.c.bf16 %v988_v34, %v984_v33  ;;  %v983_v43 = vld [vmem:[%s4389_s7 + $0xc40] sm:$0xff]  ;;  %v1235_v55 = vpack.c.bf16 %v859_v40, %v855_v39  ;;  %v972_v7 = vld [vmem:[%s4389_s7 + $0xbe8] sm:$0xff] }
 0x42f   :  { %v1096_v8 = vld [vmem:[%s4389_s7 + $0xfc8] sm:$0xff]  ;;  %v1292_v11 = vpack.c.bf16 %v972_v7, %v968_v6  ;;  %v1091_v30 = vld [vmem:[%s4389_s7 + $0xfa0] sm:$0xff] }
 0x430   :  { %v1100_v9 = vld [vmem:[%s4389_s7 + $0xfe8] sm:$0xff]  ;;  %v955_v39 = vld [vmem:[%s4389_s7 + $0xb60] sm:$0xff] }
 0x431   :  { %1468 = vmatpush1.bf16.msra.mxu1 %v1251_v56  ;;  %1509 = vmatpush1.bf16.msra.mxu0 %v1315_v1  ;;  %v1299_v56 = vpack.c.bf16 %v987_v47, %v983_v43  ;;  %v847_v1 = vld [vmem:[%s4389_s7 + $0x800] sm:$0xff]  ;;  %v960_v16 = vld [vmem:[%s4389_s7 + $0xb88] sm:$0xff] }
 0x432   :  { %1469 = vmatprep.subr.bf16.mxu1 %v1248_v59  ;;  %1510 = vmatprep.subr.bf16.mxu0 %v1312_v13  ;;  %v1296_v59 = vpack.c.bf16 %v980_v53, %v976_v51  ;;  %v975_v13 = vld [vmem:[%s4389_s7 + $0xc00] sm:$0xff]  ;;  %v1231_v10 = vpack.c.bf16 %v851_v2, %v847_v1  ;;  %v964_v17 = vld [vmem:[%s4389_s7 + $0xba8] sm:$0xff] }
 0x433   :  { %v1088_v18 = vld [vmem:[%s4389_s7 + $0xf88] sm:$0xff]  ;;  %v1288_v27 = vpack.c.bf16 %v964_v17, %v960_v16  ;;  %v1083_v43 = vld [vmem:[%s4389_s7 + $0xf60] sm:$0xff] }
 0x434   :  { %v1092_v61 = vld [vmem:[%s4389_s7 + $0xfa8] sm:$0xff]  ;;  %v947_v1 = vld [vmem:[%s4389_s7 + $0xb20] sm:$0xff] }
 0x435   :  { %1470 = vmatpush1.bf16.msra.mxu1 %v1247_v58  ;;  %1511 = vmatpush1.bf16.msra.mxu0 %v1311_v62  ;;  %v1295_v58 = vpack.c.bf16 %v979_v4, %v975_v13  ;;  %v967_v62 = vld [vmem:[%s4389_s7 + $0xbc0] sm:$0xff]  ;;  %v952_v25 = vld [vmem:[%s4389_s7 + $0xb48] sm:$0xff] }
 0x436   :  { %1471 = vmatprep.subr.bf16.mxu1 %v1244_v60  ;;  %1512 = vmatprep.subr.bf16.mxu0 %v1308_v15  ;;  %v1356_v60 = vpack.c.bf16 %v1100_v9, %v1096_v8  ;;  %v1095_v15 = vld [vmem:[%s4389_s7 + $0xfc0] sm:$0xff]  ;;  %v1291_v22 = vpack.c.bf16 %v971_v57, %v967_v62  ;;  %v956_v31 = vld [vmem:[%s4389_s7 + $0xb68] sm:$0xff] }
 0x437   :  { %v1080_v32 = vld [vmem:[%s4389_s7 + $0xf48] sm:$0xff]  ;;  %v1284_v40 = vpack.c.bf16 %v956_v31, %v952_v25  ;;  %v1075_v13 = vld [vmem:[%s4389_s7 + $0xf20] sm:$0xff] }
 0x438   :  { %v1084_v33 = vld [vmem:[%s4389_s7 + $0xf68] sm:$0xff]  ;;  %v939_v62 = vld [vmem:[%s4389_s7 + $0xae0] sm:$0xff] }
 0x439   :  { %1472 = vmatpush1.bf16.msra.mxu1 %v1243_v20  ;;  %1513 = vmatpush1.bf16.msra.mxu0 %v1307_v52  ;;  %v1355_v20 = vpack.c.bf16 %v1099_v12, %v1095_v15  ;;  %v959_v52 = vld [vmem:[%s4389_s7 + $0xb80] sm:$0xff]  ;;  %v944_v47 = vld [vmem:[%s4389_s7 + $0xb08] sm:$0xff] }
 0x43a   :  { %1473 = vmatprep.subr.bf16.mxu1 %v1240_v28  ;;  %1514 = vmatprep.subr.bf16.mxu0 %v1304_v29  ;;  %v1352_v28 = vpack.c.bf16 %v1092_v61, %v1088_v18  ;;  %v1087_v29 = vld [vmem:[%s4389_s7 + $0xf80] sm:$0xff]  ;;  %v1287_v34 = vpack.c.bf16 %v963_v19, %v959_v52  ;;  %v948_v14 = vld [vmem:[%s4389_s7 + $0xb28] sm:$0xff] }
 0x43b   :  { %v1072_v48 = vld [vmem:[%s4389_s7 + $0xf08] sm:$0xff]  ;;  %v1280_v2 = vpack.c.bf16 %v948_v14, %v944_v47  ;;  %v1067_v15 = vld [vmem:[%s4389_s7 + $0xee0] sm:$0xff] }
 0x43c   :  { %v1076_v51 = vld [vmem:[%s4389_s7 + $0xf28] sm:$0xff]  ;;  %v931_v52 = vld [vmem:[%s4389_s7 + $0xaa0] sm:$0xff] }
 0x43d   :  { %1474 = vmatpush1.bf16.msra.mxu1 %v1239_v35  ;;  %1515 = vmatpush1.bf16.msra.mxu0 %v1303_v38  ;;  %v1351_v35 = vpack.c.bf16 %v1091_v30, %v1087_v29  ;;  %v951_v38 = vld [vmem:[%s4389_s7 + $0xb40] sm:$0xff]  ;;  %v936_v4 = vld [vmem:[%s4389_s7 + $0xac8] sm:$0xff] }
 0x43e   :  { %1475 = vmatprep.subr.bf16.mxu1 %v1236_v41  ;;  %1516 = vmatprep.subr.bf16.mxu0 %v1300_v42  ;;  %v1348_v41 = vpack.c.bf16 %v1084_v33, %v1080_v32  ;;  %v1079_v42 = vld [vmem:[%s4389_s7 + $0xf40] sm:$0xff]  ;;  %v1283_v53 = vpack.c.bf16 %v955_v39, %v951_v38  ;;  %v940_v6 = vld [vmem:[%s4389_s7 + $0xae8] sm:$0xff] }
 0x43f   :  { %v1064_v7 = vld [vmem:[%s4389_s7 + $0xec8] sm:$0xff]  ;;  %v1276_v57 = vpack.c.bf16 %v940_v6, %v936_v4  ;;  %v1059_v29 = vld [vmem:[%s4389_s7 + $0xea0] sm:$0xff]  ;;  %v573_v4 = vmul.f32 %v2934_v3, %v2759_v5  ;;  %v650_v6 = vld [vmem:[%s4389_s7 + $0x1d8] sm:$0xff] }
 0x440   :  { %v1068_v8 = vld [vmem:[%s4389_s7 + $0xee8] sm:$0xff]  ;;  %v923_v38 = vld [vmem:[%s4389_s7 + $0xa60] sm:$0xff] }
 0x441   :  { %1476 = vmatpush1.bf16.msra.mxu1 %v1235_v55  ;;  %1517 = vmatpush1.bf16.msra.mxu0 %v1299_v56  ;;  %v1347_v55 = vpack.c.bf16 %v1083_v43, %v1079_v42  ;;  %v943_v56 = vld [vmem:[%s4389_s7 + $0xb00] sm:$0xff]  ;;  %v928_v12 = vld [vmem:[%s4389_s7 + $0xa88] sm:$0xff] }
 0x442   :  { %1477 = vmatprep.subr.bf16.mxu1 %v1232_v0  ;;  %1518 = vmatprep.subr.bf16.mxu0 %v1296_v59  ;;  %v1344_v0 = vpack.c.bf16 %v1076_v51, %v1072_v48  ;;  %v1071_v59 = vld [vmem:[%s4389_s7 + $0xf00] sm:$0xff]  ;;  %v1279_v9 = vpack.c.bf16 %v947_v1, %v943_v56  ;;  %v932_v16 = vld [vmem:[%s4389_s7 + $0xaa8] sm:$0xff] }
 0x443   :  { %v1056_v17 = vld [vmem:[%s4389_s7 + $0xe88] sm:$0xff]  ;;  %v1272_v19 = vpack.c.bf16 %v932_v16, %v928_v12  ;;  %v1047_v39 = vld [vmem:[%s4389_s7 + $0xe40] sm:$0xff]  ;;  %v642_v12 = vld [vmem:[%s4389_s7 + $0x198] sm:$0xff] }
 0x444   :  { %v1060_v18 = vld [vmem:[%s4389_s7 + $0xea8] sm:$0xff]  ;;  %v1051_v42 = vld [vmem:[%s4389_s7 + $0xe60] sm:$0xff]  ;;  %v646_v16 = vld [vmem:[%s4389_s7 + $0x1b8] sm:$0xff] }
 0x445   :  { %1478 = vmatpush1.bf16.msra.mxu1 %v1231_v10  ;;  %1519 = vmatpush1.bf16.msra.mxu0 %v1295_v58  ;;  %v1343_v10 = vpack.c.bf16 %v1075_v13, %v1071_v59  ;;  %v935_v58 = vld [vmem:[%s4389_s7 + $0xac0] sm:$0xff]  ;;  %v920_v30 = vld [vmem:[%s4389_s7 + $0xa48] sm:$0xff]  ;;  %v571_v13 = vmul.f32 %v2934_v3, %v2743_v63 }
 0x446   :  { %1479 = vmatprep.subr.bf16.mxu1 %v1292_v11  ;;  %1520 = vmatprep.subr.bf16.mxu0 %v1356_v60  ;;  %v1340_v11 = vpack.c.bf16 %v1068_v8, %v1064_v7  ;;  %v1063_v60 = vld [vmem:[%s4389_s7 + $0xec0] sm:$0xff]  ;;  %v1275_v61 = vpack.c.bf16 %v939_v62, %v935_v58  ;;  %v924_v25 = vld [vmem:[%s4389_s7 + $0xa68] sm:$0xff]  ;;  %v654_v7 = vld [vmem:[%s4389_s7 + $0x1f8] sm:$0xff] }
 0x447   :  { %v1048_v31 = vld [vmem:[%s4389_s7 + $0xe48] sm:$0xff]  ;;  %v911_v56 = vld [vmem:[%s4389_s7 + $0xa00] sm:$0xff]  ;;  %v778_v8 = vld [vmem:[%s4389_s7 + $0x5d8] sm:$0xff]  ;;  %v579_v3 = vmax.f32 %v571_v13, 0.0  ;;  %v1134_v58 = vpack.c.bf16 %v654_v7, %v650_v6 }
 0x448   :  { %v1052_v32 = vld [vmem:[%s4389_s7 + $0xe68] sm:$0xff]  ;;  %v915_v1 = vld [vmem:[%s4389_s7 + $0xa20] sm:$0xff]  ;;  %v618_v13 = vld [vmem:[%s4389_s7 + $0xd8] sm:$0xff] }
 0x449   :  { %1480 = vmatpush2.bf16.msra.mxu1 %v1291_v22  ;;  %1521 = vmatpush2.bf16.msra.mxu0 %v1355_v20  ;;  %v1339_v22 = vpack.c.bf16 %v1067_v15, %v1063_v60  ;;  %v927_v20 = vld [vmem:[%s4389_s7 + $0xa80] sm:$0xff]  ;;  %v912_v43 = vld [vmem:[%s4389_s7 + $0xa08] sm:$0xff]  ;;  %v1263_v63 = vpack.c.bf16 %v915_v1, %v911_v56  ;;  %v777_v60 = vld [vmem:[%s4389_s7 + $0x5d0] sm:$0xff] }
 0x44a   :  { %1481 = vmatprep.subr.bf16.mxu1 %v1288_v27  ;;  %1522 = vmatprep.subr.bf16.mxu0 %v1352_v28  ;;  %v1336_v27 = vpack.c.bf16 %v1060_v18, %v1056_v17  ;;  %v1055_v28 = vld [vmem:[%s4389_s7 + $0xe80] sm:$0xff]  ;;  %v1271_v33 = vpack.c.bf16 %v931_v52, %v927_v20  ;;  %v916_v47 = vld [vmem:[%s4389_s7 + $0xa28] sm:$0xff]  ;;  %v781_v15 = vld [vmem:[%s4389_s7 + $0x5f0] sm:$0xff] }
 0x44b   :  { %v1040_v14 = vld [vmem:[%s4389_s7 + $0xe08] sm:$0xff]  ;;  %v1043_v59 = vld [vmem:[%s4389_s7 + $0xe20] sm:$0xff]  ;;  %v770_v17 = vld [vmem:[%s4389_s7 + $0x598] sm:$0xff]  ;;  %v1197_v52 = vpack.c.bf16 %v781_v15, %v777_v60 }
 0x44c   :  { %v1044_v48 = vld [vmem:[%s4389_s7 + $0xe28] sm:$0xff]  ;;  %v774_v18 = vld [vmem:[%s4389_s7 + $0x5b8] sm:$0xff]  ;;  %v625_v56 = vld [vmem:[%s4389_s7 + $0x110] sm:$0xff] }
 0x44d   :  { %1482 = vmatpush2.bf16.msra.mxu1 %v1287_v34  ;;  %1523 = vmatpush2.bf16.msra.mxu0 %v1351_v35  ;;  %v1335_v34 = vpack.c.bf16 %v1059_v29, %v1055_v28  ;;  %v919_v35 = vld [vmem:[%s4389_s7 + $0xa40] sm:$0xff]  ;;  %v769_v28 = vld [vmem:[%s4389_s7 + $0x590] sm:$0xff]  ;;  %v1130_v29 = vpack.c.bf16 %v646_v16, %v642_v12  ;;  %v746_v6 = vld [vmem:[%s4389_s7 + $0x4d8] sm:$0xff] }
 0x44e   :  { %1483 = vmatprep.subr.bf16.mxu1 %v1284_v40  ;;  %1524 = vmatprep.subr.bf16.mxu0 %v1348_v41  ;;  %v1268_v40 = vpack.c.bf16 %v924_v25, %v920_v30  ;;  %v1332_v41 = vpack.c.bf16 %v1052_v32, %v1048_v31  ;;  %v1267_v51 = vpack.c.bf16 %v923_v38, %v919_v35  ;;  %v773_v25 = vld [vmem:[%s4389_s7 + $0x5b0] sm:$0xff]  ;;  %v634_v31 = vld [vmem:[%s4389_s7 + $0x158] sm:$0xff] }
 0x44f   :  { %v1194_v30 = vpack.c.bf16 %v774_v18, %v770_v17  ;;  %v638_v32 = vld [vmem:[%s4389_s7 + $0x178] sm:$0xff]  ;;  %v1193_v38 = vpack.c.bf16 %v773_v25, %v769_v28  ;;  %v629_v1 = vld [vmem:[%s4389_s7 + $0x130] sm:$0xff] }
 0x450   :  { %v750_v7 = vld [vmem:[%s4389_s7 + $0x4f8] sm:$0xff]  ;;  %v609_v18 = vld [vmem:[%s4389_s7 + $0x90] sm:$0xff] }
 0x451   :  { %1484 = vmatpush2.bf16.msra.mxu1 %v1283_v53  ;;  %1525 = vmatpush2.bf16.msra.mxu0 %v1347_v55  ;;  %v1331_v53 = vpack.c.bf16 %v1051_v42, %v1047_v39  ;;  %v1264_v55 = vpack.c.bf16 %v916_v47, %v912_v43  ;;  %v1126_v39 = vpack.c.bf16 %v638_v32, %v634_v31  ;;  %v761_v42 = vld [vmem:[%s4389_s7 + $0x550] sm:$0xff]  ;;  %v626_v43 = vld [vmem:[%s4389_s7 + $0x118] sm:$0xff] }
 0x452   :  { %1485 = vmatprep.subr.bf16.mxu1 %v1280_v2  ;;  %1526 = vmatprep.subr.bf16.mxu0 %v1344_v0  ;;  %v1328_v2 = vpack.c.bf16 %v1044_v48, %v1040_v14  ;;  %v1039_v0 = vld [vmem:[%s4389_s7 + $0xe00] sm:$0xff]  ;;  %v630_v47 = vld [vmem:[%s4389_s7 + $0x138] sm:$0xff] }
 0x453   :  { %v1327_v5 = vpack.c.bf16 %v1043_v59, %v1039_v0  ;;  %v754_v14 = vld [vmem:[%s4389_s7 + $0x518] sm:$0xff]  ;;  %v757_v59 = vld [vmem:[%s4389_s7 + $0x530] sm:$0xff] }
 0x454   :  { %v758_v48 = vld [vmem:[%s4389_s7 + $0x538] sm:$0xff] }
 0x455   :  { %1486 = vmatpush2.bf16.msra.mxu1 %v1279_v9  ;;  %1527 = vmatpush2.bf16.msra.mxu0 %v1343_v10  ;;  %v782_v9 = vld [vmem:[%s4389_s7 + $0x5f8] sm:$0xff]  ;;  %v581_v10 = vmax.f32 %v573_v4, 0.0  ;;  %v1186_v0 = vpack.c.bf16 %v758_v48, %v754_v14  ;;  %v593_v48 = vld [vmem:[%s4389_s7 + $0x10] sm:$0xff] }
 0x456   :  { %1487 = vmatprep.subr.bf16.mxu1 %v1276_v57  ;;  %1528 = vmatprep.subr.bf16.mxu0 %v1340_v11  ;;  %v1198_v62 = vpack.c.bf16 %v782_v9, %v778_v8  ;;  %v649_v57 = vld [vmem:[%s4389_s7 + $0x1d0] sm:$0xff]  ;;  %v622_v4 = vld [vmem:[%s4389_s7 + $0xf8] sm:$0xff]  ;;  %v1121_v8 = vpack.c.bf16 %v629_v1, %v625_v56 }
 0x457   :  { %v653_v11 = vld [vmem:[%s4389_s7 + $0x1f0] sm:$0xff]  ;;  %v3380_v20 = vpack.c.bf16 %v581_v10, %v581_v10  ;;  %v738_v60 = vld [vmem:[%s4389_s7 + $0x498] sm:$0xff] }
 0x458   :  { %v745_v10 = vld [vmem:[%s4389_s7 + $0x4d0] sm:$0xff]  ;;  %v742_v15 = vld [vmem:[%s4389_s7 + $0x4b8] sm:$0xff] }
 0x459   :  { %1488 = vmatpush2.bf16.msra.mxu1 %v1275_v61  ;;  %1529 = vmatpush2.bf16.msra.mxu0 %v1339_v22  ;;  %v1133_v61 = vpack.c.bf16 %v653_v11, %v649_v57  ;;  %v3378_v22 = vpack.c.bf16 %v579_v3, %v579_v3  ;;  %v621_v3 = vld [vmem:[%s4389_s7 + $0xf0] sm:$0xff]  ;;  %v610_v57 = vld [vmem:[%s4389_s7 + $0x98] sm:$0xff] }
 0x45a   :  { %1489 = vmatprep.subr.bf16.mxu1 %v1272_v19  ;;  %1530 = vmatprep.subr.bf16.mxu0 %v1336_v27  ;;  %v641_v19 = vld [vmem:[%s4389_s7 + $0x190] sm:$0xff]  ;;  %v614_v11 = vld [vmem:[%s4389_s7 + $0xb8] sm:$0xff] }
 0x45b   :  { %v645_v27 = vld [vmem:[%s4389_s7 + $0x1b0] sm:$0xff]  ;;  %v1114_v17 = vpack.c.bf16 %v614_v11, %v610_v57  ;;  %v602_v28 = vld [vmem:[%s4389_s7 + $0x58] sm:$0xff] }
 0x45c   :  { %v1129_v35 = vpack.c.bf16 %v645_v27, %v641_v19  ;;  %v1178_v19 = vpack.c.bf16 %v742_v15, %v738_v60  ;;  %v741_v27 = vld [vmem:[%s4389_s7 + $0x4b0] sm:$0xff]  ;;  %v734_v25 = vld [vmem:[%s4389_s7 + $0x478] sm:$0xff] }
 0x45d   :  { %1490 = vmatpush2.bf16.msra.mxu1 %v1271_v33  ;;  %1531 = vmatpush2.bf16.msra.mxu0 %v1335_v34  ;;  %v762_v33 = vld [vmem:[%s4389_s7 + $0x558] sm:$0xff]  ;;  %v725_v56 = vld [vmem:[%s4389_s7 + $0x430] sm:$0xff] }
 0x45e   :  { %1491 = vmatprep.subr.bf16.mxu1 %v1268_v40  ;;  %1532 = vmatprep.subr.bf16.mxu0 %v1332_v41  ;;  %v766_v34 = vld [vmem:[%s4389_s7 + $0x578] sm:$0xff]  ;;  %v633_v40 = vld [vmem:[%s4389_s7 + $0x150] sm:$0xff] }
 0x45f   :  { %v637_v41 = vld [vmem:[%s4389_s7 + $0x170] sm:$0xff]  ;;  %v714_v1 = vld [vmem:[%s4389_s7 + $0x3d8] sm:$0xff] }
 0x460   :  { %v705_v15 = vld [vmem:[%s4389_s7 + $0x390] sm:$0xff] }
 0x461   :  { %1492 = vmatpush2.bf16.msra.mxu1 %v1267_v51  ;;  %1533 = vmatpush2.bf16.msra.mxu0 %v1331_v53  ;;  %v1125_v51 = vpack.c.bf16 %v637_v41, %v633_v40  ;;  %v733_v40 = vld [vmem:[%s4389_s7 + $0x470] sm:$0xff]  ;;  %v594_v41 = vld [vmem:[%s4389_s7 + $0x18] sm:$0xff] }
 0x462   :  { %1493 = vmatprep.subr.bf16.mxu1 %v1264_v55  ;;  %1534 = vmatprep.subr.bf16.mxu0 %v1328_v2  ;;  %v1122_v55 = vpack.c.bf16 %v630_v47, %v626_v43  ;;  %v753_v2 = vld [vmem:[%s4389_s7 + $0x510] sm:$0xff] }
 0x463   :  { %v1185_v9 = vpack.c.bf16 %v757_v59, %v753_v2  ;;  %v718_v2 = vld [vmem:[%s4389_s7 + $0x3f8] sm:$0xff] }
 0x464   :  { %v846_v59 = vld [vmem:[%s4389_s7 + $0x7f8] sm:$0xff] }
 0x465   :  { %1494 = vmatpush2.bf16.msra.mxu1 %v1263_v63  ;;  %1535 = vmatpush2.bf16.msra.mxu0 %v1327_v5  ;;  %v1118_v63 = vpack.c.bf16 %v622_v4, %v618_v13  ;;  %v617_v5 = vld [vmem:[%s4389_s7 + $0xd0] sm:$0xff] }
 0x466   :  { %1545 = vmatprep.subr.bf16.mxu1 %v1134_v58  ;;  %1586 = vmatprep.subr.bf16.mxu0 %v1198_v62  ;;  %v1182_v58 = vpack.c.bf16 %v750_v7, %v746_v6  ;;  %v749_v62 = vld [vmem:[%s4389_s7 + $0x4f0] sm:$0xff]  ;;  %v1117_v12 = vpack.c.bf16 %v621_v3, %v617_v5  ;;  %v1166_v6 = vpack.c.bf16 %v718_v2, %v714_v1  ;;  %v706_v3 = vld [vmem:[%s4389_s7 + $0x398] sm:$0xff] }
 0x467   :  { %v1181_v16 = vpack.c.bf16 %v749_v62, %v745_v10  ;;  %v713_v7 = vld [vmem:[%s4389_s7 + $0x3d0] sm:$0xff]  ;;  %v710_v10 = vld [vmem:[%s4389_s7 + $0x3b8] sm:$0xff] }
 0x468   :  { %1496 = vmatmul.mubr.bf16.vlgmr.msra.gmra.mxu1 %v3378_v22  ;;  %1537 = vmatmul.mubr.bf16.vlgmr.msra.gmra.mxu0 %v3380_v20  ;;  %v845_v5 = vld [vmem:[%s4389_s7 + $0x7f0] sm:$0xff]  ;;  %v838_v62 = vld [vmem:[%s4389_s7 + $0x7b8] sm:$0xff]  ;;  %v1162_v60 = vpack.c.bf16 %v710_v10, %v706_v3 }
 0x469   :  { %1546 = vmatpush1.bf16.msra.mxu1 %v1133_v61  ;;  %1577 = vmatprep.mubr.bf16.mxu1 %v2972_v21  ;;  %v1190_v21 = vpack.c.bf16 %v766_v34, %v762_v33  ;;  %v613_v61 = vld [vmem:[%s4389_s7 + $0xb0] sm:$0xff] }
 0x46a   :  { %1587 = vmatpush1.bf16.msra.mxu0 %v1197_v52  ;;  %1618 = vmatprep.mubr.bf16.mxu0 %v2974_v23  ;;  %v765_v23 = vld [vmem:[%s4389_s7 + $0x570] sm:$0xff]  ;;  %v1113_v31 = vpack.c.bf16 %v613_v61, %v609_v18  ;;  %v698_v61 = vld [vmem:[%s4389_s7 + $0x358] sm:$0xff] }
 0x46b   :  { %1547 = vmatprep.subr.bf16.mxu1 %v1130_v29  ;;  %1588 = vmatprep.subr.bf16.mxu0 %v1194_v30  ;;  %v1189_v53 = vpack.c.bf16 %v765_v23, %v761_v42  ;;  %v737_v52 = vld [vmem:[%s4389_s7 + $0x490] sm:$0xff]  ;;  %v606_v29 = vld [vmem:[%s4389_s7 + $0x78] sm:$0xff] }
 0x46c   :  { %v730_v30 = vld [vmem:[%s4389_s7 + $0x458] sm:$0xff]  ;;  %v1177_v32 = vpack.c.bf16 %v741_v27, %v737_v52  ;;  %v1110_v33 = vpack.c.bf16 %v606_v29, %v602_v28  ;;  %v601_v34 = vld [vmem:[%s4389_s7 + $0x50] sm:$0xff] }
 0x46d   :  { %1548 = vmatpush1.bf16.msra.mxu1 %v1129_v35  ;;  %v605_v35 = vld [vmem:[%s4389_s7 + $0x70] sm:$0xff]  ;;  %v598_v42 = vld [vmem:[%s4389_s7 + $0x38] sm:$0xff] }
 0x46e   :  { %1589 = vmatpush1.bf16.msra.mxu0 %v1193_v38  ;;  %1549 = vmatprep.subr.bf16.mxu1 %v1126_v39  ;;  %v729_v38 = vld [vmem:[%s4389_s7 + $0x450] sm:$0xff]  ;;  %v1174_v39 = vpack.c.bf16 %v734_v25, %v730_v30  ;;  %v726_v23 = vld [vmem:[%s4389_s7 + $0x438] sm:$0xff]  ;;  %v1109_v43 = vpack.c.bf16 %v605_v35, %v601_v34  ;;  %v1106_v14 = vpack.c.bf16 %v598_v42, %v594_v41 }
 0x46f   :  { %1590 = vmatprep.subr.bf16.mxu0 %v1190_v21  ;;  %v722_v21 = vld [vmem:[%s4389_s7 + $0x418] sm:$0xff]  ;;  %v1173_v47 = vpack.c.bf16 %v733_v40, %v729_v38  ;;  %v837_v18 = vld [vmem:[%s4389_s7 + $0x7b0] sm:$0xff] }
 0x470   :  { %v702_v52 = vld [vmem:[%s4389_s7 + $0x378] sm:$0xff]  ;;  %v697_v25 = vld [vmem:[%s4389_s7 + $0x350] sm:$0xff] }
 0x471   :  { %1550 = vmatpush1.bf16.msra.mxu1 %v1125_v51  ;;  %v597_v51 = vld [vmem:[%s4389_s7 + $0x30] sm:$0xff]  ;;  %v830_v27 = vld [vmem:[%s4389_s7 + $0x778] sm:$0xff]  ;;  %v1158_v30 = vpack.c.bf16 %v702_v52, %v698_v61 }
 0x472   :  { %1591 = vmatpush1.bf16.msra.mxu0 %v1189_v53  ;;  %1551 = vmatprep.subr.bf16.mxu1 %v1122_v55  ;;  %v721_v53 = vld [vmem:[%s4389_s7 + $0x410] sm:$0xff]  ;;  %v1170_v55 = vpack.c.bf16 %v726_v23, %v722_v21  ;;  %v1105_v13 = vpack.c.bf16 %v597_v51, %v593_v48  ;;  %v690_v35 = vld [vmem:[%s4389_s7 + $0x318] sm:$0xff] }
 0x473   :  { %1592 = vmatprep.subr.bf16.mxu0 %v1186_v0  ;;  %v842_v0 = vld [vmem:[%s4389_s7 + $0x7d8] sm:$0xff]  ;;  %v1169_v4 = vpack.c.bf16 %v725_v56, %v721_v53  ;;  %v829_v34 = vld [vmem:[%s4389_s7 + $0x770] sm:$0xff] }
 0x474   :  { %v694_v38 = vld [vmem:[%s4389_s7 + $0x338] sm:$0xff]  ;;  %v689_v23 = vld [vmem:[%s4389_s7 + $0x310] sm:$0xff] }
 0x475   :  { %1552 = vmatpush1.bf16.msra.mxu1 %v1121_v8  ;;  %v717_v8 = vld [vmem:[%s4389_s7 + $0x3f0] sm:$0xff]  ;;  %v822_v40 = vld [vmem:[%s4389_s7 + $0x738] sm:$0xff]  ;;  %v1154_v21 = vpack.c.bf16 %v694_v38, %v690_v35 }
 0x476   :  { %1593 = vmatpush1.bf16.msra.mxu0 %v1185_v9  ;;  %1553 = vmatprep.subr.bf16.mxu1 %v1118_v63  ;;  %v841_v9 = vld [vmem:[%s4389_s7 + $0x7d0] sm:$0xff]  ;;  %v1230_v63 = vpack.c.bf16 %v846_v59, %v842_v0  ;;  %v1165_v57 = vpack.c.bf16 %v717_v8, %v713_v7  ;;  %v682_v51 = vld [vmem:[%s4389_s7 + $0x2d8] sm:$0xff] }
 0x477   :  { %1594 = vmatprep.subr.bf16.mxu0 %v1182_v58  ;;  %v834_v58 = vld [vmem:[%s4389_s7 + $0x798] sm:$0xff]  ;;  %v1229_v11 = vpack.c.bf16 %v845_v5, %v841_v9  ;;  %v821_v48 = vld [vmem:[%s4389_s7 + $0x730] sm:$0xff] }
 0x478   :  { %v686_v53 = vld [vmem:[%s4389_s7 + $0x2f8] sm:$0xff]  ;;  %v681_v59 = vld [vmem:[%s4389_s7 + $0x2d0] sm:$0xff] }
 0x479   :  { %1554 = vmatpush1.bf16.msra.mxu1 %v1117_v12  ;;  %v709_v12 = vld [vmem:[%s4389_s7 + $0x3b0] sm:$0xff]  ;;  %v814_v56 = vld [vmem:[%s4389_s7 + $0x6f8] sm:$0xff]  ;;  %v1150_v0 = vpack.c.bf16 %v686_v53, %v682_v51 }
 0x47a   :  { %1595 = vmatpush1.bf16.msra.mxu0 %v1181_v16  ;;  %1555 = vmatprep.subr.bf16.mxu1 %v1114_v17  ;;  %v833_v16 = vld [vmem:[%s4389_s7 + $0x790] sm:$0xff]  ;;  %v1226_v17 = vpack.c.bf16 %v838_v62, %v834_v58  ;;  %v1161_v28 = vpack.c.bf16 %v709_v12, %v705_v15  ;;  %v674_v8 = vld [vmem:[%s4389_s7 + $0x298] sm:$0xff] }
 0x47b   :  { %1596 = vmatprep.subr.bf16.mxu0 %v1178_v19  ;;  %v826_v19 = vld [vmem:[%s4389_s7 + $0x758] sm:$0xff]  ;;  %v1225_v29 = vpack.c.bf16 %v837_v18, %v833_v16  ;;  %v813_v7 = vld [vmem:[%s4389_s7 + $0x6f0] sm:$0xff] }
 0x47c   :  { %v678_v9 = vld [vmem:[%s4389_s7 + $0x2b8] sm:$0xff]  ;;  %v673_v62 = vld [vmem:[%s4389_s7 + $0x290] sm:$0xff] }
 0x47d   :  { %1556 = vmatpush1.bf16.msra.mxu1 %v1113_v31  ;;  %v701_v31 = vld [vmem:[%s4389_s7 + $0x370] sm:$0xff]  ;;  %v806_v5 = vld [vmem:[%s4389_s7 + $0x6b8] sm:$0xff]  ;;  %v1146_v58 = vpack.c.bf16 %v678_v9, %v674_v8 }
 0x47e   :  { %1597 = vmatpush1.bf16.msra.mxu0 %v1177_v32  ;;  %1557 = vmatprep.subr.bf16.mxu1 %v1110_v33  ;;  %v825_v32 = vld [vmem:[%s4389_s7 + $0x750] sm:$0xff]  ;;  %v1222_v33 = vpack.c.bf16 %v830_v27, %v826_v19  ;;  %v1157_v41 = vpack.c.bf16 %v701_v31, %v697_v25  ;;  %v666_v12 = vld [vmem:[%s4389_s7 + $0x258] sm:$0xff] }
 0x47f   :  { %1598 = vmatprep.subr.bf16.mxu0 %v1174_v39  ;;  %v818_v39 = vld [vmem:[%s4389_s7 + $0x718] sm:$0xff]  ;;  %v1221_v42 = vpack.c.bf16 %v829_v34, %v825_v32  ;;  %v805_v15 = vld [vmem:[%s4389_s7 + $0x6b0] sm:$0xff] }
 0x480   :  { %v670_v16 = vld [vmem:[%s4389_s7 + $0x278] sm:$0xff]  ;;  %v665_v27 = vld [vmem:[%s4389_s7 + $0x250] sm:$0xff] }
 0x481   :  { %1558 = vmatpush1.bf16.msra.mxu1 %v1109_v43  ;;  %v693_v43 = vld [vmem:[%s4389_s7 + $0x330] sm:$0xff]  ;;  %v798_v18 = vld [vmem:[%s4389_s7 + $0x678] sm:$0xff]  ;;  %v1142_v19 = vpack.c.bf16 %v670_v16, %v666_v12 }
 0x482   :  { %1599 = vmatpush1.bf16.msra.mxu0 %v1173_v47  ;;  %1559 = vmatprep.subr.bf16.mxu1 %v1106_v14  ;;  %v817_v47 = vld [vmem:[%s4389_s7 + $0x710] sm:$0xff]  ;;  %v1218_v14 = vpack.c.bf16 %v822_v40, %v818_v39  ;;  %v1153_v1 = vpack.c.bf16 %v693_v43, %v689_v23  ;;  %v658_v31 = vld [vmem:[%s4389_s7 + $0x218] sm:$0xff] }
 0x483   :  { %1600 = vmatprep.subr.bf16.mxu0 %v1170_v55  ;;  %v810_v55 = vld [vmem:[%s4389_s7 + $0x6d8] sm:$0xff]  ;;  %v1217_v2 = vpack.c.bf16 %v821_v48, %v817_v47  ;;  %v797_v25 = vld [vmem:[%s4389_s7 + $0x670] sm:$0xff] }
 0x484   :  { %v662_v32 = vld [vmem:[%s4389_s7 + $0x238] sm:$0xff]  ;;  %v657_v40 = vld [vmem:[%s4389_s7 + $0x210] sm:$0xff] }
 0x485   :  { %1560 = vmatpush1.bf16.msra.mxu1 %v1105_v13  ;;  %v685_v13 = vld [vmem:[%s4389_s7 + $0x2f0] sm:$0xff]  ;;  %v790_v34 = vld [vmem:[%s4389_s7 + $0x638] sm:$0xff]  ;;  %v1138_v39 = vpack.c.bf16 %v662_v32, %v658_v31 }
 0x486   :  { %1601 = vmatpush1.bf16.msra.mxu0 %v1169_v4  ;;  %1561 = vmatprep.subr.bf16.mxu1 %v1166_v6  ;;  %v809_v4 = vld [vmem:[%s4389_s7 + $0x6d0] sm:$0xff]  ;;  %v1214_v6 = vpack.c.bf16 %v814_v56, %v810_v55  ;;  %v1149_v3 = vpack.c.bf16 %v685_v13, %v681_v59  ;;  %v906_v43 = vld [vmem:[%s4389_s7 + $0x9d8] sm:$0xff] }
 0x487   :  { %1602 = vmatprep.subr.bf16.mxu0 %v1230_v63  ;;  %v802_v63 = vld [vmem:[%s4389_s7 + $0x698] sm:$0xff]  ;;  %v1213_v10 = vpack.c.bf16 %v813_v7, %v809_v4  ;;  %v789_v23 = vld [vmem:[%s4389_s7 + $0x630] sm:$0xff] }
 0x488   :  { %v910_v47 = vld [vmem:[%s4389_s7 + $0x9f8] sm:$0xff]  ;;  %v905_v56 = vld [vmem:[%s4389_s7 + $0x9d0] sm:$0xff] }
 0x489   :  { %1562 = vmatpush2.bf16.msra.mxu1 %v1165_v57  ;;  %v677_v57 = vld [vmem:[%s4389_s7 + $0x2b0] sm:$0xff]  ;;  %v1038_v48 = vld [vmem:[%s4389_s7 + $0xdf8] sm:$0xff]  ;;  %v1262_v55 = vpack.c.bf16 %v910_v47, %v906_v43 }
 0x48a   :  { %1603 = vmatpush2.bf16.msra.mxu0 %v1229_v11  ;;  %1563 = vmatprep.subr.bf16.mxu1 %v1162_v60  ;;  %v801_v11 = vld [vmem:[%s4389_s7 + $0x690] sm:$0xff]  ;;  %v1210_v60 = vpack.c.bf16 %v806_v5, %v802_v63  ;;  %v1145_v61 = vpack.c.bf16 %v677_v57, %v673_v62  ;;  %v898_v13 = vld [vmem:[%s4389_s7 + $0x998] sm:$0xff] }
 0x48b   :  { %1604 = vmatprep.subr.bf16.mxu0 %v1226_v17  ;;  %v794_v17 = vld [vmem:[%s4389_s7 + $0x658] sm:$0xff]  ;;  %v1209_v52 = vpack.c.bf16 %v805_v15, %v801_v11  ;;  %v1037_v59 = vld [vmem:[%s4389_s7 + $0xdf0] sm:$0xff] }
 0x48c   :  { %v902_v4 = vld [vmem:[%s4389_s7 + $0x9b8] sm:$0xff]  ;;  %v897_v63 = vld [vmem:[%s4389_s7 + $0x990] sm:$0xff] }
 0x48d   :  { %1564 = vmatpush2.bf16.msra.mxu1 %v1161_v28  ;;  %v669_v28 = vld [vmem:[%s4389_s7 + $0x270] sm:$0xff]  ;;  %v1026_v7 = vld [vmem:[%s4389_s7 + $0xd98] sm:$0xff] }
 0x48e   :  { %1605 = vmatpush2.bf16.msra.mxu0 %v1225_v29  ;;  %1565 = vmatprep.subr.bf16.mxu1 %v1158_v30  ;;  %v793_v29 = vld [vmem:[%s4389_s7 + $0x650] sm:$0xff]  ;;  %v1206_v30 = vpack.c.bf16 %v798_v18, %v794_v17  ;;  %v1141_v35 = vpack.c.bf16 %v669_v28, %v665_v27  ;;  %v1030_v8 = vld [vmem:[%s4389_s7 + $0xdb8] sm:$0xff] }
 0x48f   :  { %1606 = vmatprep.subr.bf16.mxu0 %v1222_v33  ;;  %v786_v33 = vld [vmem:[%s4389_s7 + $0x618] sm:$0xff]  ;;  %v1205_v38 = vpack.c.bf16 %v797_v25, %v793_v29  ;;  %v901_v5 = vld [vmem:[%s4389_s7 + $0x9b0] sm:$0xff]  ;;  %v1322_v11 = vpack.c.bf16 %v1030_v8, %v1026_v7 }
 0x490   :  { %v890_v62 = vld [vmem:[%s4389_s7 + $0x958] sm:$0xff]  ;;  %v1257_v12 = vpack.c.bf16 %v901_v5, %v897_v63  ;;  %v893_v18 = vld [vmem:[%s4389_s7 + $0x970] sm:$0xff] }
 0x491   :  { %1566 = vmatpush2.bf16.msra.mxu1 %v1157_v41  ;;  %v661_v41 = vld [vmem:[%s4389_s7 + $0x230] sm:$0xff]  ;;  %v894_v57 = vld [vmem:[%s4389_s7 + $0x978] sm:$0xff] }
 0x492   :  { %1607 = vmatpush2.bf16.msra.mxu0 %v1221_v42  ;;  %1567 = vmatprep.subr.bf16.mxu1 %v1154_v21  ;;  %v785_v42 = vld [vmem:[%s4389_s7 + $0x610] sm:$0xff]  ;;  %v1202_v21 = vpack.c.bf16 %v790_v34, %v786_v33  ;;  %v1137_v51 = vpack.c.bf16 %v661_v41, %v657_v40  ;;  %v1022_v15 = vld [vmem:[%s4389_s7 + $0xd78] sm:$0xff]  ;;  %v1254_v17 = vpack.c.bf16 %v894_v57, %v890_v62 }
 0x493   :  { %1608 = vmatprep.subr.bf16.mxu0 %v1218_v14  ;;  %v1034_v14 = vld [vmem:[%s4389_s7 + $0xdd8] sm:$0xff]  ;;  %v1201_v53 = vpack.c.bf16 %v789_v23, %v785_v42  ;;  %v881_v25 = vld [vmem:[%s4389_s7 + $0x910] sm:$0xff] }
 0x494   :  { %v1010_v27 = vld [vmem:[%s4389_s7 + $0xd18] sm:$0xff]  ;;  %v885_v31 = vld [vmem:[%s4389_s7 + $0x930] sm:$0xff] }
 0x495   :  { %1568 = vmatpush2.bf16.msra.mxu1 %v1153_v1  ;;  %v909_v1 = vld [vmem:[%s4389_s7 + $0x9f0] sm:$0xff]  ;;  %v1006_v40 = vld [vmem:[%s4389_s7 + $0xcf8] sm:$0xff]  ;;  %v1249_v41 = vpack.c.bf16 %v885_v31, %v881_v25 }
 0x496   :  { %1609 = vmatpush2.bf16.msra.mxu0 %v1217_v2  ;;  %1569 = vmatprep.subr.bf16.mxu1 %v1150_v0  ;;  %v1326_v2 = vpack.c.bf16 %v1038_v48, %v1034_v14  ;;  %v1033_v0 = vld [vmem:[%s4389_s7 + $0xdd0] sm:$0xff]  ;;  %v858_v8 = vld [vmem:[%s4389_s7 + $0x858] sm:$0xff] }
 0x497   :  { %1610 = vmatprep.subr.bf16.mxu0 %v1214_v6  ;;  %v1261_v6 = vpack.c.bf16 %v909_v1, %v905_v56  ;;  %v1325_v9 = vpack.c.bf16 %v1037_v59, %v1033_v0  ;;  %v1009_v32 = vld [vmem:[%s4389_s7 + $0xd10] sm:$0xff]  ;;  %v998_v56 = vld [vmem:[%s4389_s7 + $0xcb8] sm:$0xff] }
 0x498   :  { %v1013_v34 = vld [vmem:[%s4389_s7 + $0xd30] sm:$0xff]  ;;  %v986_v63 = vld [vmem:[%s4389_s7 + $0xc58] sm:$0xff] }
 0x499   :  { %1570 = vmatpush2.bf16.msra.mxu1 %v1149_v3  ;;  %v1025_v3 = vld [vmem:[%s4389_s7 + $0xd90] sm:$0xff]  ;;  %v1313_v42 = vpack.c.bf16 %v1013_v34, %v1009_v32  ;;  %v990_v5 = vld [vmem:[%s4389_s7 + $0xc78] sm:$0xff] }
 0x49a   :  { %1611 = vmatpush2.bf16.msra.mxu0 %v1213_v10  ;;  %1571 = vmatprep.subr.bf16.mxu1 %v1146_v58  ;;  %v1258_v10 = vpack.c.bf16 %v902_v4, %v898_v13  ;;  %v1029_v58 = vld [vmem:[%s4389_s7 + $0xdb0] sm:$0xff]  ;;  %v1102_v25 = vld [vmem:[%s4389_s7 + $0xff8] sm:$0xff] }
 0x49b   :  { %1612 = vmatprep.subr.bf16.mxu0 %v1210_v60  ;;  %v1018_v60 = vld [vmem:[%s4389_s7 + $0xd58] sm:$0xff]  ;;  %v1321_v16 = vpack.c.bf16 %v1029_v58, %v1025_v3  ;;  %v873_v23 = vld [vmem:[%s4389_s7 + $0x8d0] sm:$0xff] }
 0x49c   :  { %v877_v43 = vld [vmem:[%s4389_s7 + $0x8f0] sm:$0xff] }
 0x49d   :  { %1572 = vmatpush2.bf16.msra.mxu1 %v1145_v61  ;;  %v1017_v61 = vld [vmem:[%s4389_s7 + $0xd50] sm:$0xff]  ;;  %v1245_v1 = vpack.c.bf16 %v877_v43, %v873_v23  ;;  %v1094_v23 = vld [vmem:[%s4389_s7 + $0xfb8] sm:$0xff] }
 0x49e   :  { %1613 = vmatpush2.bf16.msra.mxu0 %v1209_v52  ;;  %1573 = vmatprep.subr.bf16.mxu1 %v1142_v19  ;;  %v882_v52 = vld [vmem:[%s4389_s7 + $0x918] sm:$0xff]  ;;  %v1001_v47 = vld [vmem:[%s4389_s7 + $0xcd0] sm:$0xff] }
 0x49f   :  { %1614 = vmatprep.subr.bf16.mxu0 %v1206_v30  ;;  %v886_v19 = vld [vmem:[%s4389_s7 + $0x938] sm:$0xff]  ;;  %v1005_v48 = vld [vmem:[%s4389_s7 + $0xcf0] sm:$0xff] }
 0x4a0   :  { %v1250_v30 = vpack.c.bf16 %v886_v19, %v882_v52  ;;  %v865_v59 = vld [vmem:[%s4389_s7 + $0x890] sm:$0xff] }
 0x4a1   :  { %1574 = vmatpush2.bf16.msra.mxu1 %v1141_v35  ;;  %v874_v35 = vld [vmem:[%s4389_s7 + $0x8d8] sm:$0xff]  ;;  %v869_v13 = vld [vmem:[%s4389_s7 + $0x8b0] sm:$0xff] }
 0x4a2   :  { %1615 = vmatpush2.bf16.msra.mxu0 %v1205_v38  ;;  %1575 = vmatprep.subr.bf16.mxu1 %v1138_v39  ;;  %v878_v38 = vld [vmem:[%s4389_s7 + $0x8f8] sm:$0xff]  ;;  %v993_v4 = vld [vmem:[%s4389_s7 + $0xc90] sm:$0xff]  ;;  %v1241_v3 = vpack.c.bf16 %v869_v13, %v865_v59 }
 0x4a3   :  { %1616 = vmatprep.subr.bf16.mxu0 %v1202_v21  ;;  %v1002_v39 = vld [vmem:[%s4389_s7 + $0xcd8] sm:$0xff]  ;;  %v1246_v21 = vpack.c.bf16 %v878_v38, %v874_v35  ;;  %v997_v7 = vld [vmem:[%s4389_s7 + $0xcb0] sm:$0xff] }
 0x4a4   :  { %v1310_v14 = vpack.c.bf16 %v1006_v40, %v1002_v39  ;;  %v857_v62 = vld [vmem:[%s4389_s7 + $0x850] sm:$0xff]  ;;  %v1086_v59 = vld [vmem:[%s4389_s7 + $0xf78] sm:$0xff] }
 0x4a5   :  { %1576 = vmatpush2.bf16.msra.mxu1 %v1137_v51  ;;  %v866_v51 = vld [vmem:[%s4389_s7 + $0x898] sm:$0xff]  ;;  %v861_v57 = vld [vmem:[%s4389_s7 + $0x870] sm:$0xff] }
 0x4a6   :  { %1617 = vmatpush2.bf16.msra.mxu0 %v1201_v53  ;;  %1627 = vmatprep.subr.bf16.mxu1 %v1262_v55  ;;  %v870_v53 = vld [vmem:[%s4389_s7 + $0x8b8] sm:$0xff]  ;;  %v853_v52 = vld [vmem:[%s4389_s7 + $0x830] sm:$0xff] }
 0x4a7   :  { %1668 = vmatprep.subr.bf16.mxu0 %v1326_v2  ;;  %v994_v55 = vld [vmem:[%s4389_s7 + $0xc98] sm:$0xff]  ;;  %v1309_v2 = vpack.c.bf16 %v1005_v48, %v1001_v47  ;;  %v1242_v0 = vpack.c.bf16 %v870_v53, %v866_v51  ;;  %v977_v19 = vld [vmem:[%s4389_s7 + $0xc10] sm:$0xff] }
 0x4a8   :  { %1578 = vmatmul.mubr.bf16.vlgmr.msra.gmra.mxu1 %v2976_v24  ;;  %v889_v24 = vld [vmem:[%s4389_s7 + $0x950] sm:$0xff] }
 0x4a9   :  { %1619 = vmatmul.mubr.bf16.vlgmr.msra.gmra.mxu0 %v2978_v26  ;;  %1628 = vmatpush1.bf16.msra.mxu1 %v1261_v6  ;;  %v1318_v26 = vpack.c.bf16 %v1022_v15, %v1018_v60  ;;  %v1253_v28 = vpack.c.bf16 %v893_v18, %v889_v24  ;;  %v1306_v6 = vpack.c.bf16 %v998_v56, %v994_v55  ;;  %v989_v15 = vld [vmem:[%s4389_s7 + $0xc70] sm:$0xff]  ;;  %v982_v24 = vld [vmem:[%s4389_s7 + $0xc38] sm:$0xff] }
 0x4aa   :  { %1659 = vmatprep.mubr.bf16.mxu1 %v3008_v36  ;;  %1669 = vmatpush1.bf16.msra.mxu0 %v1325_v9  ;;  %v1021_v36 = vld [vmem:[%s4389_s7 + $0xd70] sm:$0xff]  ;;  %v862_v9 = vld [vmem:[%s4389_s7 + $0x878] sm:$0xff]  ;;  %v1302_v60 = vpack.c.bf16 %v990_v5, %v986_v63  ;;  %v1237_v18 = vpack.c.bf16 %v861_v57, %v857_v62 }
 0x4ab   :  { %1700 = vmatprep.mubr.bf16.mxu0 %v3010_v37  ;;  %1629 = vmatprep.subr.bf16.mxu1 %v1258_v10  ;;  %v1014_v37 = vld [vmem:[%s4389_s7 + $0xd38] sm:$0xff]  ;;  %v1317_v29 = vpack.c.bf16 %v1021_v36, %v1017_v61  ;;  %v1305_v10 = vpack.c.bf16 %v997_v7, %v993_v4  ;;  %v1238_v58 = vpack.c.bf16 %v862_v9, %v858_v8  ;;  %v849_v36 = vld [vmem:[%s4389_s7 + $0x810] sm:$0xff] }
 0x4ac   :  { %1670 = vmatprep.subr.bf16.mxu0 %v1322_v11  ;;  %v1314_v33 = vpack.c.bf16 %v1014_v37, %v1010_v27  ;;  %v985_v11 = vld [vmem:[%s4389_s7 + $0xc50] sm:$0xff]  ;;  %v1233_v31 = vpack.c.bf16 %v853_v52, %v849_v36  ;;  %v1078_v62 = vld [vmem:[%s4389_s7 + $0xf38] sm:$0xff] }
 0x4ad   :  { %1630 = vmatpush1.bf16.msra.mxu1 %v1257_v12  ;;  %v850_v12 = vld [vmem:[%s4389_s7 + $0x818] sm:$0xff]  ;;  %v1301_v61 = vpack.c.bf16 %v989_v15, %v985_v11  ;;  %v981_v37 = vld [vmem:[%s4389_s7 + $0xc30] sm:$0xff] }
 0x4ae   :  { %1671 = vmatpush1.bf16.msra.mxu0 %v1321_v16  ;;  %1631 = vmatprep.subr.bf16.mxu1 %v1254_v17  ;;  %v854_v16 = vld [vmem:[%s4389_s7 + $0x838] sm:$0xff]  ;;  %v1297_v32 = vpack.c.bf16 %v981_v37, %v977_v19  ;;  %v969_v34 = vld [vmem:[%s4389_s7 + $0xbd0] sm:$0xff] }
 0x4af   :  { %1672 = vmatprep.subr.bf16.mxu0 %v1318_v26  ;;  %v978_v17 = vld [vmem:[%s4389_s7 + $0xc18] sm:$0xff]  ;;  %v1234_v26 = vpack.c.bf16 %v854_v16, %v850_v12  ;;  %v973_v35 = vld [vmem:[%s4389_s7 + $0xbf0] sm:$0xff] }
 0x4b0   :  { %v1298_v27 = vpack.c.bf16 %v982_v24, %v978_v17  ;;  %v1097_v38 = vld [vmem:[%s4389_s7 + $0xfd0] sm:$0xff]  ;;  %v1293_v43 = vpack.c.bf16 %v973_v35, %v969_v34  ;;  %v1070_v36 = vld [vmem:[%s4389_s7 + $0xef8] sm:$0xff] }
 0x4b1   :  { %1632 = vmatpush1.bf16.msra.mxu1 %v1253_v28  ;;  %v970_v28 = vld [vmem:[%s4389_s7 + $0xbd8] sm:$0xff]  ;;  %v1101_v40 = vld [vmem:[%s4389_s7 + $0xff0] sm:$0xff] }
 0x4b2   :  { %1673 = vmatpush1.bf16.msra.mxu0 %v1317_v29  ;;  %1633 = vmatprep.subr.bf16.mxu1 %v1250_v30  ;;  %v974_v29 = vld [vmem:[%s4389_s7 + $0xbf8] sm:$0xff]  ;;  %v1357_v47 = vpack.c.bf16 %v1101_v40, %v1097_v38  ;;  %v961_v48 = vld [vmem:[%s4389_s7 + $0xb90] sm:$0xff] }
 0x4b3   :  { %1674 = vmatprep.subr.bf16.mxu0 %v1314_v33  ;;  %v1098_v30 = vld [vmem:[%s4389_s7 + $0xfd8] sm:$0xff]  ;;  %v1294_v33 = vpack.c.bf16 %v974_v29, %v970_v28  ;;  %v965_v51 = vld [vmem:[%s4389_s7 + $0xbb0] sm:$0xff] }
 0x4b4   :  { %v1358_v39 = vpack.c.bf16 %v1102_v25, %v1098_v30  ;;  %v1089_v53 = vld [vmem:[%s4389_s7 + $0xf90] sm:$0xff]  ;;  %v1289_v13 = vpack.c.bf16 %v965_v51, %v961_v48  ;;  %v1062_v34 = vld [vmem:[%s4389_s7 + $0xeb8] sm:$0xff] }
 0x4b5   :  { %1634 = vmatpush1.bf16.msra.mxu1 %v1249_v41  ;;  %v962_v41 = vld [vmem:[%s4389_s7 + $0xb98] sm:$0xff]  ;;  %v1093_v56 = vld [vmem:[%s4389_s7 + $0xfb0] sm:$0xff] }
 0x4b6   :  { %1675 = vmatpush1.bf16.msra.mxu0 %v1313_v42  ;;  %1635 = vmatprep.subr.bf16.mxu1 %v1246_v21  ;;  %v966_v42 = vld [vmem:[%s4389_s7 + $0xbb8] sm:$0xff]  ;;  %v1353_v4 = vpack.c.bf16 %v1093_v56, %v1089_v53  ;;  %v953_v7 = vld [vmem:[%s4389_s7 + $0xb50] sm:$0xff] }
 0x4b7   :  { %1676 = vmatprep.subr.bf16.mxu0 %v1310_v14  ;;  %v1090_v21 = vld [vmem:[%s4389_s7 + $0xf98] sm:$0xff]  ;;  %v1290_v14 = vpack.c.bf16 %v966_v42, %v962_v41  ;;  %v957_v8 = vld [vmem:[%s4389_s7 + $0xb70] sm:$0xff] }
 0x4b8   :  { %v1354_v55 = vpack.c.bf16 %v1094_v23, %v1090_v21  ;;  %v1081_v9 = vld [vmem:[%s4389_s7 + $0xf50] sm:$0xff]  ;;  %v1285_v57 = vpack.c.bf16 %v957_v8, %v953_v7  ;;  %v1054_v48 = vld [vmem:[%s4389_s7 + $0xe78] sm:$0xff] }
 0x4b9   :  { %1636 = vmatpush1.bf16.msra.mxu1 %v1245_v1  ;;  %v954_v1 = vld [vmem:[%s4389_s7 + $0xb58] sm:$0xff]  ;;  %v1085_v5 = vld [vmem:[%s4389_s7 + $0xf70] sm:$0xff] }
 0x4ba   :  { %1677 = vmatpush1.bf16.msra.mxu0 %v1309_v2  ;;  %1637 = vmatprep.subr.bf16.mxu1 %v1242_v0  ;;  %v958_v2 = vld [vmem:[%s4389_s7 + $0xb78] sm:$0xff]  ;;  %v1349_v11 = vpack.c.bf16 %v1085_v5, %v1081_v9  ;;  %v945_v15 = vld [vmem:[%s4389_s7 + $0xb10] sm:$0xff] }
 0x4bb   :  { %1678 = vmatprep.subr.bf16.mxu0 %v1306_v6  ;;  %v1082_v0 = vld [vmem:[%s4389_s7 + $0xf58] sm:$0xff]  ;;  %v1286_v6 = vpack.c.bf16 %v958_v2, %v954_v1  ;;  %v949_v12 = vld [vmem:[%s4389_s7 + $0xb30] sm:$0xff] }
 0x4bc   :  { %v1350_v63 = vpack.c.bf16 %v1086_v59, %v1082_v0  ;;  %v1073_v16 = vld [vmem:[%s4389_s7 + $0xf10] sm:$0xff]  ;;  %v1281_v52 = vpack.c.bf16 %v949_v12, %v945_v15  ;;  %v1046_v7 = vld [vmem:[%s4389_s7 + $0xe38] sm:$0xff] }
 0x4bd   :  { %1638 = vmatpush1.bf16.msra.mxu1 %v1241_v3  ;;  %v946_v3 = vld [vmem:[%s4389_s7 + $0xb18] sm:$0xff]  ;;  %v1077_v24 = vld [vmem:[%s4389_s7 + $0xf30] sm:$0xff] }
 0x4be   :  { %1679 = vmatpush1.bf16.msra.mxu0 %v1305_v10  ;;  %1639 = vmatprep.subr.bf16.mxu1 %v1238_v58  ;;  %v950_v10 = vld [vmem:[%s4389_s7 + $0xb38] sm:$0xff]  ;;  %v1345_v19 = vpack.c.bf16 %v1077_v24, %v1073_v16  ;;  %v937_v37 = vld [vmem:[%s4389_s7 + $0xad0] sm:$0xff] }
 0x4bf   :  { %1680 = vmatprep.subr.bf16.mxu0 %v1302_v60  ;;  %v1074_v58 = vld [vmem:[%s4389_s7 + $0xf18] sm:$0xff]  ;;  %v1282_v60 = vpack.c.bf16 %v950_v10, %v946_v3  ;;  %v941_v28 = vld [vmem:[%s4389_s7 + $0xaf0] sm:$0xff] }
 0x4c0   :  { %v1346_v17 = vpack.c.bf16 %v1078_v62, %v1074_v58  ;;  %v1065_v29 = vld [vmem:[%s4389_s7 + $0xed0] sm:$0xff]  ;;  %v1277_v35 = vpack.c.bf16 %v941_v28, %v937_v37 }
 0x4c1   :  { %1640 = vmatpush1.bf16.msra.mxu1 %v1237_v18  ;;  %v938_v18 = vld [vmem:[%s4389_s7 + $0xad8] sm:$0xff]  ;;  %v1069_v25 = vld [vmem:[%s4389_s7 + $0xef0] sm:$0xff] }
 0x4c2   :  { %1681 = vmatpush1.bf16.msra.mxu0 %v1301_v61  ;;  %1641 = vmatprep.subr.bf16.mxu1 %v1234_v26  ;;  %v942_v61 = vld [vmem:[%s4389_s7 + $0xaf8] sm:$0xff]  ;;  %v1341_v38 = vpack.c.bf16 %v1069_v25, %v1065_v29  ;;  %v929_v40 = vld [vmem:[%s4389_s7 + $0xa90] sm:$0xff] }
 0x4c3   :  { %1682 = vmatprep.subr.bf16.mxu0 %v1298_v27  ;;  %v1066_v26 = vld [vmem:[%s4389_s7 + $0xed8] sm:$0xff]  ;;  %v1278_v27 = vpack.c.bf16 %v942_v61, %v938_v18  ;;  %v933_v41 = vld [vmem:[%s4389_s7 + $0xab0] sm:$0xff] }
 0x4c4   :  { %v1342_v30 = vpack.c.bf16 %v1070_v36, %v1066_v26  ;;  %v1057_v42 = vld [vmem:[%s4389_s7 + $0xe90] sm:$0xff]  ;;  %v1273_v51 = vpack.c.bf16 %v933_v41, %v929_v40 }
 0x4c5   :  { %1642 = vmatpush1.bf16.msra.mxu1 %v1233_v31  ;;  %v930_v31 = vld [vmem:[%s4389_s7 + $0xa98] sm:$0xff]  ;;  %v1061_v23 = vld [vmem:[%s4389_s7 + $0xeb0] sm:$0xff] }
 0x4c6   :  { %1683 = vmatpush1.bf16.msra.mxu0 %v1297_v32  ;;  %1643 = vmatprep.subr.bf16.mxu1 %v1294_v33  ;;  %v934_v32 = vld [vmem:[%s4389_s7 + $0xab8] sm:$0xff]  ;;  %v1337_v53 = vpack.c.bf16 %v1061_v23, %v1057_v42  ;;  %v921_v56 = vld [vmem:[%s4389_s7 + $0xa50] sm:$0xff] }
 0x4c7   :  { %1684 = vmatprep.subr.bf16.mxu0 %v1358_v39  ;;  %v1058_v33 = vld [vmem:[%s4389_s7 + $0xe98] sm:$0xff]  ;;  %v1274_v39 = vpack.c.bf16 %v934_v32, %v930_v31  ;;  %v925_v1 = vld [vmem:[%s4389_s7 + $0xa70] sm:$0xff] }
 0x4c8   :  { %v1338_v21 = vpack.c.bf16 %v1062_v34, %v1058_v33  ;;  %v1049_v2 = vld [vmem:[%s4389_s7 + $0xe50] sm:$0xff]  ;;  %v1269_v8 = vpack.c.bf16 %v925_v1, %v921_v56 }
 0x4c9   :  { %1644 = vmatpush2.bf16.msra.mxu1 %v1293_v43  ;;  %v922_v43 = vld [vmem:[%s4389_s7 + $0xa58] sm:$0xff]  ;;  %v1053_v59 = vld [vmem:[%s4389_s7 + $0xe70] sm:$0xff] }
 0x4ca   :  { %1685 = vmatpush2.bf16.msra.mxu0 %v1357_v47  ;;  %1645 = vmatprep.subr.bf16.mxu1 %v1290_v14  ;;  %v926_v47 = vld [vmem:[%s4389_s7 + $0xa78] sm:$0xff]  ;;  %v1333_v9 = vpack.c.bf16 %v1053_v59, %v1049_v2  ;;  %v913_v5 = vld [vmem:[%s4389_s7 + $0xa10] sm:$0xff] }
 0x4cb   :  { %1686 = vmatprep.subr.bf16.mxu0 %v1354_v55  ;;  %v1050_v14 = vld [vmem:[%s4389_s7 + $0xe58] sm:$0xff]  ;;  %v1270_v55 = vpack.c.bf16 %v926_v47, %v922_v43  ;;  %v917_v3 = vld [vmem:[%s4389_s7 + $0xa30] sm:$0xff] }
 0x4cc   :  { %v1334_v0 = vpack.c.bf16 %v1054_v48, %v1050_v14  ;;  %v1041_v58 = vld [vmem:[%s4389_s7 + $0xe10] sm:$0xff] }
 0x4cd   :  { %1646 = vmatpush2.bf16.msra.mxu1 %v1289_v13  ;;  %v914_v13 = vld [vmem:[%s4389_s7 + $0xa18] sm:$0xff]  ;;  %v1045_v62 = vld [vmem:[%s4389_s7 + $0xe30] sm:$0xff] }
 0x4ce   :  { %1687 = vmatpush2.bf16.msra.mxu0 %v1353_v4  ;;  %1647 = vmatprep.subr.bf16.mxu1 %v1286_v6  ;;  %v918_v4 = vld [vmem:[%s4389_s7 + $0xa38] sm:$0xff] }
 0x4cf   :  { %1688 = vmatprep.subr.bf16.mxu0 %v1350_v63  ;;  %v1042_v6 = vld [vmem:[%s4389_s7 + $0xe18] sm:$0xff]  ;;  %v1266_v63 = vpack.c.bf16 %v918_v4, %v914_v13 }
 0x4d0   :  { %v1330_v10 = vpack.c.bf16 %v1046_v7, %v1042_v6 }
 0x4d1   :  { %1648 = vmatpush2.bf16.msra.mxu1 %v1285_v57  ;;  %v1265_v57 = vpack.c.bf16 %v917_v3, %v913_v5 }
 0x4d2   :  { %1689 = vmatpush2.bf16.msra.mxu0 %v1349_v11  ;;  %1649 = vmatprep.subr.bf16.mxu1 %v1282_v60  ;;  %v1329_v11 = vpack.c.bf16 %v1045_v62, %v1041_v58  ;;  %v1359_v60 = vld [vmem:[%s4390_s8] sm:$0xf] }
 0x4d3   :  { %1690 = vmatprep.subr.bf16.mxu0 %v1346_v17  ;;  %v1364_v15 = vrot.slane %v1359_v60, %v310_v45  ;;  %v1368_v12 = vrot.slane %v1359_v60, %v314_v46  ;;  %v1372_v47 = vrot.slane %v1359_v60, %v318_v49  ;;  %v1376_v14 = vrot.slane %v1359_v60, %v322_v54  ;;  %v1782_v60 = vld [vmem:[%s4392_s9 + $0xf0] sm:$0xff] }
 0x4d5   :  { %1650 = vmatpush2.bf16.msra.mxu1 %v1281_v52 }
 0x4d6   :  { %1691 = vmatpush2.bf16.msra.mxu0 %v1345_v19  ;;  %1651 = vmatprep.subr.bf16.mxu1 %v1278_v27 }
 0x4d7   :  { %1692 = vmatprep.subr.bf16.mxu0 %v1342_v30 }
 0x4d9   :  { %1652 = vmatpush2.bf16.msra.mxu1 %v1277_v35 }
 0x4da   :  { %1693 = vmatpush2.bf16.msra.mxu0 %v1341_v38  ;;  %1653 = vmatprep.subr.bf16.mxu1 %v1274_v39 }
 0x4db   :  { %1694 = vmatprep.subr.bf16.mxu0 %v1338_v21 }
 0x4dd   :  { %1654 = vmatpush2.bf16.msra.mxu1 %v1273_v51 }
 0x4de   :  { %1695 = vmatpush2.bf16.msra.mxu0 %v1337_v53  ;;  %1655 = vmatprep.subr.bf16.mxu1 %v1270_v55 }
 0x4df   :  { %1696 = vmatprep.subr.bf16.mxu0 %v1334_v0 }
 0x4e1   :  { %1656 = vmatpush2.bf16.msra.mxu1 %v1269_v8 }
 0x4e2   :  { %1697 = vmatpush2.bf16.msra.mxu0 %v1333_v9  ;;  %1657 = vmatprep.subr.bf16.mxu1 %v1266_v63  ;;  %v1947_v63 = vld [vmem:[%s4391_s4] ss:$0 sm:$0xff] }
 0x4e3   :  { %1698 = vmatprep.subr.bf16.mxu0 %v1330_v10 }
 0x4e5   :  { %1658 = vmatpush2.bf16.msra.mxu1 %v1265_v57  ;;  %v191_v57 = vadd.f32 %v1947_v63, %v2447_v50  ;;  %v1815_v50 = vld [vmem:[%s4392_s9 + $0x1f8] sm:$0xff] }
 0x4e6   :  { %1699 = vmatpush2.bf16.msra.mxu0 %v1329_v11  ;;  %v1795_v63 = vld [vmem:[%s4392_s9 + $0x158] sm:$0xff] }
 0x4e7   :  { %v197_v11 = vsel %vm196_vm3, %v191_v57, -inf }
 0x4e8   :  { %1660 = vmatmul.mubr.bf16.vlgmr.msra.gmra.mxu1 %v3378_v22  ;;  %v1415_v16 = vpop.f32.mrf.mxu1  ;;  %v1456_v17 = vpop.f32.mrf.mxu0 }
 0x4e9   :  { %1701 = vmatmul.mubr.bf16.vlgmr.msra.gmra.mxu0 %v3380_v20  ;;  %v1416_v24 = vadd.f32 %v1415_v16, %v1364_v15  ;;  %v1783_v15 = vld [vmem:[%s4392_s9 + $0xf8] sm:$0xff] }
 0x4ea   :  { %v1417_v18 = vpop.f32.mrf.mxu1  ;;  %v1458_v61 = vpop.f32.mrf.mxu0  ;;  %v1831_v16 = vpack.c.bf16 %v1783_v15, %v1782_v60  ;;  %v1761_v60 = vld [vmem:[%s4392_s9 + $0x48] sm:$0xff] }
 0x4eb   :  { %v1457_v26 = vadd.f32 %v1456_v17, %v1416_v24  ;;  %v1418_v36 = vadd.f32 %v1417_v18, %v1368_v12  ;;  %v1814_v12 = vld [vmem:[%s4392_s9 + $0x1f0] sm:$0xff]  ;;  %v1767_v24 = vld [vmem:[%s4392_s9 + $0x78] sm:$0xff] }
 0x4ec   :  { %v1419_v52 = vpop.f32.mrf.mxu1  ;;  %v1460_v19 = vpop.f32.mrf.mxu0  ;;  %v1766_v17 = vld [vmem:[%s4392_s9 + $0x70] sm:$0xff]  ;;  %v1847_v18 = vpack.c.bf16 %v1815_v50, %v1814_v12  ;;  %1967 = vmatprep.subr.bf16.mxu1 %v1831_v16  ;;  %v1792_v16 = vld [vmem:[%s4392_s9 + $0x140] sm:$0xff]  ;;  %v1793_v50 = vld [vmem:[%s4392_s9 + $0x148] sm:$0xff] }
 0x4ed   :  { %v1459_v27 = vadd.f32 %v1458_v61, %v1418_v36  ;;  %v1823_v61 = vpack.c.bf16 %v1767_v24, %v1766_v17  ;;  %v1799_v36 = vld [vmem:[%s4392_s9 + $0x178] sm:$0xff]  ;;  %v1780_v52 = vld [vmem:[%s4392_s9 + $0xe0] sm:$0xff]  ;;  %v1774_v17 = vld [vmem:[%s4392_s9 + $0xb0] sm:$0xff]  ;;  %v1836_v24 = vpack.c.bf16 %v1793_v50, %v1792_v16 }
 0x4ee   :  { %v1420_v37 = vpop.f32.mrf.mxu1  ;;  %v1461_v45 = vpop.f32.mrf.mxu0  ;;  %1989 = vmatprep.subr.bf16.mxu0 %v1847_v18  ;;  %v1775_v18 = vld [vmem:[%s4392_s9 + $0xb8] sm:$0xff] }
 0x4ef   :  { %v1812_v37 = vld [vmem:[%s4392_s9 + $0x1e0] sm:$0xff]  ;;  %v1813_v45 = vld [vmem:[%s4392_s9 + $0x1e8] sm:$0xff]  ;;  %1968 = vmatpush3.bf16.msra.mxu1 %v1823_v61  ;;  %v1806_v61 = vld [vmem:[%s4392_s9 + $0x1b0] sm:$0xff] }
 0x528   :  { %v1497_v28 = vpop.f32.mrf.mxu1  ;;  %v1538_v29 = vpop.f32.mrf.mxu0 }
 0x529   :  { %v1498_v30 = vadd.f32 %v1497_v28, %v1457_v26  ;;  %v1798_v26 = vld [vmem:[%s4392_s9 + $0x170] sm:$0xff] }
 0x52a   :  { %v1499_v46 = vpop.f32.mrf.mxu1  ;;  %v1540_v25 = vpop.f32.mrf.mxu0  ;;  %v1839_v19 = vpack.c.bf16 %v1799_v36, %v1798_v26  ;;  %v1807_v26 = vld [vmem:[%s4392_s9 + $0x1b8] sm:$0xff]  ;;  %v1827_v36 = vpack.c.bf16 %v1775_v18, %v1774_v17 }
 0x52b   :  { %v4131_v22 = vadd.f32 %v1538_v29, %v1498_v30  ;;  %v1500_v31 = vadd.f32 %v1499_v46, %v1459_v27  ;;  %v1781_v27 = vld [vmem:[%s4392_s9 + $0xe8] sm:$0xff]  ;;  %v1846_v29 = vpack.c.bf16 %v1813_v45, %v1812_v37  ;;  %v1764_v30 = vld [vmem:[%s4392_s9 + $0x60] sm:$0xff]  ;;  %v1790_v37 = vld [vmem:[%s4392_s9 + $0x130] sm:$0xff] }
 0x52c   :  { %v1501_v32 = vpop.f32.mrf.mxu1  ;;  %v1542_v20 = vpop.f32.mrf.mxu0  ;;  %v1830_v28 = vpack.c.bf16 %v1781_v27, %v1780_v52  ;;  %v1765_v46 = vld [vmem:[%s4392_s9 + $0x68] sm:$0xff]  ;;  %1990 = vmatpush3.bf16.msra.mxu0 %v1839_v19  ;;  %v1843_v52 = vpack.c.bf16 %v1807_v26, %v1806_v61  ;;  %v1758_v19 = vld [vmem:[%s4392_s9 + $0x30] sm:$0xff]  ;;  %v1759_v27 = vld [vmem:[%s4392_s9 + $0x38] sm:$0xff] }
 0x52d   :  { %v4133_v33 = vadd.f32 %v1540_v25, %v1500_v31  ;;  %v1709_v13 = vsel %vm108_vm2, %v4131_v22, 0.0  ;;  %v1796_v25 = vld [vmem:[%s4392_s9 + $0x160] sm:$0xff]  ;;  %v1822_v31 = vpack.c.bf16 %v1765_v46, %v1764_v30  ;;  %v1797_v32 = vld [vmem:[%s4392_s9 + $0x168] sm:$0xff]  ;;  %1991 = vmatprep.subr.bf16.mxu0 %v1846_v29  ;;  %v1819_v45 = vpack.c.bf16 %v1759_v27, %v1758_v19 }
 0x52e   :  { %v1502_v34 = vpop.f32.mrf.mxu1  ;;  %v1543_v35 = vpop.f32.mrf.mxu0  ;;  %1969 = vmatprep.subr.bf16.mxu1 %v1830_v28  ;;  %v1838_v20 = vpack.c.bf16 %v1797_v32, %v1796_v25  ;;  %v1791_v28 = vld [vmem:[%s4392_s9 + $0x138] sm:$0xff]  ;;  %v1772_v30 = vld [vmem:[%s4392_s9 + $0xa0] sm:$0xff]  ;;  %v1773_v46 = vld [vmem:[%s4392_s9 + $0xa8] sm:$0xff] }
 0x52f   :  { %v1710_v56 = vsel %vm108_vm2, %v4133_v33, 0.0  ;;  %1970 = vmatpush3.bf16.msra.mxu1 %v1822_v31  ;;  %v1835_v29 = vpack.c.bf16 %v1791_v28, %v1790_v37  ;;  %v1804_v25 = vld [vmem:[%s4392_s9 + $0x1a0] sm:$0xff]  ;;  %v1826_v31 = vpack.c.bf16 %v1773_v46, %v1772_v30  ;;  %v1805_v32 = vld [vmem:[%s4392_s9 + $0x1a8] sm:$0xff] }
 0x530   :  { %v1711_v7 = vadd.f32 %v1710_v56, %v1709_v13  ;;  %1992 = vmatpush3.bf16.msra.mxu0 %v1838_v20  ;;  %v1779_v13 = vld [vmem:[%s4392_s9 + $0xd8] sm:$0xff]  ;;  %v1756_v20 = vld [vmem:[%s4392_s9 + $0x20] sm:$0xff] }
 0x568   :  { %v1579_v38 = vpop.f32.mrf.mxu1 }
 0x569   :  { %v1620_v39 = vpop.f32.mrf.mxu0  ;;  %v1580_v48 = vadd.f32 %v1579_v38, %v1372_v47 }
 0x56a   :  { %v1581_v40 = vpop.f32.mrf.mxu1 }
 0x56b   :  { %v1622_v41 = vpop.f32.mrf.mxu0  ;;  %v1582_v51 = vadd.f32 %v1581_v40, %v1376_v14  ;;  %v1621_v53 = vadd.f32 %v1620_v39, %v1580_v48 }
 0x56c   :  { %v1583_v42 = vpop.f32.mrf.mxu1 }
 0x56d   :  { %v1624_v21 = vpop.f32.mrf.mxu0  ;;  %v1623_v1 = vadd.f32 %v1622_v41, %v1582_v51 }
 0x56e   :  { %v1584_v23 = vpop.f32.mrf.mxu1 }
 0x56f   :  { %v1625_v43 = vpop.f32.mrf.mxu0 }
 0x5a8   :  { %v1661_v55 = vpop.f32.mrf.mxu1 }
 0x5a9   :  { %v1662_v2 = vadd.f32 %v1661_v55, %v1621_v53  ;;  %v1702_v0 = vpop.f32.mrf.mxu0 }
 0x5aa   :  { %v1663_v59 = vpop.f32.mrf.mxu1 }
 0x5ab   :  { %v1703_v4 = vadd.f32 %v1702_v0, %v1662_v2  ;;  %v1664_v6 = vadd.f32 %v1663_v59, %v1623_v1  ;;  %v1704_v49 = vpop.f32.mrf.mxu0  ;;  %v1778_v59 = vld [vmem:[%s4392_s9 + $0xd0] sm:$0xff] }
 0x5ac   :  { %v1665_v44 = vpop.f32.mrf.mxu1 }
 0x5ad   :  { %v1712_v54 = vsel %vm108_vm2, %v1703_v4, 0.0  ;;  %v1705_v8 = vadd.f32 %v1704_v49, %v1664_v6  ;;  %v1706_v9 = vpop.f32.mrf.mxu0  ;;  %v1829_v6 = vpack.c.bf16 %v1779_v13, %v1778_v59  ;;  %v1811_v49 = vld [vmem:[%s4392_s9 + $0x1d8] sm:$0xff]  ;;  %v1768_v13 = vld [vmem:[%s4392_s9 + $0x80] sm:$0xff] }
 0x5ae   :  { %v1666_v5 = vpop.f32.mrf.mxu1  ;;  %v1713_v3 = vadd.f32 %v1712_v54, %v1711_v7  ;;  %v1762_v7 = vld [vmem:[%s4392_s9 + $0x50] sm:$0xff]  ;;  %v1763_v44 = vld [vmem:[%s4392_s9 + $0x58] sm:$0xff] }
 0x5af   :  { %v1707_v10 = vpop.f32.mrf.mxu0  ;;  %v1714_v58 = vsel %vm108_vm2, %v1705_v8, 0.0  ;;  %v1794_v9 = vld [vmem:[%s4392_s9 + $0x150] sm:$0xff]  ;;  %1971 = vmatprep.subr.bf16.mxu1 %v1829_v6  ;;  %v1800_v6 = vld [vmem:[%s4392_s9 + $0x180] sm:$0xff] }
 0x5b0   :  { %v1715_v62 = vadd.f32 %v1714_v58, %v1713_v3  ;;  %v1837_v5 = vpack.c.bf16 %v1795_v63, %v1794_v9  ;;  %v1776_v3 = vld [vmem:[%s4392_s9 + $0xc0] sm:$0xff]  ;;  %v1777_v10 = vld [vmem:[%s4392_s9 + $0xc8] sm:$0xff] }
 0x5b1   :  { %v1808_v58 = vld [vmem:[%s4392_s9 + $0x1c0] sm:$0xff] }
 0x5b2   :  { %1716 = vadd.xlane.f32.xlu0 %v1715_v62  ;;  %v1828_v62 = vpack.c.bf16 %v1777_v10, %v1776_v3  ;;  %v1784_v63 = vld [vmem:[%s4392_s9 + $0x100] sm:$0xff] }
 0x5b6   :  { %198 = vmax.xlane.f32.xlu0 %v197_v11  ;;  %v1760_v11 = vld [vmem:[%s4392_s9 + $0x40] sm:$0xff] }
 0x5b7   :  { %v1820_v12 = vpack.c.bf16 %v1761_v60, %v1760_v11 }
 0x63b   :  { %v1717_v34 = vpop.xlane.xlu0 %1716 }
 0x63c   :  { %v1719_v35 = vmul.f32 0.001953125, %v1717_v34  ;;  %v1757_v34 = vld [vmem:[%s4392_s9 + $0x28] sm:$0xff] }
 0x63e   :  { %v4199_v38 = vsub.f32 %v4131_v22, %v1719_v35  ;;  %v4202_v39 = vsub.f32 %v4133_v33, %v1719_v35  ;;  %v4204_v40 = vsub.f32 %v1703_v4, %v1719_v35  ;;  %v4206_v41 = vsub.f32 %v1705_v8, %v1719_v35  ;;  %v1810_v4 = vld [vmem:[%s4392_s9 + $0x1d0] sm:$0xff] }
 0x63f   :  { %v199_v42 = vpop.xlane.xlu0 %198  ;;  %v1845_v54 = vpack.c.bf16 %v1811_v49, %v1810_v4  ;;  %v1821_v8 = vpack.c.bf16 %v1763_v44, %v1762_v7  ;;  %v1842_v35 = vpack.c.bf16 %v1805_v32, %v1804_v25  ;;  %v1769_v4 = vld [vmem:[%s4392_s9 + $0x88] sm:$0xff]  ;;  %v1752_v44 = vld [vmem:[%s4392_s9] sm:$0xff] }
 0x640   :  { %v4208_v21 = vsub.f32 %v191_v57, %v199_v42  ;;  %v1724_v23 = vmul.f32 %v4199_v38, %v4199_v38  ;;  %v1725_v43 = vmul.f32 %v4202_v39, %v4202_v39  ;;  %v1726_v22 = vmul.f32 %v4204_v40, %v4204_v40  ;;  %v1809_v57 = vld [vmem:[%s4392_s9 + $0x1c8] sm:$0xff] }
 0x641   :  { %v1727_v33 = vmul.f32 %v4206_v41, %v4206_v41  ;;  %1993 = vmatprep.subr.bf16.mxu0 %v1845_v54  ;;  %1972 = vmatpush3.bf16.msra.mxu1 %v1821_v8  ;;  %v1844_v15 = vpack.c.bf16 %v1809_v57, %v1808_v58  ;;  %v1818_v42 = vpack.c.bf16 %v1757_v34, %v1756_v20  ;;  %v1801_v7 = vld [vmem:[%s4392_s9 + $0x188] sm:$0xff] }
 0x642   :  { %v201_v47 = vmul.f32 1.442695, %v4208_v21  ;;  %v1728_v14 = vsel %vm108_vm2, %v1724_v23, 0.0  ;;  %v1729_v48 = vsel %vm108_vm2, %v1725_v43, 0.0  ;;  %v1731_v53 = vsel %vm108_vm2, %v1726_v22, 0.0  ;;  %1994 = vmatpush3.bf16.msra.mxu0 %v1837_v5  ;;  %1973 = vmatprep.subr.bf16.mxu1 %v1828_v62  ;;  %v1788_v23 = vld [vmem:[%s4392_s9 + $0x120] sm:$0xff] }
 0x643   :  { %v1730_v51 = vadd.f32 %v1729_v48, %v1728_v14  ;;  %v1733_v56 = vsel %vm108_vm2, %v1727_v33, 0.0  ;;  %1995 = vmatprep.subr.bf16.mxu0 %v1844_v15  ;;  %v1789_v43 = vld [vmem:[%s4392_s9 + $0x128] sm:$0xff]  ;;  %v1771_v33 = vld [vmem:[%s4392_s9 + $0x98] sm:$0xff]  ;;  %v1802_v14 = vld [vmem:[%s4392_s9 + $0x190] sm:$0xff]  ;;  %v1824_v49 = vpack.c.bf16 %v1769_v4, %v1768_v13  ;;  %v1840_v8 = vpack.c.bf16 %v1801_v7, %v1800_v6 }
 0x644   :  { %2050 = vpow2.f32 %v201_v47  ;;  %v1834_v22 = vpack.c.bf16 %v1789_v43, %v1788_v23  ;;  %v1770_v47 = vld [vmem:[%s4392_s9 + $0x90] sm:$0xff]  ;;  %v1753_v54 = vld [vmem:[%s4392_s9 + $0x8] sm:$0xff] }
 0x645   :  { %v1732_v55 = vadd.f32 %v1731_v53, %v1730_v51  ;;  %1974 = vmatpush3.bf16.msra.mxu1 %v1820_v12  ;;  %v1825_v48 = vpack.c.bf16 %v1771_v33, %v1770_v47  ;;  %v1803_v51 = vld [vmem:[%s4392_s9 + $0x198] sm:$0xff]  ;;  %v1754_v53 = vld [vmem:[%s4392_s9 + $0x10] sm:$0xff]  ;;  %v1816_v9 = vpack.c.bf16 %v1753_v54, %v1752_v44  ;;  %v1785_v5 = vld [vmem:[%s4392_s9 + $0x108] sm:$0xff] }
 0x646   :  { %1996 = vmatpush3.bf16.msra.mxu0 %v1836_v24  ;;  %1975 = vmatprep.subr.bf16.mxu1 %v1827_v36  ;;  %v1832_v3 = vpack.c.bf16 %v1785_v5, %v1784_v63 }
 0x647   :  { %v1734_v1 = vadd.f32 %v1733_v56, %v1732_v55  ;;  %1997 = vmatprep.subr.bf16.mxu0 %v1843_v52  ;;  %v1755_v55 = vld [vmem:[%s4392_s9 + $0x18] sm:$0xff]  ;;  %v1841_v56 = vpack.c.bf16 %v1803_v51, %v1802_v14 }
 0x649   :  { %1735 = vadd.xlane.f32.xlu1 %v1734_v1  ;;  %1976 = vmatpush3.bf16.msra.mxu1 %v1819_v45  ;;  %v1817_v1 = vpack.c.bf16 %v1755_v55, %v1754_v53 }
 0x64a   :  { %1998 = vmatpush3.bf16.msra.mxu0 %v1835_v29  ;;  %1977 = vmatprep.subr.bf16.mxu1 %v1826_v31 }
 0x64b   :  { %1999 = vmatprep.subr.bf16.mxu0 %v1842_v35 }
 0x64d   :  { %1978 = vmatpush3.bf16.msra.mxu1 %v1818_v42 }
 0x64e   :  { %2000 = vmatpush3.bf16.msra.mxu0 %v1834_v22  ;;  %1979 = vmatprep.subr.bf16.mxu1 %v1825_v48 }
 0x64f   :  { %2001 = vmatprep.subr.bf16.mxu0 %v1841_v56 }
 0x651   :  { %v2051_v2 = vpop.eup %2050  ;;  %1980 = vmatpush3.bf16.msra.mxu1 %v1817_v1 }
 0x652   :  { %v203_v0 = vsel %vm196_vm3, %v2051_v2, 0.0  ;;  %v1786_v2 = vld [vmem:[%s4392_s9 + $0x110] sm:$0xff]  ;;  %1981 = vmatprep.subr.bf16.mxu1 %v1824_v49 }
 0x653   :  { %204 = vadd.xlane.f32.xlu1 %v203_v0  ;;  %v1787_v0 = vld [vmem:[%s4392_s9 + $0x118] sm:$0xff] }
 0x654   :  { %v1833_v59 = vpack.c.bf16 %v1787_v0, %v1786_v2 }
 0x655   :  { %1982 = vmatpush3.bf16.msra.mxu1 %v1816_v9 }
 0x656   :  { %2002 = vmatpush3.bf16.msra.mxu0 %v1833_v59 }
 0x657   :  { %2003 = vmatprep.subr.bf16.mxu0 %v1840_v8 }
 0x65a   :  { %2004 = vmatpush3.bf16.msra.mxu0 %v1832_v3 }
 0x6d2   :  { %v1736_v10 = vpop.xlane.xlu1 %1735 }
 0x6d3   :  { %v1737_v58 = vmul.f32 0.001953125, %v1736_v10 }
 0x6d5   :  { %v1738_v62 = vadd.f32 1e-05, %v1737_v58 }
 0x6d7   :  { %2052 = vrsqrt.f32 %v1738_v62 }
 0x6dc   :  { %v205_v57 = vpop.xlane.xlu1 %204 }
 0x6dd   :  { %2054 = vlog2.f32 %v205_v57 }
 0x6e4   :  { %v2053_v11 = vpop.eup %2052 }
 0x6e5   :  { %v1741_v60 = vmul.f32 %v2053_v11, %v4202_v39  ;;  %v1743_v15 = vmul.f32 %v2053_v11, %v4206_v41  ;;  %v1740_v12 = vmul.f32 %v2053_v11, %v4199_v38  ;;  %v1742_v16 = vmul.f32 %v2053_v11, %v4204_v40 }
 0x6e6   :  { %v18_v38 = vstv %s4394_s10 }
 0x6e7   :  { %v1745_v50 = vmax.f32 %v1741_v60, 0.0  ;;  %v1747_v17 = vmax.f32 %v1743_v15, 0.0  ;;  %v1744_v24 = vmax.f32 %v1740_v12, 0.0  ;;  %v1746_v18 = vmax.f32 %v1742_v16, 0.0  ;;  %19 = vst [vmem:[#allocation2] sm:$0x1] %v18_v38 }
 0x6e9   :  { %v1749_v61 = vpack.c.bf16 %v1745_v50, %v1745_v50  ;;  %v1751_v26 = vpack.c.bf16 %v1747_v17, %v1747_v17  ;;  %v1748_v36 = vpack.c.bf16 %v1744_v24, %v1744_v24  ;;  %v1750_v52 = vpack.c.bf16 %v1746_v18, %v1746_v18 }
 0x6ea   :  { %v2055_v19 = vpop.eup %2054 }
 0x6eb   :  { %v207_v27 = vmul.f32 0.6931472, %v2055_v19  ;;  %1887 = vmatprep.mubr.bf16.mxu1 %v1749_v61  ;;  %1927 = vmatprep.mubr.bf16.mxu0 %v1751_v26 }
 0x6ec   :  { %1888 = vmatmul.mubr.bf16.vlgmr.msra.gmra.mxu1 %v1748_v36  ;;  %1928 = vmatmul.mubr.bf16.vlgmr.msra.gmra.mxu0 %v1750_v52 }
 0x6ed   :  { %v208_v39 = vsub.f32 %v4208_v21, %v207_v27 }
 0x6ee   :  { %v1952_v37 = vld [vmem:[#allocation2] ss:$0 sm:$0xff] }
 0x6ef   :  { %209 = vst.msk [vmem:[%s4393_s11] sm:$0x3] %vm196_vm3, %v208_v39 }
 0x7ac   :  { %v1983_v40 = vpop.f32.mrf.mxu1  ;;  %v2005_v41 = vpop.f32.mrf.mxu0 }
 0x7ae   :  { %v1984_v45 = vpop.f32.mrf.mxu1  ;;  %v2006_v28 = vpop.f32.mrf.mxu0 }
 0x7af   :  { %v1985_v29 = vadd.f32 %v1984_v45, %v1983_v40  ;;  %v2007_v21 = vadd.f32 %v2006_v28, %v2005_v41 }
 0x7b0   :  { %v1986_v30 = vpop.f32.mrf.mxu1  ;;  %v2008_v46 = vpop.f32.mrf.mxu0 }
 0x7b1   :  { %v1890_v25 = vadd.f32 %v1985_v29, %v1952_v37 }
 0x7b2   :  { %v1987_v31 = vpop.f32.mrf.mxu1  ;;  %v2009_v32 = vpop.f32.mrf.mxu0 }
 0x7b3   :  { %v1930_v20 = vadd.f32 %v2007_v21, %v1890_v25 }
 0x7b5   :  { %1936 = vst.msk [vmem:[%s4395_s12] sm:$0x3] %vm1935_vm4, %v1930_v20 }

</bundles_post_ra>
